<compile_context>
chip_gen: v5e
topology: v5e:2x2
jax: 0.10.0
libtpu: 0.0.40
codegen_flags: <defaults>
</compile_context>

<pallas_src>
import functools
import math

import jax
import jax.numpy as jnp
from jax.experimental import pallas as pl
from jax.experimental.pallas import tpu as pltpu


# ----------------------------------------------------------------------------
# Pallas kernel: one grid step == TM sequences, flattened to (TM*S, F) rows.
# Fuses: fused QKV projection, per-head scaled-dot-product attention
# (batched over TM sequences), output projection, and the 2-layer MLP w/ ReLU.
# ----------------------------------------------------------------------------
def _sib_kernel(x_ref, wqkv_ref, bqkv_ref, wo_ref, bo_ref,
                w1_ref, b1_ref, w2_ref, b2_ref, o_ref,
                *, num_heads: int, head_dim: int, seq_len: int):
    x = x_ref[...]                                   # (TM*S, F) fp32
    rows, feat = x.shape
    tm = rows // seq_len

    # Fused QKV projection (1/sqrt(Dh) already folded into the Q columns).
    qkv = jnp.dot(x, wqkv_ref[...], preferred_element_type=jnp.float32)
    qkv = qkv + bqkv_ref[...]                        # (TM*S, 3F)
    q = qkv[:, :feat]
    k = qkv[:, feat:2 * feat]
    v = qkv[:, 2 * feat:]

    # Per-head attention, batched over TM sequences via 3-D einsums.
    # Output projection is accumulated per head to avoid a lane concatenate:
    #   concat_h(O_h) @ WoT == sum_h O_h @ WoT[h*Dh:(h+1)*Dh, :]
    attn = jnp.zeros((rows, feat), jnp.float32)
    for h in range(num_heads):                       # static unroll, H small
        lo = h * head_dim
        hi = lo + head_dim
        qh = q[:, lo:hi].reshape(tm, seq_len, head_dim)
        kh = k[:, lo:hi].reshape(tm, seq_len, head_dim)
        vh = v[:, lo:hi].reshape(tm, seq_len, head_dim)
        s = jnp.einsum("bqd,bkd->bqk", qh, kh,
                       preferred_element_type=jnp.float32)       # (TM, S, S)
        s = s - jnp.max(s, axis=-1, keepdims=True)
        p = jnp.exp(s)
        inv = pl.reciprocal(jnp.sum(p, axis=-1, keepdims=True), approx=False)
        p = p * inv
        oh = jnp.einsum("bqk,bkd->bqd", p, vh,
                        preferred_element_type=jnp.float32)      # (TM, S, Dh)
        attn = attn + jnp.dot(oh.reshape(rows, head_dim), wo_ref[lo:hi, :],
                              preferred_element_type=jnp.float32)
    attn = attn + bo_ref[...]

    # MLP: Linear -> ReLU -> Linear (weights pre-transposed to (in, out)).
    h1 = jnp.dot(attn, w1_ref[...], preferred_element_type=jnp.float32) + b1_ref[...]
    h1 = jnp.maximum(h1, 0.0)
    out = jnp.dot(h1, w2_ref[...], preferred_element_type=jnp.float32) + b2_ref[...]

    o_ref[...] = out.astype(o_ref.dtype)


# ----------------------------------------------------------------------------
# One-time parameter transform (torch layout -> kernel layout).
# ----------------------------------------------------------------------------
def prepare_params(params, *, num_heads: int):
    wq, wk, wv, bq, bk, bv, wo, bo, w1, b1, w2, b2 = params
    F = wq.shape[0]
    head_dim = F // num_heads
    scale = 1.0 / math.sqrt(head_dim)
    wqkv = jnp.concatenate([wq * scale, wk, wv], axis=0).T        # (F, 3F)
    bqkv = jnp.concatenate([bq * scale, bk, bv], axis=1)          # (1, 3F)
    return (wqkv, bqkv, wo.T, bo, w1.T, b1, w2.T, b2)


def sensor_interaction_block(x, kparams, *, num_heads: int):
    """x: (B, F, L, S) float32 -> (B, F, L, S), matching the PyTorch module.

    `kparams` must come from prepare_params()."""
    B, F, L, S = x.shape
    head_dim = F // num_heads
    assert head_dim * num_heads == F
    M = B * L

    # torch .view on a contiguous tensor == row-major reshape. Flatten all
    # tokens so the kernel works on (rows, F) slabs (rows multiple of 8).
    x2d = jnp.reshape(x, (M * S, F))

    wqkv, bqkv, wo_t, bo, w1_t, b1, w2_t, b2 = kparams
    mlp_dim = w1_t.shape[1]

    # TM sequences per grid step: largest divisor of M with <= ~1024 rows,
    # comfortably inside VMEM (even at v7x's 64 MiB) with default buffering.
    tm = 1
    for d in range(1, M + 1):
        if M % d == 0 and d * S <= 1024:
            tm = d
    grid = (M // tm,)
    rows = tm * S

    full = lambda shape: pl.BlockSpec(shape, lambda i: tuple(0 for _ in shape))

    kernel = functools.partial(_sib_kernel, num_heads=num_heads,
                               head_dim=head_dim, seq_len=S)

    out2d = pl.pallas_call(
        kernel,
        out_shape=jax.ShapeDtypeStruct((M * S, F), x.dtype),
        grid_spec=pltpu.PrefetchScalarGridSpec(
            num_scalar_prefetch=0,
            grid=grid,
            in_specs=[
                pl.BlockSpec((rows, F), lambda i: (i, 0)),     # x slab
                full((F, 3 * F)), full((1, 3 * F)),            # fused Wqkv, bqkv
                full((F, F)), full((1, F)),                    # Wo^T, bo
                full((F, mlp_dim)), full((1, mlp_dim)),        # W1^T, b1
                full((mlp_dim, F)), full((1, F)),              # W2^T, b2
            ],
            out_specs=pl.BlockSpec((rows, F), lambda i: (i, 0)),
        ),
        compiler_params=pltpu.CompilerParams(
            dimension_semantics=("parallel",)),
    )(x2d, wqkv, bqkv, wo_t, bo, w1_t, b1, w2_t, b2)

    return jnp.reshape(out2d, (B, F, L, S))


# ----------------------------------------------------------------------------
# Pure-JAX reference (mirrors nn.MultiheadAttention + nn.Sequential MLP).
# ----------------------------------------------------------------------------
def reference(x, params, *, num_heads: int):
    B, F, L, S = x.shape
    head_dim = F // num_heads
    wq, wk, wv, bq, bk, bv, wo, bo, w1, b1, w2, b2 = params
    xs = jnp.reshape(x, (B * L, S, F))
    q = xs @ wq.T + bq[0]
    k = xs @ wk.T + bk[0]
    v = xs @ wv.T + bv[0]
    M = B * L
    q = q.reshape(M, S, num_heads, head_dim).transpose(0, 2, 1, 3)
    k = k.reshape(M, S, num_heads, head_dim).transpose(0, 2, 1, 3)
    v = v.reshape(M, S, num_heads, head_dim).transpose(0, 2, 1, 3)
    s = jnp.einsum("mhqd,mhkd->mhqk", q, k) / math.sqrt(head_dim)
    p = jax.nn.softmax(s, axis=-1)
    o = jnp.einsum("mhqk,mhkd->mhqd", p, v).transpose(0, 2, 1, 3).reshape(M, S, F)
    o = o @ wo.T + bo[0]
    h1 = jax.nn.relu(o @ w1.T + b1[0])
    out = h1 @ w2.T + b2[0]
    return jnp.reshape(out, (B, F, L, S))


def init_params(key, num_filters, mlp_dim):
    F = num_filters
    ks = jax.random.split(key, 12)
    s = 0.1
    wq = jax.random.normal(ks[0], (F, F), jnp.float32) * s
    wk = jax.random.normal(ks[1], (F, F), jnp.float32) * s
    wv = jax.random.normal(ks[2], (F, F), jnp.float32) * s
    bq = jax.random.normal(ks[3], (1, F), jnp.float32) * s
    bk = jax.random.normal(ks[4], (1, F), jnp.float32) * s
    bv = jax.random.normal(ks[5], (1, F), jnp.float32) * s
    wo = jax.random.normal(ks[6], (F, F), jnp.float32) * s
    bo = jax.random.normal(ks[7], (1, F), jnp.float32) * s
    w1 = jax.random.normal(ks[8], (mlp_dim, F), jnp.float32) * s
    b1 = jax.random.normal(ks[9], (1, mlp_dim), jnp.float32) * s
    w2 = jax.random.normal(ks[10], (F, mlp_dim), jnp.float32) * s
    b2 = jax.random.normal(ks[11], (1, F), jnp.float32) * s
    return (wq, wk, wv, bq, bk, bv, wo, bo, w1, b1, w2, b2)


if __name__ == "__main__":
    # Small shapes consistent with the module: x is (B, num_filters, length, num_sensors).
    B, num_filters, length, num_sensors = 2, 32, 8, 8
    num_heads, mlp_dim = 4, 64

    key = jax.random.PRNGKey(0)
    k_x, k_p = jax.random.split(key)
    x = jax.random.normal(k_x, (B, num_filters, length, num_sensors), jnp.float32)
    params = init_params(k_p, num_filters, mlp_dim)

    # One-time parameter prep (transpose / QKV fusion / scale folding).
    kparams = prepare_params(params, num_heads=num_heads)

    out = sensor_interaction_block(x, kparams, num_heads=num_heads)
    out = jax.block_until_ready(out)

    ref = jax.block_until_ready(reference(x, params, num_heads=num_heads))
    assert out.shape == (B, num_filters, length, num_sensors)
    assert jnp.allclose(out, ref, atol=1e-4, rtol=1e-4), "mismatch vs reference"

    print("KERNEL_OK")
</pallas_src>

<mosaic_0001>
module attributes {stable_mosaic.version = 11 : i64} {
  func.func @_sib_kernel(%arg0: i32, %arg1: memref<128x32xf32, #tpu.memory_space<vmem>>, %arg2: memref<32x96xf32, #tpu.memory_space<vmem>>, %arg3: memref<1x96xf32, #tpu.memory_space<vmem>>, %arg4: memref<32x32xf32, #tpu.memory_space<vmem>>, %arg5: memref<1x32xf32, #tpu.memory_space<vmem>>, %arg6: memref<32x64xf32, #tpu.memory_space<vmem>>, %arg7: memref<1x64xf32, #tpu.memory_space<vmem>>, %arg8: memref<64x32xf32, #tpu.memory_space<vmem>>, %arg9: memref<1x32xf32, #tpu.memory_space<vmem>>, %arg10: memref<128x32xf32, #tpu.memory_space<vmem>>) attributes {dimension_semantics = [#tpu.dimension_semantics<parallel>], iteration_bounds = array<i64: 1>, scalar_prefetch = 0 : i64, scratch_operands = 0 : i64, tpu.core_type = #tpu.core_type<tc>, window_params = [{transform_indices = @transform_0, window_bounds = array<i64: 128, 32>}, {pipeline_mode = #tpu.pipeline_mode<synchronous>, transform_indices = @transform_1, window_bounds = array<i64: 32, 96>}, {pipeline_mode = #tpu.pipeline_mode<synchronous>, transform_indices = @transform_2, window_bounds = array<i64: 1, 96>}, {pipeline_mode = #tpu.pipeline_mode<synchronous>, transform_indices = @transform_3, window_bounds = array<i64: 32, 32>}, {pipeline_mode = #tpu.pipeline_mode<synchronous>, transform_indices = @transform_4, window_bounds = array<i64: 1, 32>}, {pipeline_mode = #tpu.pipeline_mode<synchronous>, transform_indices = @transform_5, window_bounds = array<i64: 32, 64>}, {pipeline_mode = #tpu.pipeline_mode<synchronous>, transform_indices = @transform_6, window_bounds = array<i64: 1, 64>}, {pipeline_mode = #tpu.pipeline_mode<synchronous>, transform_indices = @transform_7, window_bounds = array<i64: 64, 32>}, {pipeline_mode = #tpu.pipeline_mode<synchronous>, transform_indices = @transform_8, window_bounds = array<i64: 1, 32>}, {transform_indices = @transform_9, window_bounds = array<i64: 128, 32>}]} {
    %c0 = arith.constant 0 : index
    %c0_0 = arith.constant 0 : index
    %0 = vector.load %arg1[%c0, %c0_0] : memref<128x32xf32, #tpu.memory_space<vmem>>, vector<128x32xf32>
    %c0_1 = arith.constant 0 : index
    %c0_2 = arith.constant 0 : index
    %1 = vector.load %arg2[%c0_1, %c0_2] : memref<32x96xf32, #tpu.memory_space<vmem>>, vector<32x96xf32>
    %cst = arith.constant dense<0.000000e+00> : vector<128x96xf32>
    %2 = tpu.matmul %0, %1, %cst {dimension_numbers = #tpu.dot_dimension_numbers<[1], [0], [0], [1], [0, 0, 1, 1], [], []>} : vector<128x32xf32>, vector<32x96xf32>, vector<128x96xf32> -> vector<128x96xf32>
    %c0_3 = arith.constant 0 : index
    %c0_4 = arith.constant 0 : index
    %3 = vector.load %arg3[%c0_3, %c0_4] : memref<1x96xf32, #tpu.memory_space<vmem>>, vector<1x96xf32>
    %4 = vector.broadcast %3 : vector<1x96xf32> to vector<128x96xf32>
    %5 = arith.addf %2, %4 : vector<128x96xf32>
    %6 = vector.extract_strided_slice %5 {offsets = [0, 0], sizes = [128, 32], strides = [1, 1]} : vector<128x96xf32> to vector<128x32xf32>
    %7 = vector.extract_strided_slice %5 {offsets = [0, 32], sizes = [128, 32], strides = [1, 1]} : vector<128x96xf32> to vector<128x32xf32>
    %8 = vector.extract_strided_slice %5 {offsets = [0, 64], sizes = [128, 32], strides = [1, 1]} : vector<128x96xf32> to vector<128x32xf32>
    %cst_5 = arith.constant 0.000000e+00 : f32
    %9 = vector.broadcast %cst_5 : f32 to vector<128x32xf32>
    %10 = vector.extract_strided_slice %6 {offsets = [0, 0], sizes = [128, 8], strides = [1, 1]} : vector<128x32xf32> to vector<128x8xf32>
    %11 = vector.shape_cast %10 : vector<128x8xf32> to vector<16x8x8xf32>
    %12 = vector.extract_strided_slice %7 {offsets = [0, 0], sizes = [128, 8], strides = [1, 1]} : vector<128x32xf32> to vector<128x8xf32>
    %13 = vector.shape_cast %12 : vector<128x8xf32> to vector<16x8x8xf32>
    %14 = vector.extract_strided_slice %8 {offsets = [0, 0], sizes = [128, 8], strides = [1, 1]} : vector<128x32xf32> to vector<128x8xf32>
    %15 = vector.shape_cast %14 : vector<128x8xf32> to vector<16x8x8xf32>
    "tpu.trace_start"() <{level = 10 : i32, message = "bqd,bkd->bqk"}> : () -> ()
    %cst_6 = arith.constant dense<0.000000e+00> : vector<16x8x8xf32>
    %16 = tpu.matmul %11, %13, %cst_6 {dimension_numbers = #tpu.dot_dimension_numbers<[2], [2], [1], [1], [0, 0, 0, 1, 1, 1], [0], [0]>} : vector<16x8x8xf32>, vector<16x8x8xf32>, vector<16x8x8xf32> -> vector<16x8x8xf32>
    "tpu.trace_stop"() : () -> ()
    %cst_7 = arith.constant dense<0xFF800000> : vector<16x8xf32>
    %17 = vector.multi_reduction <maximumf>, %16, %cst_7 [2] : vector<16x8x8xf32> to vector<16x8xf32>
    %18 = vector.shape_cast %17 : vector<16x8xf32> to vector<16x8x1xf32>
    %19 = vector.broadcast %18 : vector<16x8x1xf32> to vector<16x8x8xf32>
    %20 = arith.subf %16, %19 : vector<16x8x8xf32>
    %21 = math.exp %20 : vector<16x8x8xf32>
    %cst_8 = arith.constant dense<0.000000e+00> : vector<16x8xf32>
    %22 = vector.multi_reduction <add>, %21, %cst_8 [2] : vector<16x8x8xf32> to vector<16x8xf32>
    %23 = vector.shape_cast %22 : vector<16x8xf32> to vector<16x8x1xf32>
    %24 = tpu.reciprocal %23 : vector<16x8x1xf32> -> vector<16x8x1xf32>
    %25 = vector.broadcast %24 : vector<16x8x1xf32> to vector<16x8x8xf32>
    %26 = arith.mulf %21, %25 : vector<16x8x8xf32>
    "tpu.trace_start"() <{level = 10 : i32, message = "bqk,bkd->bqd"}> : () -> ()
    %cst_9 = arith.constant dense<0.000000e+00> : vector<16x8x8xf32>
    %27 = tpu.matmul %26, %15, %cst_9 {dimension_numbers = #tpu.dot_dimension_numbers<[2], [1], [1], [2], [0, 0, 0, 1, 1, 2], [0], [0]>} : vector<16x8x8xf32>, vector<16x8x8xf32>, vector<16x8x8xf32> -> vector<16x8x8xf32>
    "tpu.trace_stop"() : () -> ()
    %28 = vector.shape_cast %27 : vector<16x8x8xf32> to vector<128x8xf32>
    %c0_10 = arith.constant 0 : index
    %c0_11 = arith.constant 0 : index
    %29 = vector.load %arg4[%c0_10, %c0_11] : memref<32x32xf32, #tpu.memory_space<vmem>>, vector<8x32xf32>
    %cst_12 = arith.constant dense<0.000000e+00> : vector<128x32xf32>
    %30 = tpu.matmul %28, %29, %cst_12 {dimension_numbers = #tpu.dot_dimension_numbers<[1], [0], [0], [1], [0, 0, 1, 1], [], []>} : vector<128x8xf32>, vector<8x32xf32>, vector<128x32xf32> -> vector<128x32xf32>
    %31 = arith.addf %9, %30 : vector<128x32xf32>
    %32 = vector.extract_strided_slice %6 {offsets = [0, 8], sizes = [128, 8], strides = [1, 1]} : vector<128x32xf32> to vector<128x8xf32>
    %33 = vector.shape_cast %32 : vector<128x8xf32> to vector<16x8x8xf32>
    %34 = vector.extract_strided_slice %7 {offsets = [0, 8], sizes = [128, 8], strides = [1, 1]} : vector<128x32xf32> to vector<128x8xf32>
    %35 = vector.shape_cast %34 : vector<128x8xf32> to vector<16x8x8xf32>
    %36 = vector.extract_strided_slice %8 {offsets = [0, 8], sizes = [128, 8], strides = [1, 1]} : vector<128x32xf32> to vector<128x8xf32>
    %37 = vector.shape_cast %36 : vector<128x8xf32> to vector<16x8x8xf32>
    "tpu.trace_start"() <{level = 10 : i32, message = "bqd,bkd->bqk"}> : () -> ()
    %cst_13 = arith.constant dense<0.000000e+00> : vector<16x8x8xf32>
    %38 = tpu.matmul %33, %35, %cst_13 {dimension_numbers = #tpu.dot_dimension_numbers<[2], [2], [1], [1], [0, 0, 0, 1, 1, 1], [0], [0]>} : vector<16x8x8xf32>, vector<16x8x8xf32>, vector<16x8x8xf32> -> vector<16x8x8xf32>
    "tpu.trace_stop"() : () -> ()
    %cst_14 = arith.constant dense<0xFF800000> : vector<16x8xf32>
    %39 = vector.multi_reduction <maximumf>, %38, %cst_14 [2] : vector<16x8x8xf32> to vector<16x8xf32>
    %40 = vector.shape_cast %39 : vector<16x8xf32> to vector<16x8x1xf32>
    %41 = vector.broadcast %40 : vector<16x8x1xf32> to vector<16x8x8xf32>
    %42 = arith.subf %38, %41 : vector<16x8x8xf32>
    %43 = math.exp %42 : vector<16x8x8xf32>
    %cst_15 = arith.constant dense<0.000000e+00> : vector<16x8xf32>
    %44 = vector.multi_reduction <add>, %43, %cst_15 [2] : vector<16x8x8xf32> to vector<16x8xf32>
    %45 = vector.shape_cast %44 : vector<16x8xf32> to vector<16x8x1xf32>
    %46 = tpu.reciprocal %45 : vector<16x8x1xf32> -> vector<16x8x1xf32>
    %47 = vector.broadcast %46 : vector<16x8x1xf32> to vector<16x8x8xf32>
    %48 = arith.mulf %43, %47 : vector<16x8x8xf32>
    "tpu.trace_start"() <{level = 10 : i32, message = "bqk,bkd->bqd"}> : () -> ()
    %cst_16 = arith.constant dense<0.000000e+00> : vector<16x8x8xf32>
    %49 = tpu.matmul %48, %37, %cst_16 {dimension_numbers = #tpu.dot_dimension_numbers<[2], [1], [1], [2], [0, 0, 0, 1, 1, 2], [0], [0]>} : vector<16x8x8xf32>, vector<16x8x8xf32>, vector<16x8x8xf32> -> vector<16x8x8xf32>
    "tpu.trace_stop"() : () -> ()
    %50 = vector.shape_cast %49 : vector<16x8x8xf32> to vector<128x8xf32>
    %c8 = arith.constant 8 : index
    %c0_17 = arith.constant 0 : index
    %51 = vector.load %arg4[%c8, %c0_17] : memref<32x32xf32, #tpu.memory_space<vmem>>, vector<8x32xf32>
    %cst_18 = arith.constant dense<0.000000e+00> : vector<128x32xf32>
    %52 = tpu.matmul %50, %51, %cst_18 {dimension_numbers = #tpu.dot_dimension_numbers<[1], [0], [0], [1], [0, 0, 1, 1], [], []>} : vector<128x8xf32>, vector<8x32xf32>, vector<128x32xf32> -> vector<128x32xf32>
    %53 = arith.addf %31, %52 : vector<128x32xf32>
    %54 = vector.extract_strided_slice %6 {offsets = [0, 16], sizes = [128, 8], strides = [1, 1]} : vector<128x32xf32> to vector<128x8xf32>
    %55 = vector.shape_cast %54 : vector<128x8xf32> to vector<16x8x8xf32>
    %56 = vector.extract_strided_slice %7 {offsets = [0, 16], sizes = [128, 8], strides = [1, 1]} : vector<128x32xf32> to vector<128x8xf32>
    %57 = vector.shape_cast %56 : vector<128x8xf32> to vector<16x8x8xf32>
    %58 = vector.extract_strided_slice %8 {offsets = [0, 16], sizes = [128, 8], strides = [1, 1]} : vector<128x32xf32> to vector<128x8xf32>
    %59 = vector.shape_cast %58 : vector<128x8xf32> to vector<16x8x8xf32>
    "tpu.trace_start"() <{level = 10 : i32, message = "bqd,bkd->bqk"}> : () -> ()
    %cst_19 = arith.constant dense<0.000000e+00> : vector<16x8x8xf32>
    %60 = tpu.matmul %55, %57, %cst_19 {dimension_numbers = #tpu.dot_dimension_numbers<[2], [2], [1], [1], [0, 0, 0, 1, 1, 1], [0], [0]>} : vector<16x8x8xf32>, vector<16x8x8xf32>, vector<16x8x8xf32> -> vector<16x8x8xf32>
    "tpu.trace_stop"() : () -> ()
    %cst_20 = arith.constant dense<0xFF800000> : vector<16x8xf32>
    %61 = vector.multi_reduction <maximumf>, %60, %cst_20 [2] : vector<16x8x8xf32> to vector<16x8xf32>
    %62 = vector.shape_cast %61 : vector<16x8xf32> to vector<16x8x1xf32>
    %63 = vector.broadcast %62 : vector<16x8x1xf32> to vector<16x8x8xf32>
    %64 = arith.subf %60, %63 : vector<16x8x8xf32>
    %65 = math.exp %64 : vector<16x8x8xf32>
    %cst_21 = arith.constant dense<0.000000e+00> : vector<16x8xf32>
    %66 = vector.multi_reduction <add>, %65, %cst_21 [2] : vector<16x8x8xf32> to vector<16x8xf32>
    %67 = vector.shape_cast %66 : vector<16x8xf32> to vector<16x8x1xf32>
    %68 = tpu.reciprocal %67 : vector<16x8x1xf32> -> vector<16x8x1xf32>
    %69 = vector.broadcast %68 : vector<16x8x1xf32> to vector<16x8x8xf32>
    %70 = arith.mulf %65, %69 : vector<16x8x8xf32>
    "tpu.trace_start"() <{level = 10 : i32, message = "bqk,bkd->bqd"}> : () -> ()
    %cst_22 = arith.constant dense<0.000000e+00> : vector<16x8x8xf32>
    %71 = tpu.matmul %70, %59, %cst_22 {dimension_numbers = #tpu.dot_dimension_numbers<[2], [1], [1], [2], [0, 0, 0, 1, 1, 2], [0], [0]>} : vector<16x8x8xf32>, vector<16x8x8xf32>, vector<16x8x8xf32> -> vector<16x8x8xf32>
    "tpu.trace_stop"() : () -> ()
    %72 = vector.shape_cast %71 : vector<16x8x8xf32> to vector<128x8xf32>
    %c16 = arith.constant 16 : index
    %c0_23 = arith.constant 0 : index
    %73 = vector.load %arg4[%c16, %c0_23] : memref<32x32xf32, #tpu.memory_space<vmem>>, vector<8x32xf32>
    %cst_24 = arith.constant dense<0.000000e+00> : vector<128x32xf32>
    %74 = tpu.matmul %72, %73, %cst_24 {dimension_numbers = #tpu.dot_dimension_numbers<[1], [0], [0], [1], [0, 0, 1, 1], [], []>} : vector<128x8xf32>, vector<8x32xf32>, vector<128x32xf32> -> vector<128x32xf32>
    %75 = arith.addf %53, %74 : vector<128x32xf32>
    %76 = vector.extract_strided_slice %6 {offsets = [0, 24], sizes = [128, 8], strides = [1, 1]} : vector<128x32xf32> to vector<128x8xf32>
    %77 = vector.shape_cast %76 : vector<128x8xf32> to vector<16x8x8xf32>
    %78 = vector.extract_strided_slice %7 {offsets = [0, 24], sizes = [128, 8], strides = [1, 1]} : vector<128x32xf32> to vector<128x8xf32>
    %79 = vector.shape_cast %78 : vector<128x8xf32> to vector<16x8x8xf32>
    %80 = vector.extract_strided_slice %8 {offsets = [0, 24], sizes = [128, 8], strides = [1, 1]} : vector<128x32xf32> to vector<128x8xf32>
    %81 = vector.shape_cast %80 : vector<128x8xf32> to vector<16x8x8xf32>
    "tpu.trace_start"() <{level = 10 : i32, message = "bqd,bkd->bqk"}> : () -> ()
    %cst_25 = arith.constant dense<0.000000e+00> : vector<16x8x8xf32>
    %82 = tpu.matmul %77, %79, %cst_25 {dimension_numbers = #tpu.dot_dimension_numbers<[2], [2], [1], [1], [0, 0, 0, 1, 1, 1], [0], [0]>} : vector<16x8x8xf32>, vector<16x8x8xf32>, vector<16x8x8xf32> -> vector<16x8x8xf32>
    "tpu.trace_stop"() : () -> ()
    %cst_26 = arith.constant dense<0xFF800000> : vector<16x8xf32>
    %83 = vector.multi_reduction <maximumf>, %82, %cst_26 [2] : vector<16x8x8xf32> to vector<16x8xf32>
    %84 = vector.shape_cast %83 : vector<16x8xf32> to vector<16x8x1xf32>
    %85 = vector.broadcast %84 : vector<16x8x1xf32> to vector<16x8x8xf32>
    %86 = arith.subf %82, %85 : vector<16x8x8xf32>
    %87 = math.exp %86 : vector<16x8x8xf32>
    %cst_27 = arith.constant dense<0.000000e+00> : vector<16x8xf32>
    %88 = vector.multi_reduction <add>, %87, %cst_27 [2] : vector<16x8x8xf32> to vector<16x8xf32>
    %89 = vector.shape_cast %88 : vector<16x8xf32> to vector<16x8x1xf32>
    %90 = tpu.reciprocal %89 : vector<16x8x1xf32> -> vector<16x8x1xf32>
    %91 = vector.broadcast %90 : vector<16x8x1xf32> to vector<16x8x8xf32>
    %92 = arith.mulf %87, %91 : vector<16x8x8xf32>
    "tpu.trace_start"() <{level = 10 : i32, message = "bqk,bkd->bqd"}> : () -> ()
    %cst_28 = arith.constant dense<0.000000e+00> : vector<16x8x8xf32>
    %93 = tpu.matmul %92, %81, %cst_28 {dimension_numbers = #tpu.dot_dimension_numbers<[2], [1], [1], [2], [0, 0, 0, 1, 1, 2], [0], [0]>} : vector<16x8x8xf32>, vector<16x8x8xf32>, vector<16x8x8xf32> -> vector<16x8x8xf32>
    "tpu.trace_stop"() : () -> ()
    %94 = vector.shape_cast %93 : vector<16x8x8xf32> to vector<128x8xf32>
    %c24 = arith.constant 24 : index
    %c0_29 = arith.constant 0 : index
    %95 = vector.load %arg4[%c24, %c0_29] : memref<32x32xf32, #tpu.memory_space<vmem>>, vector<8x32xf32>
    %cst_30 = arith.constant dense<0.000000e+00> : vector<128x32xf32>
    %96 = tpu.matmul %94, %95, %cst_30 {dimension_numbers = #tpu.dot_dimension_numbers<[1], [0], [0], [1], [0, 0, 1, 1], [], []>} : vector<128x8xf32>, vector<8x32xf32>, vector<128x32xf32> -> vector<128x32xf32>
    %97 = arith.addf %75, %96 : vector<128x32xf32>
    %c0_31 = arith.constant 0 : index
    %c0_32 = arith.constant 0 : index
    %98 = vector.load %arg5[%c0_31, %c0_32] : memref<1x32xf32, #tpu.memory_space<vmem>>, vector<1x32xf32>
    %99 = vector.broadcast %98 : vector<1x32xf32> to vector<128x32xf32>
    %100 = arith.addf %97, %99 : vector<128x32xf32>
    %c0_33 = arith.constant 0 : index
    %c0_34 = arith.constant 0 : index
    %101 = vector.load %arg6[%c0_33, %c0_34] : memref<32x64xf32, #tpu.memory_space<vmem>>, vector<32x64xf32>
    %cst_35 = arith.constant dense<0.000000e+00> : vector<128x64xf32>
    %102 = tpu.matmul %100, %101, %cst_35 {dimension_numbers = #tpu.dot_dimension_numbers<[1], [0], [0], [1], [0, 0, 1, 1], [], []>} : vector<128x32xf32>, vector<32x64xf32>, vector<128x64xf32> -> vector<128x64xf32>
    %c0_36 = arith.constant 0 : index
    %c0_37 = arith.constant 0 : index
    %103 = vector.load %arg7[%c0_36, %c0_37] : memref<1x64xf32, #tpu.memory_space<vmem>>, vector<1x64xf32>
    %104 = vector.broadcast %103 : vector<1x64xf32> to vector<128x64xf32>
    %105 = arith.addf %102, %104 : vector<128x64xf32>
    %cst_38 = arith.constant 0.000000e+00 : f32
    %106 = vector.broadcast %cst_38 : f32 to vector<128x64xf32>
    %107 = arith.maximumf %105, %106 : vector<128x64xf32>
    %c0_39 = arith.constant 0 : index
    %c0_40 = arith.constant 0 : index
    %108 = vector.load %arg8[%c0_39, %c0_40] : memref<64x32xf32, #tpu.memory_space<vmem>>, vector<64x32xf32>
    %cst_41 = arith.constant dense<0.000000e+00> : vector<128x32xf32>
    %109 = tpu.matmul %107, %108, %cst_41 {dimension_numbers = #tpu.dot_dimension_numbers<[1], [0], [0], [1], [0, 0, 1, 1], [], []>} : vector<128x64xf32>, vector<64x32xf32>, vector<128x32xf32> -> vector<128x32xf32>
    %c0_42 = arith.constant 0 : index
    %c0_43 = arith.constant 0 : index
    %110 = vector.load %arg9[%c0_42, %c0_43] : memref<1x32xf32, #tpu.memory_space<vmem>>, vector<1x32xf32>
    %111 = vector.broadcast %110 : vector<1x32xf32> to vector<128x32xf32>
    %112 = arith.addf %109, %111 : vector<128x32xf32>
    %c0_44 = arith.constant 0 : index
    %c0_45 = arith.constant 0 : index
    %113 = vector.load %arg10[%c0_44, %c0_45] : memref<128x32xf32, #tpu.memory_space<vmem>>, vector<128x32xf32>
    tpu.vector_store %arg10[%c0_44, %c0_45], %112 {strides = array<i32>} : memref<128x32xf32, #tpu.memory_space<vmem>>, vector<128x32xf32>,
    return
  }
  func.func @transform_0(%arg0: i32) -> (i32, i32) {
    %c0_i32 = arith.constant 0 : i32
    %c0_i32_0 = arith.constant 0 : i32
    return %arg0, %c0_i32 : i32, i32
  }
  func.func @transform_1(%arg0: i32) -> (i32, i32) {
    %c0_i32 = arith.constant 0 : i32
    %c0_i32_0 = arith.constant 0 : i32
    %c0_i32_1 = arith.constant 0 : i32
    return %c0_i32, %c0_i32_0 : i32, i32
  }
  func.func @transform_2(%arg0: i32) -> (i32, i32) {
    %c0_i32 = arith.constant 0 : i32
    %c0_i32_0 = arith.constant 0 : i32
    %c0_i32_1 = arith.constant 0 : i32
    return %c0_i32, %c0_i32_0 : i32, i32
  }
  func.func @transform_3(%arg0: i32) -> (i32, i32) {
    %c0_i32 = arith.constant 0 : i32
    %c0_i32_0 = arith.constant 0 : i32
    %c0_i32_1 = arith.constant 0 : i32
    return %c0_i32, %c0_i32_0 : i32, i32
  }
  func.func @transform_4(%arg0: i32) -> (i32, i32) {
    %c0_i32 = arith.constant 0 : i32
    %c0_i32_0 = arith.constant 0 : i32
    %c0_i32_1 = arith.constant 0 : i32
    return %c0_i32, %c0_i32_0 : i32, i32
  }
  func.func @transform_5(%arg0: i32) -> (i32, i32) {
    %c0_i32 = arith.constant 0 : i32
    %c0_i32_0 = arith.constant 0 : i32
    %c0_i32_1 = arith.constant 0 : i32
    return %c0_i32, %c0_i32_0 : i32, i32
  }
  func.func @transform_6(%arg0: i32) -> (i32, i32) {
    %c0_i32 = arith.constant 0 : i32
    %c0_i32_0 = arith.constant 0 : i32
    %c0_i32_1 = arith.constant 0 : i32
    return %c0_i32, %c0_i32_0 : i32, i32
  }
  func.func @transform_7(%arg0: i32) -> (i32, i32) {
    %c0_i32 = arith.constant 0 : i32
    %c0_i32_0 = arith.constant 0 : i32
    %c0_i32_1 = arith.constant 0 : i32
    return %c0_i32, %c0_i32_0 : i32, i32
  }
  func.func @transform_8(%arg0: i32) -> (i32, i32) {
    %c0_i32 = arith.constant 0 : i32
    %c0_i32_0 = arith.constant 0 : i32
    %c0_i32_1 = arith.constant 0 : i32
    return %c0_i32, %c0_i32_0 : i32, i32
  }
  func.func @transform_9(%arg0: i32) -> (i32, i32) {
    %c0_i32 = arith.constant 0 : i32
    %c0_i32_0 = arith.constant 0 : i32
    return %arg0, %c0_i32 : i32, i32
  }
}

</mosaic_0001>

<bundles_post_ra>
// kernel: tpu_custom_call.1
= control target key start
LH: loop header
LB: loop body
LE: loop exit
PB: predicated region body
PF: predicated region fallthrough
CT: control target
= control target key end

     0   :  { %vm56_vm0 = vcmask 261120   ;;  %s6682_s28 = smov 96   ;;  %vm173_vm1 = vcmask 64512   ;;  %s6685_s29 = smov 120   ;;  %s9031_s1 = inlined_call_operand.vmem [shape: f32[32,96], index: 1, kind: input, shape index: {}]   ;;  %s9032_s0 = inlined_call_operand.vmem [shape: f32[128,32], index: 0, kind: input, shape index: {}]   ;;  %s9033_s2 = inlined_call_operand.vmem [shape: f32[1,96], index: 2, kind: input, shape index: {}]   ;;  %s9034_s3 = inlined_call_operand.vmem [shape: f32[32,32], index: 3, kind: input, shape index: {}]   ;;  %s9035_s4 = inlined_call_operand.vmem [shape: f32[1,32], index: 4, kind: input, shape index: {}]   ;;  %s9036_s5 = inlined_call_operand.vmem [shape: f32[32,64], index: 5, kind: input, shape index: {}]   ;;  %s9037_s6 = inlined_call_operand.vmem [shape: f32[1,64], index: 6, kind: input, shape index: {}]   ;;  %s9038_s7 = inlined_call_operand.vmem [shape: f32[64,32], index: 7, kind: input, shape index: {}]   ;;  %s9039_s8 = inlined_call_operand.vmem [shape: f32[1,32], index: 8, kind: input, shape index: {}]   ;;  %s9040_s9 = inlined_call_operand.vmem [shape: f32[128,32], index: 9, kind: output, shape index: {}]  }
   0x1   :  { %v51_v0 = vld [vmem:[%s9031_s1 + $0x18] sm:$0xff]  ;;  %v50_v1 = vld [vmem:[%s9031_s1 + $0x10] sm:$0xff]  ;;  %v49_v2 = vld [vmem:[%s9031_s1 + $0x8] sm:$0xff]  ;;  %s6686_s30 = smov 56   ;;  %s6687_s10 = smov 80  }
   0x2   :  { %117 = vmatpush.msra.mxu0 %v51_v0  ;;  %6242 = vmatpush.msra.mxu1 %v51_v0  ;;  %v48_v3 = vld [vmem:[%s9031_s1] sm:$0xff]  ;;  %v33_v5 = vld [vmem:[%s9032_s0 + $0x8] sm:$0xff]  ;;  %v34_v6 = vld [vmem:[%s9032_s0 + $0x10] sm:$0xff]  ;;  %s6688_s11 = smov 112   ;;  %s6689_s12 = smov 48  }
   0x3   :  { %v32_v4 = vld [vmem:[%s9032_s0] sm:$0xff]  ;;  %v35_v7 = vld [vmem:[%s9032_s0 + $0x18] sm:$0xff]  ;;  %v37_v9 = vld [vmem:[%s9032_s0 + $0x28] sm:$0xff]  ;;  %s6690_s13 = smov 104   ;;  %s6691_s14 = smov 72  }
   0x4   :  { %118 = vmatpush.msra.mxu0 %v50_v1  ;;  %6243 = vmatpush.msra.mxu1 %v50_v1  ;;  %v36_v8 = vld [vmem:[%s9032_s0 + $0x20] sm:$0xff]  ;;  %v38_v10 = vld [vmem:[%s9032_s0 + $0x30] sm:$0xff]  ;;  %v39_v12 = vld [vmem:[%s9032_s0 + $0x38] sm:$0xff]  ;;  %s6692_s17 = smov 40  }
   0x5   :  { %v46_v11 = vld [vmem:[%s9032_s0 + $0x70] sm:$0xff]  ;;  %v40_v13 = vld [vmem:[%s9032_s0 + $0x40] sm:$0xff]  ;;  %v41_v14 = vld [vmem:[%s9032_s0 + $0x48] sm:$0xff] }
   0x6   :  { %119 = vmatpush.msra.mxu0 %v49_v2  ;;  %6244 = vmatpush.msra.mxu1 %v49_v2  ;;  %v47_v15 = vld [vmem:[%s9032_s0 + $0x78] sm:$0xff]  ;;  %v42_v16 = vld [vmem:[%s9032_s0 + $0x50] sm:$0xff]  ;;  %v44_v18 = vld [vmem:[%s9032_s0 + $0x60] sm:$0xff] }
   0x7   :  { %v43_v17 = vld [vmem:[%s9032_s0 + $0x58] sm:$0xff]  ;;  %v45_v19 = vld [vmem:[%s9032_s0 + $0x68] sm:$0xff]  ;;  %v6421_v20 = vld [vmem:[%s9033_s2] ss:$0 sm:$0xff]  ;;  %s6683_s0 = smov 64   ;;  %s6684_s2 = smov 88  }
   0x8   :  { %120 = vmatpush.msra.mxu0 %v48_v3  ;;  %6245 = vmatpush.msra.mxu1 %v48_v3 }
   0x9   :  { %5938 = vmatmul.msk.f32.vlgmr.msra.gmra.mxu0 %vm56_vm0, %v32_v4  ;;  %5952 = vmatmul.msk.f32.vlgmr.msra.gmra.mxu1 %vm56_vm0, %v46_v11 }
  0x11   :  { %5939 = vmatmul.msk.f32.gmra.mxu0 %vm56_vm0, %v33_v5  ;;  %5953 = vmatmul.msk.f32.gmra.mxu1 %vm56_vm0, %v47_v15 }
  0x19   :  { %5940 = vmatmul.msk.f32.gmra.mxu0 %vm56_vm0, %v34_v6 }
  0x21   :  { %5941 = vmatmul.msk.f32.gmra.mxu0 %vm56_vm0, %v35_v7 }
  0x29   :  { %5942 = vmatmul.msk.f32.gmra.mxu0 %vm56_vm0, %v36_v8 }
  0x31   :  { %5943 = vmatmul.msk.f32.gmra.mxu0 %vm56_vm0, %v37_v9 }
  0x39   :  { %5944 = vmatmul.msk.f32.gmra.mxu0 %vm56_vm0, %v38_v10 }
  0x41   :  { %5945 = vmatmul.msk.f32.gmra.mxu0 %vm56_vm0, %v39_v12 }
  0x49   :  { %5946 = vmatmul.msk.f32.gmra.mxu0 %vm56_vm0, %v40_v13 }
  0x51   :  { %5947 = vmatmul.msk.f32.gmra.mxu0 %vm56_vm0, %v41_v14 }
  0x59   :  { %5948 = vmatmul.msk.f32.gmra.mxu0 %vm56_vm0, %v42_v16 }
  0x61   :  { %5949 = vmatmul.msk.f32.gmra.mxu0 %vm56_vm0, %v43_v17 }
  0x69   :  { %5950 = vmatmul.msk.f32.gmra.mxu0 %vm56_vm0, %v44_v18 }
  0x71   :  { %5951 = vmatmul.msk.f32.gmra.mxu0 %vm56_vm0, %v45_v19 }
  0x86   :  { %v122_v21 = vpop.f32.mrf.mxu0  ;;  %v164_v45 = vpop.f32.mrf.mxu1 }
  0x87   :  { %v6822_v22 = vadd.f32 %v6421_v20, %v122_v21  ;;  %v6870_v47 = vadd.f32 %v6421_v20, %v164_v45 }
  0x89   :  { %171 = vrot.lane.b32.xlu0 %v6822_v22, %s6682_s28  ;;  %9078 = vst [vmem:[#allocation8_spill] sm:$0xff] %v6870_v47 }
  0x8e   :  { %v125_v23 = vpop.f32.mrf.mxu0  ;;  %v167_v49 = vpop.f32.mrf.mxu1 }
  0x8f   :  { %v6826_v24 = vadd.f32 %v6421_v20, %v125_v23  ;;  %v6878_v51 = vadd.f32 %v6421_v20, %v167_v49 }
  0x91   :  { %199 = vrot.lane.b32.xlu0 %v6826_v24, %s6682_s28  ;;  %9080 = vst [vmem:[#allocation10_spill] sm:$0xff] %v6878_v51  ;;  %v6891_v54 = vpack.i.bf16 %v6826_v24, %v6822_v22  ;;  %v6296_v61 = vpack.i.bf16 %v6870_v47, %v6878_v51 }
  0x93   :  { %9081 = vst [vmem:[#allocation11_spill] sm:$0xff] %v6891_v54 }
  0x96   :  { %v128_v25 = vpop.f32.mrf.mxu0 }
  0x97   :  { %v6830_v26 = vadd.f32 %v6421_v20, %v128_v25 }
  0x99   :  { %9072 = vst [vmem:[#allocation2_spill] sm:$0xff] %v6830_v26  ;;  %226 = vrot.lane.b32.xlu1 %v6830_v26, %s6682_s28 }
  0x9e   :  { %v131_v27 = vpop.f32.mrf.mxu0 }
  0x9f   :  { %v6834_v28 = vadd.f32 %v6421_v20, %v131_v27 }
  0xa1   :  { %253 = vrot.lane.b32.xlu1 %v6834_v28, %s6682_s28  ;;  %v6271_v55 = vpack.i.bf16 %v6830_v26, %v6834_v28 }
  0xa6   :  { %v134_v29 = vpop.f32.mrf.mxu0 }
  0xa7   :  { %v6838_v30 = vadd.f32 %v6421_v20, %v134_v29 }
  0xa9   :  { %9073 = vst [vmem:[#allocation3_spill] sm:$0xff] %v6838_v30  ;;  %280 = vrot.lane.b32.xlu2 %v6838_v30, %s6682_s28 }
  0xae   :  { %v137_v31 = vpop.f32.mrf.mxu0 }
  0xaf   :  { %v6842_v32 = vadd.f32 %v6421_v20, %v137_v31 }
  0xb1   :  { %307 = vrot.lane.b32.xlu2 %v6842_v32, %s6682_s28 }
  0xb6   :  { %v140_v33 = vpop.f32.mrf.mxu0 }
  0xb7   :  { %v6846_v34 = vadd.f32 %v6421_v20, %v140_v33 }
  0xb9   :  { %9074 = vst [vmem:[#allocation4_spill] sm:$0xff] %v6846_v34  ;;  %334 = vrot.lane.b32.xlu0 %v6846_v34, %s6682_s28  ;;  %v6276_v58 = vpack.i.bf16 %v6846_v34, %v6838_v30 }
  0xbe   :  { %v143_v35 = vpop.f32.mrf.mxu0 }
  0xbf   :  { %v6850_v36 = vadd.f32 %v6421_v20, %v143_v35 }
  0xc1   :  { %9075 = vst [vmem:[#allocation5_spill] sm:$0xff] %v6850_v36  ;;  %361 = vrot.lane.b32.xlu1 %v6850_v36, %s6682_s28  ;;  %v6281_v53 = vpack.i.bf16 %v6850_v36, %v6842_v32 }
  0xc6   :  { %v146_v37 = vpop.f32.mrf.mxu0 }
  0xc7   :  { %v6854_v38 = vadd.f32 %v6421_v20, %v146_v37 }
  0xc9   :  { %388 = vrot.lane.b32.xlu2 %v6854_v38, %s6682_s28 }
  0xce   :  { %v149_v39 = vpop.f32.mrf.mxu0 }
  0xcf   :  { %v6858_v40 = vadd.f32 %v6421_v20, %v149_v39 }
  0xd1   :  { %415 = vrot.lane.b32.xlu0 %v6858_v40, %s6682_s28  ;;  %v6286_v57 = vpack.i.bf16 %v6854_v38, %v6858_v40 }
  0xd6   :  { %v152_v41 = vpop.f32.mrf.mxu0 }
  0xd7   :  { %v6862_v42 = vadd.f32 %v6421_v20, %v152_v41 }
  0xd9   :  { %9076 = vst [vmem:[#allocation6_spill] sm:$0xff] %v6862_v42  ;;  %442 = vrot.lane.b32.xlu1 %v6862_v42, %s6682_s28 }
  0xde   :  { %v155_v43 = vpop.f32.mrf.mxu0 }
  0xdf   :  { %v6866_v44 = vadd.f32 %v6421_v20, %v155_v43 }
  0xe1   :  { %9077 = vst [vmem:[#allocation7_spill] sm:$0xff] %v6866_v44  ;;  %469 = vrot.lane.b32.xlu2 %v6866_v44, %s6682_s28 }
  0xe6   :  { %v158_v46 = vpop.f32.mrf.mxu0 }
  0xe7   :  { %v6872_v48 = vadd.f32 %v6421_v20, %v158_v46 }
  0xe9   :  { %9079 = vst [vmem:[#allocation9_spill] sm:$0xff] %v6872_v48  ;;  %550 = vrot.lane.b32.xlu2 %v6870_v47, %s6682_s28  ;;  %496 = vrot.lane.b32.xlu0 %v6872_v48, %s6682_s28  ;;  %v6291_v62 = vpack.i.bf16 %v6872_v48, %v6862_v42 }
  0xee   :  { %v161_v50 = vpop.f32.mrf.mxu0 }
  0xef   :  { %v6880_v52 = vadd.f32 %v6421_v20, %v161_v50 }
  0xf1   :  { %6282 = vrot.lane.b32.xlu2 %v6281_v53, %s6683_s0  ;;  %523 = vrot.lane.b32.xlu1 %v6880_v52, %s6682_s28  ;;  %v6301_v5 = vpack.i.bf16 %v6880_v52, %v6866_v44 }
  0xf2   :  { %577 = vrot.lane.b32.xlu0 %v6878_v51, %s6682_s28 }
  0xf9   :  { %1434 = vrot.lane.b32.xlu2 %v6826_v24, %s6684_s2  ;;  %6267 = vrot.lane.b32.xlu1 %v6891_v54, %s6683_s0 }
  0xfa   :  { %6272 = vrot.lane.b32.xlu0 %v6271_v55, %s6683_s0 }
  0xfb   :  { %v172_v56 = vpop.permute.xlu0 %171 }
  0xfc   :  { %5954 = vmatpush.xpose.msk.msrb.mxu1 %vm173_vm1, %v172_v56 }
  0xff   :  { %5955 = vmatmul.msk.f32.vlgmr.msrb.gmra.mxu1 %vm173_vm1, %v6822_v22 }
 0x101   :  { %1574 = vrot.lane.b32.xlu2 %v6846_v34, %s6684_s2  ;;  %6287 = vrot.lane.b32.xlu1 %v6286_v57, %s6683_s0 }
 0x102   :  { %6277 = vrot.lane.b32.xlu0 %v6276_v58, %s6683_s0 }
 0x103   :  { %v281_v59 = vpop.permute.xlu2 %280  ;;  %v200_v60 = vpop.permute.xlu0 %199 }
 0x104   :  { %5956 = vmatpush.xpose.msk.msra.mxu1 %vm173_vm1, %v200_v60  ;;  %5962 = vmatpush.xpose.msk.msra.mxu2 %vm173_vm1, %v281_v59 }
 0x107   :  { %5957 = vmatmul.msk.f32.vlgmr.msra.gmra.mxu1 %vm173_vm1, %v6826_v24  ;;  %5963 = vmatmul.msk.f32.vlgmr.msra.gmra.mxu2 %vm173_vm1, %v6838_v30 }
 0x109   :  { %6297 = vrot.lane.b32.xlu1 %v6296_v61, %s6683_s0 }
 0x10a   :  { %6292 = vrot.lane.b32.xlu0 %v6291_v62, %s6683_s0 }
 0x10b   :  { %v227_v63 = vpop.permute.xlu1 %226  ;;  %v308_v0 = vpop.permute.xlu2 %307 }
 0x10c   :  { %5958 = vmatpush.xpose.msk.msra.mxu3 %vm173_vm1, %v227_v63 }
 0x10f   :  { %5959 = vmatmul.msk.f32.vlgmr.msra.gmra.mxu3 %vm173_vm1, %v6830_v26 }
 0x110   :  { %5964 = vmatpush.xpose.msk.msrb.mxu3 %vm173_vm1, %v308_v0 }
 0x111   :  { %1462 = vrot.lane.b32.xlu1 %v6830_v26, %s6684_s2 }
 0x112   :  { %1406 = vrot.lane.b32.xlu0 %v6822_v22, %s6684_s2 }
 0x113   :  { %v254_v1 = vpop.permute.xlu1 %253 }
 0x114   :  { %5960 = vmatpush.xpose.msk.msrb.mxu1 %vm173_vm1, %v254_v1 }
 0x117   :  { %5961 = vmatmul.msk.f32.vlgmr.msrb.gmra.mxu1 %vm173_vm1, %v6834_v28  ;;  %5965 = vmatmul.msk.f32.vlgmr.msrb.gmra.mxu3 %vm173_vm1, %v6842_v32 }
 0x119   :  { %1460 = vrot.lane.b32.xlu1 %v6830_v26, %s6685_s29 }
 0x11a   :  { %1404 = vrot.lane.b32.xlu0 %v6822_v22, %s6685_s29 }
 0x121   :  { %1546 = vrot.lane.b32.xlu1 %v6842_v32, %s6684_s2 }
 0x122   :  { %1490 = vrot.lane.b32.xlu0 %v6834_v28, %s6684_s2 }
 0x123   :  { %v389_v2 = vpop.permute.xlu2 %388 }
 0x124   :  { %5970 = vmatpush.xpose.msk.msra.mxu3 %vm173_vm1, %v389_v2 }
 0x127   :  { %5971 = vmatmul.msk.f32.vlgmr.msra.gmra.mxu3 %vm173_vm1, %v6854_v38 }
 0x129   :  { %1488 = vrot.lane.b32.xlu1 %v6834_v28, %s6685_s29 }
 0x12a   :  { %1432 = vrot.lane.b32.xlu0 %v6826_v24, %s6685_s29 }
 0x12b   :  { %v335_v3 = vpop.permute.xlu0 %334 }
 0x12c   :  { %5966 = vmatpush.xpose.msk.msra.mxu1 %vm173_vm1, %v335_v3 }
 0x12f   :  { %5967 = vmatmul.msk.f32.vlgmr.msra.gmra.mxu1 %vm173_vm1, %v6846_v34 }
 0x131   :  { %1518 = vrot.lane.b32.xlu1 %v6838_v30, %s6684_s2 }
 0x132   :  { %1544 = vrot.lane.b32.xlu0 %v6842_v32, %s6685_s29 }
 0x133   :  { %v362_v4 = vpop.permute.xlu1 %361 }
 0x134   :  { %5968 = vmatpush.xpose.msk.msrb.mxu2 %vm173_vm1, %v362_v4 }
 0x137   :  { %5969 = vmatmul.msk.f32.vlgmr.msrb.gmra.mxu2 %vm173_vm1, %v6850_v36 }
 0x139   :  { %6302 = vrot.lane.b32.xlu1 %v6301_v5, %s6683_s0 }
 0x13a   :  { %1630 = vrot.lane.b32.xlu0 %v6854_v38, %s6684_s2 }
 0x13b   :  { %v470_v6 = vpop.permute.xlu2 %469 }
 0x13c   :  { %5976 = vmatpush.xpose.msk.msrb.mxu3 %vm173_vm1, %v470_v6 }
 0x13f   :  { %5977 = vmatmul.msk.f32.vlgmr.msrb.gmra.mxu3 %vm173_vm1, %v6866_v44 }
 0x143   :  { %v551_v7 = vpop.permute.xlu2 %550  ;;  %v416_v8 = vpop.permute.xlu0 %415 }
 0x144   :  { %5972 = vmatpush.xpose.msk.msrb.mxu1 %vm173_vm1, %v416_v8  ;;  %5982 = vmatpush.xpose.msk.msra.mxu3 %vm173_vm1, %v551_v7 }
 0x147   :  { %5973 = vmatmul.msk.f32.vlgmr.msrb.gmra.mxu1 %vm173_vm1, %v6858_v40  ;;  %5983 = vmatmul.msk.f32.vlgmr.msra.gmra.mxu3 %vm173_vm1, %v6870_v47 }
 0x14b   :  { %v443_v9 = vpop.permute.xlu1 %442  ;;  %v6987_v13 = vpop.permute.xlu2 %6282 }
 0x14c   :  { %5974 = vmatpush.xpose.msk.msra.mxu2 %vm173_vm1, %v443_v9  ;;  %v6284_v20 = vunpack.i.l.bf16 %v6987_v13 }
 0x14f   :  { %5975 = vmatmul.msk.f32.vlgmr.msra.gmra.mxu2 %vm173_vm1, %v6862_v42 }
 0x15b   :  { %v497_v10 = vpop.permute.xlu0 %496 }
 0x15c   :  { %5978 = vmatpush.xpose.msk.msra.mxu1 %vm173_vm1, %v497_v10 }
 0x15f   :  { %5979 = vmatmul.msk.f32.vlgmr.msra.gmra.mxu1 %vm173_vm1, %v6872_v48 }
 0x163   :  { %v524_v11 = vpop.permute.xlu1 %523 }
 0x164   :  { %v578_v12 = vpop.permute.xlu0 %577  ;;  %5980 = vmatpush.xpose.msk.msrb.mxu2 %vm173_vm1, %v524_v11 }
 0x165   :  { %5984 = vmatpush.xpose.msk.msrb.mxu1 %vm173_vm1, %v578_v12 }
 0x167   :  { %5981 = vmatmul.msk.f32.vlgmr.msrb.gmra.mxu2 %vm173_vm1, %v6880_v52 }
 0x168   :  { %5985 = vmatmul.msk.f32.vlgmr.msrb.gmra.mxu1 %vm173_vm1, %v6878_v51 }
 0x16b   :  { %v6268_v14 = vpop.permute.xlu1 %6267 }
 0x16c   :  { %v6270_v15 = vunpack.i.h.bf16 %v6268_v14  ;;  %v6269_v16 = vunpack.i.l.bf16 %v6268_v14  ;;  %v6273_v17 = vpop.permute.xlu0 %6272 }
 0x16d   :  { %v6275_v18 = vunpack.i.h.bf16 %v6273_v17  ;;  %v6274_v19 = vunpack.i.l.bf16 %v6273_v17 }
 0x16e   :  { %1008 = vmatpush.msra.mxu2 %v6269_v16  ;;  %1034 = vmatpush.msrb.mxu3 %v6270_v15 }
 0x16f   :  { %1060 = vmatpush.msra.mxu1 %v6275_v18  ;;  %v7075_v18 = vpop.permute.xlu2 %1434 }
 0x170   :  { %1086 = vmatpush.msrb.mxu2 %v6274_v19  ;;  %9086 = vst [vmem:[#allocation16_spill] sm:$0xff] %v7075_v18 }
 0x171   :  { %1138 = vmatpush.msrb.mxu1 %v6284_v20 }
 0x173   :  { %v7017_v49 = vpop.permute.xlu1 %6287 }
 0x174   :  { %v6990_v21 = vpop.permute.xlu0 %6277 }
 0x175   :  { %v6279_v23 = vunpack.i.l.bf16 %v6990_v21 }
 0x177   :  { %1112 = vmatpush.msra.mxu3 %v6279_v23 }
 0x17b   :  { %v7025_v56 = vpop.permute.xlu1 %6297 }
 0x17c   :  { %v6993_v25 = vpop.f32.mrf.mxu1  ;;  %v7043_v1 = vpop.permute.xlu0 %6292 }
 0x17d   :  { %v603_v27 = vsel %vm173_vm1, %v6993_v25, -inf }
 0x17e   :  { %604 = vmax.xlane.f32.xlu1 %v603_v27 }
 0x183   :  { %v7029_v58 = vpop.permute.xlu1 %1462 }
 0x184   :  { %v6997_v29 = vpop.f32.mrf.mxu1  ;;  %9082 = vst [vmem:[#allocation12_spill] sm:$0xff] %v7029_v58  ;;  %v7053_v6 = vpop.permute.xlu0 %1406 }
 0x185   :  { %v606_v31 = vsel %vm173_vm1, %v6997_v29, -inf }
 0x186   :  { %607 = vmax.xlane.f32.xlu2 %v606_v31  ;;  %v7085_v31 = vpop.permute.xlu2 %1574 }
 0x18a   :  { %v7001_v33 = vpop.f32.mrf.mxu2 }
 0x18b   :  { %v615_v35 = vsel %vm173_vm1, %v7001_v33, -inf  ;;  %v7035_v61 = vpop.permute.xlu1 %1460 }
 0x18c   :  { %616 = vmax.xlane.f32.xlu1 %v615_v35  ;;  %9083 = vst [vmem:[#allocation13_spill] sm:$0xff] %v7035_v61  ;;  %v7061_v10 = vpop.permute.xlu0 %1404 }
 0x192   :  { %v7005_v37 = vpop.f32.mrf.mxu3 }
 0x193   :  { %v609_v39 = vsel %vm173_vm1, %v7005_v37, -inf  ;;  %v7049_v4 = vpop.permute.xlu1 %1546 }
 0x194   :  { %610 = vmax.xlane.f32.xlu2 %v609_v39  ;;  %v7009_v41 = vpop.f32.mrf.mxu1  ;;  %9084 = vst [vmem:[#allocation14_spill] sm:$0xff] %v7049_v4  ;;  %v7069_v15 = vpop.permute.xlu0 %1490 }
 0x195   :  { %v612_v43 = vsel %vm173_vm1, %v7009_v41, -inf }
 0x196   :  { %613 = vmax.xlane.f32.xlu0 %v612_v43 }
 0x19a   :  { %v7013_v45 = vpop.f32.mrf.mxu3 }
 0x19b   :  { %v618_v46 = vsel %vm173_vm1, %v7013_v45, -inf  ;;  %v7059_v9 = vpop.permute.xlu1 %1488 }
 0x19c   :  { %v7083_v27 = vpop.permute.xlu0 %1432 }
 0x19d   :  { %9087 = vst [vmem:[#allocation17_spill] sm:$0xff] %v7083_v27 }
 0x19e   :  { %619 = vmax.xlane.f32.xlu0 %v618_v46 }
 0x1a3   :  { %v7067_v14 = vpop.permute.xlu1 %1518 }
 0x1a4   :  { %9085 = vst [vmem:[#allocation15_spill] sm:$0xff] %v7067_v14  ;;  %v7088_v46 = vpop.permute.xlu0 %1544 }
 0x1a5   :  { %9088 = vst [vmem:[#allocation18_spill] sm:$0xff] %v7088_v46 }
 0x1aa   :  { %v7019_v50 = vpop.f32.mrf.mxu3 }
 0x1ab   :  { %v627_v53 = vsel %vm173_vm1, %v7019_v50, -inf  ;;  %v7077_v19 = vpop.permute.xlu1 %6302 }
 0x1ac   :  { %628 = vmax.xlane.f32.xlu0 %v627_v53  ;;  %v7023_v55 = vpop.f32.mrf.mxu1 }
 0x1ad   :  { %v621_v57 = vsel %vm173_vm1, %v7023_v55, -inf }
 0x1ae   :  { %622 = vmax.xlane.f32.xlu2 %v621_v57 }
 0x1ba   :  { %v7031_v59 = vpop.f32.mrf.mxu2 }
 0x1bb   :  { %v624_v60 = vsel %vm173_vm1, %v7031_v59, -inf }
 0x1bc   :  { %625 = vmax.xlane.f32.xlu1 %v624_v60 }
 0x1c2   :  { %v7037_v62 = vpop.f32.mrf.mxu3 }
 0x1c3   :  { %v636_v63 = vsel %vm173_vm1, %v7037_v62, -inf }
 0x1c4   :  { %637 = vmax.xlane.f32.xlu0 %v636_v63  ;;  %v7041_v0 = vpop.f32.mrf.mxu1 }
 0x1c5   :  { %v630_v2 = vsel %vm173_vm1, %v7041_v0, -inf }
 0x1c6   :  { %631 = vmax.xlane.f32.xlu2 %v630_v2 }
 0x1ca   :  { %v7047_v3 = vpop.f32.mrf.mxu3 }
 0x1cb   :  { %v645_v5 = vsel %vm173_vm1, %v7047_v3, -inf }
 0x1cc   :  { %646 = vmax.xlane.f32.xlu0 %v645_v5  ;;  %v7095_v5 = vpop.permute.xlu0 %1630 }
 0x1cd   :  { %9089 = vst [vmem:[#allocation19_spill] sm:$0xff] %v7095_v5 }
 0x1d2   :  { %v7055_v7 = vpop.f32.mrf.mxu2 }
 0x1d3   :  { %v633_v8 = vsel %vm173_vm1, %v7055_v7, -inf }
 0x1d4   :  { %634 = vmax.xlane.f32.xlu1 %v633_v8 }
 0x1dc   :  { %v7063_v11 = vpop.f32.mrf.mxu1 }
 0x1dd   :  { %v639_v12 = vsel %vm173_vm1, %v7063_v11, -inf }
 0x1de   :  { %640 = vmax.xlane.f32.xlu2 %v639_v12 }
 0x1e5   :  { %v7071_v16 = vpop.f32.mrf.mxu1 }
 0x1e6   :  { %v648_v17 = vsel %vm173_vm1, %v7071_v16, -inf }
 0x1e7   :  { %649 = vmax.xlane.f32.xlu2 %v648_v17 }
 0x1ea   :  { %v7079_v20 = vpop.f32.mrf.mxu2 }
 0x1eb   :  { %v642_v23 = vsel %vm173_vm1, %v7079_v20, -inf }
 0x1ec   :  { %643 = vmax.xlane.f32.xlu1 %v642_v23 }
 0x1f1   :  { %v605_v35 = vpop.xlane.xlu1 %604 }
 0x1f2   :  { %v651_v39 = vsub.f32 %v6993_v25, %v605_v35 }
 0x1f4   :  { %v667_v43 = vmul.f32 1.442695, %v651_v39 }
 0x1f6   :  { %6425 = vpow2.f32 %v667_v43 }
 0x1f9   :  { %v608_v53 = vpop.xlane.xlu2 %607 }
 0x1fa   :  { %v652_v57 = vsub.f32 %v6997_v29, %v608_v53 }
 0x1fc   :  { %v7091_v60 = vpop.eup %6425  ;;  %v669_v63 = vmul.f32 1.442695, %v652_v57 }
 0x1fd   :  { %v699_v2 = vsel %vm173_vm1, %v7091_v60, 0.0 }
 0x1fe   :  { %6427 = vpow2.f32 %v669_v63  ;;  %700 = vadd.xlane.f32.xlu1 %v699_v2 }
 0x204   :  { %v7097_v8 = vpop.eup %6427 }
 0x205   :  { %v702_v25 = vsel %vm173_vm1, %v7097_v8, 0.0 }
 0x206   :  { %703 = vadd.xlane.f32.xlu2 %v702_v25  ;;  %v617_v25 = vpop.xlane.xlu1 %616 }
 0x207   :  { %v611_v12 = vpop.xlane.xlu2 %610 }
 0x208   :  { %v653_v17 = vsub.f32 %v7005_v37, %v611_v12 }
 0x209   :  { %v614_v29 = vpop.xlane.xlu0 %613 }
 0x20a   :  { %v671_v23 = vmul.f32 1.442695, %v653_v17  ;;  %v654_v35 = vsub.f32 %v7009_v41, %v614_v29 }
 0x20c   :  { %6429 = vpow2.f32 %v671_v23  ;;  %v673_v39 = vmul.f32 1.442695, %v654_v35 }
 0x20e   :  { %6431 = vpow2.f32 %v673_v39  ;;  %v655_v39 = vsub.f32 %v7001_v33, %v617_v25 }
 0x212   :  { %v7103_v43 = vpop.eup %6429 }
 0x213   :  { %v705_v53 = vsel %vm173_vm1, %v7103_v43, 0.0 }
 0x214   :  { %v7107_v57 = vpop.eup %6431  ;;  %706 = vadd.xlane.f32.xlu1 %v705_v53  ;;  %v620_v53 = vpop.xlane.xlu0 %619 }
 0x215   :  { %v708_v63 = vsel %vm173_vm1, %v7107_v57, 0.0 }
 0x216   :  { %709 = vadd.xlane.f32.xlu0 %v708_v63 }
 0x21e   :  { %1572 = vrot.lane.b32.xlu2 %v6846_v34, %s6685_s29 }
 0x221   :  { %v623_v37 = vpop.xlane.xlu2 %622 }
 0x222   :  { %v657_v41 = vsub.f32 %v7023_v55, %v623_v37  ;;  %v675_v55 = vmul.f32 1.442695, %v655_v39 }
 0x224   :  { %v679_v2 = vmul.f32 1.442695, %v657_v41  ;;  %v656_v41 = vsub.f32 %v7013_v45, %v620_v53 }
 0x226   :  { %6433 = vpow2.f32 %v679_v2  ;;  %v677_v2 = vmul.f32 1.442695, %v656_v41 }
 0x22c   :  { %v7114_v12 = vpop.eup %6433 }
 0x22d   :  { %1516 = vrot.lane.b32.xlu1 %v6838_v30, %s6685_s29  ;;  %v717_v17 = vsel %vm173_vm1, %v7114_v12, 0.0 }
 0x22e   :  { %718 = vadd.xlane.f32.xlu0 %v717_v17  ;;  %v629_v17 = vpop.xlane.xlu0 %628 }
 0x22f   :  { %v626_v29 = vpop.xlane.xlu1 %625 }
 0x230   :  { %v658_v23 = vsub.f32 %v7031_v59, %v626_v29  ;;  %v659_v59 = vsub.f32 %v7019_v50, %v629_v17 }
 0x232   :  { %v681_v35 = vmul.f32 1.442695, %v658_v23  ;;  %v683_v29 = vmul.f32 1.442695, %v659_v59 }
 0x234   :  { %6435 = vpow2.f32 %v681_v35 }
 0x235   :  { %6437 = vpow2.f32 %v675_v55 }
 0x236   :  { %6439 = vpow2.f32 %v677_v2 }
 0x237   :  { %6441 = vpow2.f32 %v683_v29 }
 0x239   :  { %v632_v35 = vpop.xlane.xlu2 %631 }
 0x23a   :  { %v7122_v63 = vpop.eup %6435  ;;  %v660_v45 = vsub.f32 %v7041_v0, %v632_v35 }
 0x23b   :  { %v720_v37 = vsel %vm173_vm1, %v7122_v63, 0.0  ;;  %v7127_v54 = vpop.eup %6437 }
 0x23c   :  { %721 = vadd.xlane.f32.xlu0 %v720_v37  ;;  %v711_v33 = vsel %vm173_vm1, %v7127_v54, 0.0  ;;  %v7133_v55 = vpop.eup %6439  ;;  %v685_v53 = vmul.f32 1.442695, %v660_v45  ;;  %v638_v45 = vpop.xlane.xlu0 %637 }
 0x23d   :  { %v714_v50 = vsel %vm173_vm1, %v7133_v55, 0.0  ;;  %v7140_v37 = vpop.eup %6441 }
 0x23e   :  { %v723_v0 = vsel %vm173_vm1, %v7140_v37, 0.0 }
 0x244   :  { %v7169_v61 = vpop.xlane.xlu0 %646 }
 0x247   :  { %v635_v25 = vpop.xlane.xlu1 %634  ;;  %712 = vadd.xlane.f32.xlu2 %v711_v33 }
 0x248   :  { %v661_v23 = vsub.f32 %v7055_v7, %v635_v25 }
 0x24a   :  { %v687_v39 = vmul.f32 1.442695, %v661_v23 }
 0x24c   :  { %6443 = vpow2.f32 %v687_v39 }
 0x24d   :  { %6445 = vpow2.f32 %v685_v53 }
 0x24f   :  { %715 = vadd.xlane.f32.xlu2 %v714_v50 }
 0x250   :  { %1628 = vrot.lane.b32.xlu0 %v6854_v38, %s6685_s29 }
 0x251   :  { %v7152_v33 = vpop.xlane.xlu2 %640 }
 0x252   :  { %v7142_v41 = vpop.eup %6443 }
 0x253   :  { %v729_v7 = vsel %vm173_vm1, %v7142_v41, 0.0  ;;  %v7148_v2 = vpop.eup %6445 }
 0x254   :  { %v726_v17 = vsel %vm173_vm1, %v7148_v2, 0.0 }
 0x257   :  { %730 = vadd.xlane.f32.xlu1 %v729_v7  ;;  %724 = vadd.xlane.f32.xlu2 %v723_v0 }
 0x25a   :  { %v7157_v23 = vpop.xlane.xlu2 %649 }
 0x25f   :  { %727 = vadd.xlane.f32.xlu2 %v726_v17  ;;  %v644_v59 = vpop.xlane.xlu1 %643 }
 0x260   :  { %v664_v25 = vsub.f32 %v7079_v20, %v644_v59 }
 0x262   :  { %v693_v29 = vmul.f32 1.442695, %v664_v25 }
 0x264   :  { %6447 = vpow2.f32 %v693_v29 }
 0x26a   :  { %v7159_v39 = vpop.eup %6447 }
 0x26b   :  { %v738_v7 = vsel %vm173_vm1, %v7159_v39, 0.0 }
 0x270   :  { %1602 = vrot.lane.b32.xlu1 %v6850_v36, %s6684_s2 }
 0x271   :  { %v701_v35 = vpop.xlane.xlu1 %700 }
 0x272   :  { %6449 = vrcp.f32 %v701_v35  ;;  %v758_v17 = vand.u32 2147483648, %v701_v35  ;;  %v756_v25 = vand.u32 2147483647, %v701_v35  ;;  %vm752_vm3 = vweird.f32 %v701_v35 }
 0x274   :  { %v759_v5 = vor.u32 1.1754944e-38, %v758_v17  ;;  %vm757_vm5 = vcmp.eq.f32.partialorder %v756_v25, 8.507059e+37 }
 0x277   :  { %1714 = vrot.lane.b32.xlu2 %v6866_v44, %s6684_s2 }
 0x278   :  { %v6450_v50 = vpop.eup %6449  ;;  %1712 = vrot.lane.b32.xlu1 %v6866_v44, %s6685_s29 }
 0x279   :  { %v748_v20 = vmul.f32 %v6450_v50, %v701_v35  ;;  %v704_v53 = vpop.xlane.xlu2 %703  ;;  %vm753_vm2 = vweird.f32 %v6450_v50 }
 0x27a   :  { %6451 = vrcp.f32 %v704_v53  ;;  %739 = vadd.xlane.f32.xlu0 %v738_v7  ;;  %vm754_vm4 = vmor %vm752_vm3, %vm753_vm2  ;;  %v772_v35 = vand.u32 2147483648, %v704_v53  ;;  %v770_v17 = vand.u32 2147483647, %v704_v53  ;;  %vm766_vm7 = vweird.f32 %v704_v53 }
 0x27b   :  { %v749_v0 = vsub.f32 1.0, %v748_v20 }
 0x27c   :  { %vm771_vm9 = vcmp.eq.f32.partialorder %v770_v17, 8.507059e+37 }
 0x27d   :  { %v750_v59 = vmul.f32 %v6450_v50, %v749_v0  ;;  %v6280_v0 = vunpack.i.h.bf16 %v6990_v21 }
 0x27f   :  { %v751_v29 = vadd.f32 %v6450_v50, %v750_v59 }
 0x280   :  { %v6452_v46 = vpop.eup %6451  ;;  %1798 = vrot.lane.b32.xlu1 %v6870_v47, %s6684_s2 }
 0x281   :  { %v755_v4 = vsel %vm754_vm4, %v6450_v50, %v751_v29  ;;  %v762_v27 = vmul.f32 %v6452_v46, %v704_v53  ;;  %vm767_vm6 = vweird.f32 %v6452_v46 }
 0x282   :  { %v760_v14 = vsel %vm757_vm5, %v759_v5, %v755_v4  ;;  %vm768_vm8 = vmor %vm766_vm7, %vm767_vm6  ;;  %v6285_v5 = vunpack.i.h.bf16 %v6987_v13 }
 0x283   :  { %v763_v7 = vsub.f32 1.0, %v762_v27  ;;  %v971_v20 = vmul.f32 %v7091_v60, %v760_v14  ;;  %v773_v27 = vor.u32 1.1754944e-38, %v772_v35 }
 0x285   :  { %v764_v58 = vmul.f32 %v6452_v46, %v763_v7  ;;  %5986 = vmatmul.msk.f32.vlgmr.msra.gmra.mxu2 %vm173_vm1, %v971_v20 }
 0x286   :  { %1164 = vmatpush.msra.mxu2 %v6280_v0 }
 0x287   :  { %v765_v59 = vadd.f32 %v6452_v46, %v764_v58  ;;  %v707_v18 = vpop.xlane.xlu1 %706  ;;  %v662_v58 = vsub.f32 %v7037_v62, %v638_v45 }
 0x288   :  { %6453 = vrcp.f32 %v707_v18  ;;  %1796 = vrot.lane.b32.xlu1 %v6870_v47, %s6685_s29  ;;  %v784_v13 = vand.u32 2147483647, %v707_v18  ;;  %vm780_vm11 = vweird.f32 %v707_v18 }
 0x289   :  { %v769_v4 = vsel %vm768_vm8, %v6452_v46, %v765_v59  ;;  %v710_v14 = vpop.xlane.xlu0 %709  ;;  %v689_v7 = vmul.f32 1.442695, %v662_v58  ;;  %v663_v59 = vsub.f32 %v7063_v11, %v7152_v33  ;;  %v6290_v11 = vunpack.i.h.bf16 %v7017_v49 }
 0x28a   :  { %6455 = vrcp.f32 %v710_v14  ;;  %v774_v21 = vsel %vm771_vm9, %v773_v27, %v769_v4  ;;  %v800_v62 = vand.u32 2147483648, %v710_v14  ;;  %v798_v17 = vand.u32 2147483647, %v710_v14 }
 0x28b   :  { %v972_v60 = vmul.f32 %v7097_v8, %v774_v21  ;;  %v786_v8 = vand.u32 2147483648, %v707_v18  ;;  %6457 = vpow2.f32 %v689_v7  ;;  %vm785_vm14 = vcmp.eq.f32.partialorder %v784_v13, 8.507059e+37 }
 0x28c   :  { %vm794_vm15 = vweird.f32 %v710_v14  ;;  %vm799_vm3 = vcmp.eq.f32.partialorder %v798_v17, 8.507059e+37  ;;  %v691_v33 = vmul.f32 1.442695, %v663_v59 }
 0x28d   :  { %5987 = vmatmul.msk.f32.vlgmr.msrb.gmra.mxu3 %vm173_vm1, %v972_v60  ;;  %v787_v4 = vor.u32 1.1754944e-38, %v786_v8 }
 0x28e   :  { %v6454_v50 = vpop.eup %6453  ;;  %1600 = vrot.lane.b32.xlu0 %v6850_v36, %s6685_s29  ;;  %1190 = vmatpush.msrb.mxu3 %v6285_v5  ;;  %6459 = vpow2.f32 %v691_v33 }
 0x28f   :  { %v776_v53 = vmul.f32 %v6454_v50, %v707_v18  ;;  %vm781_vm10 = vweird.f32 %v6454_v50  ;;  %v801_v18 = vor.u32 1.1754944e-38, %v800_v62 }
 0x290   :  { %v6456_v46 = vpop.eup %6455  ;;  %1826 = vrot.lane.b32.xlu1 %v6878_v51, %s6684_s2  ;;  %vm782_vm13 = vmor %vm780_vm11, %vm781_vm10 }
 0x291   :  { %v777_v25 = vsub.f32 1.0, %v776_v53  ;;  %v790_v29 = vmul.f32 %v6456_v46, %v710_v14  ;;  %vm795_vm12 = vweird.f32 %v6456_v46  ;;  %v6289_v14 = vunpack.i.l.bf16 %v7017_v49 }
 0x292   :  { %vm796_vm2 = vmor %vm794_vm15, %vm795_vm12 }
 0x293   :  { %v778_v20 = vmul.f32 %v6454_v50, %v777_v25  ;;  %v791_v0 = vsub.f32 1.0, %v790_v29  ;;  %v7194_v25 = vpop.eup %6457 }
 0x294   :  { %v7207_v7 = vpop.eup %6459 }
 0x295   :  { %v779_v45 = vadd.f32 %v6454_v50, %v778_v20  ;;  %v792_v35 = vmul.f32 %v6456_v46, %v791_v0 }
 0x296   :  { %1686 = vrot.lane.b32.xlu0 %v6862_v42, %s6684_s2 }
 0x297   :  { %v783_v27 = vsel %vm782_vm13, %v6454_v50, %v779_v45  ;;  %v793_v21 = vadd.f32 %v6456_v46, %v792_v35 }
 0x298   :  { %1770 = vrot.lane.b32.xlu1 %v6880_v52, %s6684_s2  ;;  %v788_v60 = vsel %vm785_vm14, %v787_v4, %v783_v27  ;;  %v7225_v27 = vpop.permute.xlu2 %1572 }
 0x299   :  { %v797_v5 = vsel %vm796_vm2, %v6456_v46, %v793_v21  ;;  %v973_v58 = vmul.f32 %v7103_v43, %v788_v60  ;;  %v665_v46 = vsub.f32 %v7047_v3, %v7169_v61  ;;  %v6311_v43 = vpack.i.bf16 %v6862_v42, %v6834_v28 }
 0x29a   :  { %v802_v53 = vsel %vm799_vm3, %v801_v18, %v797_v5  ;;  %v666_v61 = vsub.f32 %v7071_v16, %v7157_v23  ;;  %v735_v3 = vsel %vm173_vm1, %v7207_v7, 0.0 }
 0x29b   :  { %5988 = vmatmul.msk.f32.vlgmr.msra.gmra.mxu1 %vm173_vm1, %v973_v58  ;;  %v974_v50 = vmul.f32 %v7107_v57, %v802_v53  ;;  %v732_v57 = vsel %vm173_vm1, %v7194_v25, 0.0  ;;  %v695_v29 = vmul.f32 1.442695, %v665_v46  ;;  %v6295_v58 = vunpack.i.h.bf16 %v7043_v1 }
 0x29c   :  { %1216 = vmatpush.msra.mxu1 %v6290_v11  ;;  %v697_v13 = vmul.f32 1.442695, %v666_v61  ;;  %v6316_v11 = vpack.i.bf16 %v6870_v47, %v6850_v36 }
 0x29d   :  { %5989 = vmatmul.msk.f32.vlgmr.msrb.gmra.mxu2 %vm173_vm1, %v974_v50 }
 0x29e   :  { %1242 = vmatpush.msrb.mxu2 %v6289_v14  ;;  %1684 = vrot.lane.b32.xlu0 %v6862_v42, %s6685_s29 }
 0x29f   :  { %v7250_v46 = vpop.permute.xlu1 %1516 }
 0x2a0   :  { %6312 = vrot.lane.b32.xlu1 %v6311_v43, %s6686_s30  ;;  %733 = vadd.xlane.f32.xlu2 %v732_v57 }
 0x2a1   :  { %v719_v49 = vpop.xlane.xlu0 %718 }
 0x2a2   :  { %6461 = vrcp.f32 %v719_v49  ;;  %v842_v45 = vand.u32 2147483648, %v719_v49  ;;  %v840_v16 = vand.u32 2147483647, %v719_v49  ;;  %vm836_vm5 = vweird.f32 %v719_v49 }
 0x2a3   :  { %6463 = vpow2.f32 %v695_v29 }
 0x2a4   :  { %6465 = vpow2.f32 %v697_v13  ;;  %v843_v59 = vor.u32 1.1754944e-38, %v842_v45  ;;  %vm841_vm7 = vcmp.eq.f32.partialorder %v840_v16, 8.507059e+37  ;;  %v6304_v45 = vunpack.i.l.bf16 %v7077_v19 }
 0x2a6   :  { %1740 = vrot.lane.b32.xlu0 %v6872_v48, %s6685_s29 }
 0x2a8   :  { %v6462_v8 = vpop.eup %6461  ;;  %2881 = vrot.lane.b32.xlu1 %v6822_v22, %s6687_s10  ;;  %736 = vadd.xlane.f32.xlu2 %v735_v3 }
 0x2a9   :  { %v832_v20 = vmul.f32 %v6462_v8, %v719_v49  ;;  %v7217_v62 = vpop.eup %6463  ;;  %vm837_vm4 = vweird.f32 %v6462_v8 }
 0x2aa   :  { %v741_v17 = vsel %vm173_vm1, %v7217_v62, 0.0  ;;  %vm838_vm6 = vmor %vm836_vm5, %vm837_vm4  ;;  %v7230_v5 = vpop.eup %6465 }
 0x2ab   :  { %v833_v0 = vsub.f32 1.0, %v832_v20  ;;  %v744_v33 = vsel %vm173_vm1, %v7230_v5, 0.0 }
 0x2ad   :  { %v834_v35 = vmul.f32 %v6462_v8, %v833_v0 }
 0x2ae   :  { %1768 = vrot.lane.b32.xlu0 %v6880_v52, %s6685_s29 }
 0x2af   :  { %v835_v23 = vadd.f32 %v6462_v8, %v834_v35  ;;  %v7227_v18 = vpop.xlane.xlu0 %721 }
 0x2b0   :  { %2937 = vrot.lane.b32.xlu1 %v6830_v26, %s6687_s10  ;;  %742 = vadd.xlane.f32.xlu2 %v741_v17  ;;  %6467 = vrcp.f32 %v7227_v18  ;;  %vm850_vm13 = vweird.f32 %v7227_v18 }
 0x2b1   :  { %v839_v4 = vsel %vm838_vm6, %v6462_v8, %v835_v23 }
 0x2b2   :  { %v844_v21 = vsel %vm841_vm7, %v843_v59, %v839_v4 }
 0x2b3   :  { %v977_v60 = vmul.f32 %v7114_v12, %v844_v21  ;;  %v856_v21 = vand.u32 2147483648, %v7227_v18 }
 0x2b5   :  { %5992 = vmatmul.msk.f32.vlgmr.msra.gmra.mxu2 %vm173_vm1, %v977_v60 }
 0x2b6   :  { %1320 = vmatpush.msra.mxu2 %v6295_v58  ;;  %6317 = vrot.lane.b32.xlu0 %v6316_v11, %s6686_s30  ;;  %v7242_v53 = vpop.eup %6467  ;;  %v854_v58 = vand.u32 2147483647, %v7227_v18 }
 0x2b7   :  { %v846_v50 = vmul.f32 %v7242_v53, %v7227_v18  ;;  %vm851_vm11 = vweird.f32 %v7242_v53 }
 0x2b8   :  { %2909 = vrot.lane.b32.xlu1 %v6826_v24, %s6687_s10  ;;  %745 = vadd.xlane.f32.xlu2 %v744_v33  ;;  %vm7274_vm14 = vmor %vm850_vm13, %vm851_vm11  ;;  %vm855_vm3 = vcmp.eq.f32.partialorder %v854_v58, 8.507059e+37  ;;  %v6305_v33 = vunpack.i.h.bf16 %v7077_v19 }
 0x2b9   :  { %v847_v49 = vsub.f32 1.0, %v846_v50 }
 0x2ba   :  { %v713_v12 = vpop.xlane.xlu2 %712 }
 0x2bb   :  { %6469 = vrcp.f32 %v713_v12  ;;  %v848_v3 = vmul.f32 %v7242_v53, %v847_v49  ;;  %v814_v8 = vand.u32 2147483648, %v713_v12  ;;  %vm808_vm9 = vweird.f32 %v713_v12 }
 0x2bc   :  { %v812_v13 = vand.u32 2147483647, %v713_v12 }
 0x2bd   :  { %v849_v59 = vadd.f32 %v7242_v53, %v848_v3  ;;  %v815_v4 = vor.u32 1.1754944e-38, %v814_v8 }
 0x2be   :  { %2879 = vrot.lane.b32.xlu0 %v6822_v22, %s6688_s11  ;;  %vm813_vm12 = vcmp.eq.f32.partialorder %v812_v13, 8.507059e+37 }
 0x2bf   :  { %v853_v49 = vsel %vm7274_vm14, %v7242_v53, %v849_v59 }
 0x2c0   :  { %2991 = vrot.lane.b32.xlu1 %v6838_v30, %s6688_s11 }
 0x2c1   :  { %v6470_v14 = vpop.eup %6469 }
 0x2c2   :  { %v804_v43 = vmul.f32 %v6470_v14, %v713_v12  ;;  %v716_v57 = vpop.xlane.xlu2 %715  ;;  %vm809_vm8 = vweird.f32 %v6470_v14 }
 0x2c3   :  { %6471 = vrcp.f32 %v716_v57  ;;  %vm7257_vm10 = vmor %vm808_vm9, %vm809_vm8  ;;  %v828_v50 = vand.u32 2147483648, %v716_v57  ;;  %v826_v18 = vand.u32 2147483647, %v716_v57  ;;  %vm822_vm2 = vweird.f32 %v716_v57 }
 0x2c4   :  { %v805_v29 = vsub.f32 1.0, %v804_v43  ;;  %v6294_v43 = vunpack.i.l.bf16 %v7043_v1 }
 0x2c5   :  { %v829_v8 = vor.u32 1.1754944e-38, %v828_v50  ;;  %vm827_vm5 = vcmp.eq.f32.partialorder %v826_v18, 8.507059e+37 }
 0x2c6   :  { %v806_v61 = vmul.f32 %v6470_v14, %v805_v29  ;;  %2935 = vrot.lane.b32.xlu0 %v6830_v26, %s6688_s11  ;;  %v857_v29 = vor.u32 1.1754944e-38, %v856_v21 }
 0x2c8   :  { %v807_v20 = vadd.f32 %v6470_v14, %v806_v61  ;;  %2963 = vrot.lane.b32.xlu1 %v6834_v28, %s6688_s11 }
 0x2c9   :  { %v6472_v0 = vpop.eup %6471 }
 0x2ca   :  { %v811_v35 = vsel %vm7257_vm10, %v6470_v14, %v807_v20  ;;  %v818_v16 = vmul.f32 %v6472_v0, %v716_v57  ;;  %v7263_v23 = vpop.xlane.xlu1 %730  ;;  %v7265_v17 = vpop.xlane.xlu2 %724  ;;  %vm823_vm15 = vweird.f32 %v6472_v0  ;;  %v858_v57 = vsel %vm855_vm3, %v857_v29, %v853_v49 }
 0x2cb   :  { %6473 = vrcp.f32 %v7263_v23  ;;  %v816_v11 = vsel %vm813_vm12, %v815_v4, %v811_v35  ;;  %vm824_vm4 = vmor %vm822_vm2, %vm823_vm15  ;;  %v898_v59 = vand.u32 2147483648, %v7263_v23  ;;  %v978_v21 = vmul.f32 %v7122_v63, %v858_v57 }
 0x2cc   :  { %v819_v60 = vsub.f32 1.0, %v818_v16  ;;  %6475 = vrcp.f32 %v7265_v17  ;;  %v975_v14 = vmul.f32 %v7127_v54, %v816_v11  ;;  %v896_v58 = vand.u32 2147483647, %v7263_v23 }
 0x2cd   :  { %v870_v11 = vand.u32 2147483648, %v7265_v17  ;;  %v868_v50 = vand.u32 2147483647, %v7265_v17  ;;  %vm892_vm8 = vweird.f32 %v7263_v23  ;;  %vm864_vm10 = vweird.f32 %v7265_v17 }
 0x2ce   :  { %v820_v12 = vmul.f32 %v6472_v0, %v819_v60  ;;  %2907 = vrot.lane.b32.xlu0 %v6826_v24, %s6688_s11  ;;  %5990 = vmatmul.msk.f32.vlgmr.msra.gmra.mxu3 %vm173_vm1, %v975_v14  ;;  %v899_v14 = vor.u32 1.1754944e-38, %v898_v59  ;;  %vm897_vm11 = vcmp.eq.f32.partialorder %v896_v58, 8.507059e+37  ;;  %v7335_v59 = vpop.permute.xlu0 %1628 }
 0x2cf   :  { %1268 = vmatpush.msra.mxu3 %v6294_v43  ;;  %v871_v49 = vor.u32 1.1754944e-38, %v870_v11  ;;  %vm869_vm13 = vcmp.eq.f32.partialorder %v868_v50, 8.507059e+37  ;;  %v6321_v11 = vpack.i.bf16 %v6878_v51, %v6866_v44 }
 0x2d0   :  { %v821_v61 = vadd.f32 %v6472_v0, %v820_v12  ;;  %3105 = vrot.lane.b32.xlu1 %v6854_v38, %s6687_s10  ;;  %1658 = vrot.lane.b32.xlu2 %v6858_v40, %s6684_s2 }
 0x2d1   :  { %v6474_v3 = vpop.eup %6473 }
 0x2d2   :  { %v6476_v54 = vpop.eup %6475  ;;  %v825_v1 = vsel %vm824_vm4, %v6472_v0, %v821_v61  ;;  %v888_v53 = vmul.f32 %v6474_v3, %v7263_v23  ;;  %v7291_v20 = vpop.xlane.xlu2 %727  ;;  %vm893_vm6 = vweird.f32 %v6474_v3 }
 0x2d3   :  { %v860_v13 = vmul.f32 %v6476_v54, %v7265_v17  ;;  %6477 = vrcp.f32 %v7291_v20  ;;  %v830_v16 = vsel %vm827_vm5, %v829_v8, %v825_v1  ;;  %vm865_vm7 = vweird.f32 %v6476_v54  ;;  %vm894_vm9 = vmor %vm892_vm8, %vm893_vm6 }
 0x2d4   :  { %v889_v35 = vsub.f32 1.0, %v888_v53  ;;  %v976_v0 = vmul.f32 %v7133_v55, %v830_v16  ;;  %vm866_vm12 = vmor %vm864_vm10, %vm865_vm7  ;;  %v884_v8 = vand.u32 2147483648, %v7291_v20  ;;  %v6300_v53 = vunpack.i.h.bf16 %v7025_v56 }
 0x2d5   :  { %v861_v4 = vsub.f32 1.0, %v860_v13  ;;  %v882_v13 = vand.u32 2147483647, %v7291_v20  ;;  %vm878_vm15 = vweird.f32 %v7291_v20  ;;  %v6299_v16 = vunpack.i.l.bf16 %v7025_v56 }
 0x2d6   :  { %v890_v60 = vmul.f32 %v6474_v3, %v889_v35  ;;  %3049 = vrot.lane.b32.xlu0 %v6846_v34, %s6687_s10  ;;  %5991 = vmatmul.msk.f32.vlgmr.msrb.gmra.mxu1 %vm173_vm1, %v976_v0  ;;  %v6306_v56 = vpack.i.bf16 %v6846_v34, %v6830_v26 }
 0x2d7   :  { %v862_v12 = vmul.f32 %v6476_v54, %v861_v4  ;;  %5993 = vmatmul.msk.f32.vlgmr.msrb.gmra.mxu3 %vm173_vm1, %v978_v21  ;;  %1294 = vmatpush.msrb.mxu1 %v6304_v45  ;;  %vm883_vm3 = vcmp.eq.f32.partialorder %v882_v13, 8.507059e+37 }
 0x2d8   :  { %v891_v55 = vadd.f32 %v6474_v3, %v890_v60  ;;  %1346 = vmatpush.msrb.mxu3 %v6305_v33  ;;  %3077 = vrot.lane.b32.xlu1 %v6850_v36, %s6687_s10 }
 0x2d9   :  { %v6478_v63 = vpop.eup %6477  ;;  %v863_v43 = vadd.f32 %v6476_v54, %v862_v12  ;;  %1656 = vrot.lane.b32.xlu2 %v6858_v40, %s6685_s29 }
 0x2da   :  { %v895_v19 = vsel %vm894_vm9, %v6474_v3, %v891_v55  ;;  %v874_v23 = vmul.f32 %v6478_v63, %v7291_v20  ;;  %vm879_vm14 = vweird.f32 %v6478_v63 }
 0x2db   :  { %v867_v18 = vsel %vm866_vm12, %v6476_v54, %v863_v43  ;;  %v900_v29 = vsel %vm897_vm11, %v899_v14, %v895_v19  ;;  %vm880_vm2 = vmor %vm878_vm15, %vm879_vm14 }
 0x2dc   :  { %v875_v61 = vsub.f32 1.0, %v874_v23  ;;  %v872_v1 = vsel %vm869_vm13, %v871_v49, %v867_v18  ;;  %v981_v17 = vmul.f32 %v7142_v41, %v900_v29  ;;  %v885_v41 = vor.u32 1.1754944e-38, %v884_v8  ;;  %v7384_v29 = vpop.permute.xlu2 %1714 }
 0x2dd   :  { %v979_v3 = vmul.f32 %v7140_v37, %v872_v1 }
 0x2de   :  { %v876_v57 = vmul.f32 %v6478_v63, %v875_v61  ;;  %3021 = vrot.lane.b32.xlu0 %v6842_v32, %s6687_s10 }
 0x2df   :  { %5994 = vmatmul.msk.f32.vlgmr.msra.gmra.mxu1 %vm173_vm1, %v979_v3  ;;  %5996 = vmatmul.msk.f32.vlgmr.msra.gmra.mxu3 %vm173_vm1, %v981_v17 }
 0x2e0   :  { %v877_v54 = vadd.f32 %v6478_v63, %v876_v57  ;;  %1372 = vmatpush.msra.mxu1 %v6300_v53  ;;  %6002 = vmatpush.xpose.msk.msra.mxu3 %vm173_vm1, %v7053_v6 }
 0x2e1   :  { %3159 = vrot.lane.b32.xlu1 %v6862_v42, %s6688_s11  ;;  %1742 = vrot.lane.b32.xlu2 %v6872_v48, %s6684_s2 }
 0x2e2   :  { %v881_v37 = vsel %vm880_vm2, %v6478_v63, %v877_v54  ;;  %v7331_v45 = vpop.permute.xlu1 %1602 }
 0x2e3   :  { %v886_v35 = vsel %vm883_vm3, %v885_v41, %v881_v37 }
 0x2e4   :  { %v980_v20 = vmul.f32 %v7148_v2, %v886_v35 }
 0x2e6   :  { %3103 = vrot.lane.b32.xlu0 %v6854_v38, %s6688_s11  ;;  %5995 = vmatmul.msk.f32.vlgmr.msrb.gmra.mxu2 %vm173_vm1, %v980_v20 }
 0x2e7   :  { %1398 = vmatpush.msrb.mxu2 %v6299_v16 }
 0x2e9   :  { %3131 = vrot.lane.b32.xlu1 %v6858_v40, %s6688_s11  ;;  %1824 = vrot.lane.b32.xlu2 %v6878_v51, %s6685_s29 }
 0x2ea   :  { %v7344_v6 = vpop.permute.xlu1 %1712 }
 0x2ed   :  { %v740_v4 = vpop.xlane.xlu0 %739 }
 0x2ee   :  { %6479 = vrcp.f32 %v740_v4  ;;  %3075 = vrot.lane.b32.xlu0 %v6850_v36, %s6688_s11  ;;  %v940_v58 = vand.u32 2147483648, %v740_v4  ;;  %v938_v12 = vand.u32 2147483647, %v740_v4  ;;  %vm934_vm5 = vweird.f32 %v740_v4 }
 0x2f0   :  { %v941_v63 = vor.u32 1.1754944e-38, %v940_v58  ;;  %vm939_vm7 = vcmp.eq.f32.partialorder %v938_v12, 8.507059e+37  ;;  %v9094_v12 = vld [vmem:[#allocation16_spill] sm:$0xff] }
 0x2f1   :  { %3273 = vrot.lane.b32.xlu1 %v6870_v47, %s6687_s10  ;;  %6307 = vrot.lane.b32.xlu2 %v6306_v56, %s6686_s30 }
 0x2f2   :  { %v7353_v2 = vpop.permute.xlu1 %1798 }
 0x2f4   :  { %v6480_v0 = vpop.eup %6479 }
 0x2f5   :  { %v930_v21 = vmul.f32 %v6480_v0, %v740_v4  ;;  %vm935_vm4 = vweird.f32 %v6480_v0 }
 0x2f6   :  { %3217 = vrot.lane.b32.xlu0 %v6872_v48, %s6687_s10  ;;  %vm936_vm6 = vmor %vm934_vm5, %vm935_vm4 }
 0x2f7   :  { %v931_v60 = vsub.f32 1.0, %v930_v21 }
 0x2f9   :  { %v932_v33 = vmul.f32 %v6480_v0, %v931_v60  ;;  %6322 = vrot.lane.b32.xlu2 %v6321_v11, %s6686_s30 }
 0x2fa   :  { %v7360_v50 = vpop.permute.xlu1 %1796 }
 0x2fb   :  { %v933_v55 = vadd.f32 %v6480_v0, %v932_v33 }
 0x2fd   :  { %v937_v14 = vsel %vm936_vm6, %v6480_v0, %v933_v55 }
 0x2fe   :  { %3189 = vrot.lane.b32.xlu0 %v6866_v44, %s6687_s10  ;;  %v942_v43 = vsel %vm939_vm7, %v941_v63, %v937_v14 }
 0x2ff   :  { %v984_v19 = vmul.f32 %v7159_v39, %v942_v43 }
 0x300   :  { %v7365_v49 = vpop.permute.xlu0 %1600 }
 0x301   :  { %5999 = vmatmul.msk.f32.vlgmr.msrb.gmra.mxu3 %vm173_vm1, %v984_v19  ;;  %2993 = vrot.lane.b32.xlu2 %v6838_v30, %s6687_s10 }
 0x302   :  { %6008 = vmatpush.xpose.msk.msrb.mxu3 %vm173_vm1, %v7069_v15  ;;  %v7372_v23 = vpop.permute.xlu1 %1826 }
 0x308   :  { %v7374_v18 = vpop.permute.xlu0 %1686 }
 0x309   :  { %6003 = vmatmul.msk.f32.vlgmr.msra.gmra.mxu3 %vm173_vm1, %v7061_v10  ;;  %2965 = vrot.lane.b32.xlu2 %v6834_v28, %s6687_s10 }
 0x30a   :  { %6014 = vmatpush.xpose.msk.msra.mxu3 %vm173_vm1, %v7085_v31  ;;  %v7382_v39 = vpop.permute.xlu1 %1770 }
 0x310   :  { %v7386_v61 = vpop.permute.xlu0 %1684 }
 0x311   :  { %6009 = vmatmul.msk.f32.vlgmr.msrb.gmra.mxu3 %vm173_vm1, %v7059_v9  ;;  %3047 = vrot.lane.b32.xlu2 %v6846_v34, %s6688_s11 }
 0x312   :  { %v7392_v15 = vpop.permute.xlu1 %6312 }
 0x313   :  { %v734_v10 = vpop.xlane.xlu2 %733  ;;  %v6314_v1 = vunpack.i.l.bf16 %v7392_v15 }
 0x314   :  { %6481 = vrcp.f32 %v734_v10  ;;  %v912_v57 = vand.u32 2147483648, %v734_v10  ;;  %v910_v13 = vand.u32 2147483647, %v734_v10  ;;  %vm906_vm9 = vweird.f32 %v734_v10 }
 0x315   :  { %2335 = vmatpush.msrb.mxu0 %v6314_v1 }
 0x316   :  { %v913_v35 = vor.u32 1.1754944e-38, %v912_v57  ;;  %vm911_vm11 = vcmp.eq.f32.partialorder %v910_v13, 8.507059e+37  ;;  %v9095_v57 = vld [vmem:[#allocation12_spill] sm:$0xff] }
 0x318   :  { %v7395_v31 = vpop.permute.xlu0 %1740 }
 0x319   :  { %6015 = vmatmul.msk.f32.vlgmr.msra.gmra.mxu3 %vm173_vm1, %v7225_v27  ;;  %3019 = vrot.lane.b32.xlu2 %v6842_v32, %s6688_s11 }
 0x31a   :  { %v6482_v17 = vpop.eup %6481 }
 0x31b   :  { %v902_v9 = vmul.f32 %v6482_v17, %v734_v10  ;;  %v737_v8 = vpop.xlane.xlu2 %736  ;;  %vm907_vm8 = vweird.f32 %v6482_v17 }
 0x31c   :  { %6483 = vrcp.f32 %v737_v8  ;;  %vm908_vm10 = vmor %vm906_vm9, %vm907_vm8  ;;  %v926_v60 = vand.u32 2147483648, %v737_v8  ;;  %v924_v58 = vand.u32 2147483647, %v737_v8  ;;  %vm920_vm13 = vweird.f32 %v737_v8 }
 0x31d   :  { %v903_v3 = vsub.f32 1.0, %v902_v9 }
 0x31e   :  { %v927_v14 = vor.u32 1.1754944e-38, %v926_v60  ;;  %vm925_vm15 = vcmp.eq.f32.partialorder %v924_v58, 8.507059e+37 }
 0x31f   :  { %v904_v53 = vmul.f32 %v6482_v17, %v903_v3 }
 0x320   :  { %v7401_v54 = vpop.permute.xlu0 %1768 }
 0x321   :  { %v905_v41 = vadd.f32 %v6482_v17, %v904_v53  ;;  %3161 = vrot.lane.b32.xlu2 %v6862_v42, %s6687_s10 }
 0x322   :  { %v6484_v37 = vpop.eup %6483 }
 0x323   :  { %v909_v27 = vsel %vm908_vm10, %v6482_v17, %v905_v41  ;;  %v916_v20 = vmul.f32 %v6484_v37, %v737_v8  ;;  %v743_v16 = vpop.xlane.xlu2 %742  ;;  %vm921_vm12 = vweird.f32 %v6484_v37 }
 0x324   :  { %6485 = vrcp.f32 %v743_v16  ;;  %v914_v56 = vsel %vm911_vm11, %v913_v35, %v909_v27  ;;  %vm922_vm14 = vmor %vm920_vm13, %vm921_vm12  ;;  %v954_v17 = vand.u32 2147483648, %v743_v16  ;;  %v952_v3 = vand.u32 2147483647, %v743_v16 }
 0x325   :  { %v917_v4 = vsub.f32 1.0, %v916_v20  ;;  %v982_v0 = vmul.f32 %v7194_v25, %v914_v56  ;;  %vm948_vm3 = vweird.f32 %v743_v16 }
 0x326   :  { %v955_v41 = vor.u32 1.1754944e-38, %v954_v17  ;;  %vm953_vm5 = vcmp.eq.f32.partialorder %v952_v3, 8.507059e+37 }
 0x327   :  { %v918_v21 = vmul.f32 %v6484_v37, %v917_v4  ;;  %5997 = vmatmul.msk.f32.vlgmr.msrb.gmra.mxu1 %vm173_vm1, %v982_v0 }
 0x328   :  { %v7407_v11 = vpop.permute.xlu0 %6317  ;;  %6004 = vmatpush.xpose.msk.msrb.mxu1 %vm173_vm1, %v9094_v12 }
 0x329   :  { %v919_v33 = vadd.f32 %v6484_v37, %v918_v21  ;;  %v6319_v55 = vunpack.i.l.bf16 %v7407_v11  ;;  %3133 = vrot.lane.b32.xlu2 %v6858_v40, %s6687_s10  ;;  %v9096_v21 = vld [vmem:[#allocation15_spill] sm:$0xff] }
 0x32a   :  { %v6486_v63 = vpop.eup %6485 }
 0x32b   :  { %v923_v25 = vsel %vm922_vm14, %v6484_v37, %v919_v33  ;;  %v944_v43 = vmul.f32 %v6486_v63, %v743_v16  ;;  %v746_v19 = vpop.xlane.xlu2 %745  ;;  %2439 = vmatpush.msra.mxu0 %v6319_v55  ;;  %vm949_vm2 = vweird.f32 %v6486_v63 }
 0x32c   :  { %6487 = vrcp.f32 %v746_v19  ;;  %v928_v1 = vsel %vm925_vm15, %v927_v14, %v923_v25  ;;  %vm950_vm4 = vmor %vm948_vm3, %vm949_vm2  ;;  %v968_v16 = vand.u32 2147483648, %v746_v19  ;;  %v966_v0 = vand.u32 2147483647, %v746_v19  ;;  %v9098_v25 = vld [vmem:[#allocation14_spill] sm:$0xff] }
 0x32d   :  { %v945_v10 = vsub.f32 1.0, %v944_v43  ;;  %v983_v9 = vmul.f32 %v7207_v7, %v928_v1  ;;  %vm962_vm7 = vweird.f32 %v746_v19  ;;  %v9099_v43 = vld [vmem:[#allocation13_spill] sm:$0xff] }
 0x32e   :  { %v969_v58 = vor.u32 1.1754944e-38, %v968_v16  ;;  %vm967_vm9 = vcmp.eq.f32.partialorder %v966_v0, 8.507059e+37 }
 0x32f   :  { %v946_v8 = vmul.f32 %v6486_v63, %v945_v10  ;;  %5998 = vmatmul.msk.f32.vlgmr.msra.gmra.mxu2 %vm173_vm1, %v983_v9 }
 0x330   :  { %6006 = vmatpush.xpose.msk.msra.mxu2 %vm173_vm1, %v9095_v57 }
 0x331   :  { %v947_v53 = vadd.f32 %v6486_v63, %v946_v8  ;;  %3215 = vrot.lane.b32.xlu2 %v6872_v48, %s6688_s11 }
 0x332   :  { %v6488_v13 = vpop.eup %6487 }
 0x333   :  { %v951_v37 = vsel %vm950_vm4, %v6486_v63, %v947_v53  ;;  %v958_v27 = vmul.f32 %v6488_v13, %v746_v19  ;;  %v1659_v7 = vpop.permute.xlu2 %1658  ;;  %vm963_vm6 = vweird.f32 %v6488_v13  ;;  %v9097_v63 = vld [vmem:[#allocation17_spill] sm:$0xff]  ;;  %v9101_v19 = vld [vmem:[#allocation18_spill] sm:$0xff] }
 0x334   :  { %6020 = vmatpush.xpose.msk.msrb.mxu3 %vm173_vm1, %v1659_v7  ;;  %v956_v35 = vsel %vm953_vm5, %v955_v41, %v951_v37  ;;  %vm964_vm8 = vmor %vm962_vm7, %vm963_vm6 }
 0x335   :  { %v959_v20 = vsub.f32 1.0, %v958_v27  ;;  %v985_v4 = vmul.f32 %v7217_v62, %v956_v35 }
 0x337   :  { %v960_v56 = vmul.f32 %v6488_v13, %v959_v20  ;;  %6000 = vmatmul.msk.f32.vlgmr.msra.gmra.mxu1 %vm173_vm1, %v985_v4 }
 0x338   :  { %6010 = vmatpush.xpose.msk.msra.mxu1 %vm173_vm1, %v9096_v21 }
 0x339   :  { %v961_v60 = vadd.f32 %v6488_v13, %v960_v56  ;;  %3187 = vrot.lane.b32.xlu2 %v6866_v44, %s6688_s11 }
 0x33b   :  { %v965_v33 = vsel %vm964_vm8, %v6488_v13, %v961_v60  ;;  %v1657_v12 = vpop.permute.xlu2 %1656 }
 0x33c   :  { %6021 = vmatmul.msk.f32.vlgmr.msrb.gmra.mxu3 %vm173_vm1, %v1657_v12  ;;  %v970_v62 = vsel %vm967_vm9, %v969_v58, %v965_v33 }
 0x33d   :  { %v986_v55 = vmul.f32 %v7230_v5, %v970_v62  ;;  %v9100_v5 = vld [vmem:[#allocation19_spill] sm:$0xff] }
 0x33f   :  { %6001 = vmatmul.msk.f32.vlgmr.msrb.gmra.mxu2 %vm173_vm1, %v986_v55  ;;  %6005 = vmatmul.msk.f32.vlgmr.msrb.gmra.mxu1 %vm173_vm1, %v9097_v63 }
 0x340   :  { %6012 = vmatpush.xpose.msk.msrb.mxu2 %vm173_vm1, %v9098_v25  ;;  %6016 = vmatpush.xpose.msk.msrb.mxu1 %vm173_vm1, %v7331_v45  ;;  %v7532_v25 = vpop.permute.xlu1 %2881 }
 0x343   :  { %v1743_v14 = vpop.permute.xlu2 %1742 }
 0x344   :  { %6026 = vmatpush.xpose.msk.msra.mxu3 %vm173_vm1, %v1743_v14 }
 0x347   :  { %6007 = vmatmul.msk.f32.vlgmr.msra.gmra.mxu2 %vm173_vm1, %v9099_v43  ;;  %6011 = vmatmul.msk.f32.vlgmr.msra.gmra.mxu1 %vm173_vm1, %v7250_v46 }
 0x348   :  { %6032 = vmatpush.xpose.msk.msrb.mxu3 %vm173_vm1, %v7372_v23  ;;  %6018 = vmatpush.xpose.msk.msra.mxu2 %vm173_vm1, %v9100_v5 }
 0x349   :  { %6022 = vmatpush.xpose.msk.msra.mxu1 %vm173_vm1, %v7374_v18  ;;  %6027 = vmatmul.msk.f32.vlgmr.msra.gmra.mxu3 %vm173_vm1, %v7395_v31  ;;  %v7482_v31 = vpop.f32.mrf.mxu1 }
 0x34a   :  { %9108 = vst [vmem:[#allocation19_spill] sm:$0xff] %v7482_v31 }
 0x34b   :  { %v1825_v45 = vpop.permute.xlu2 %1824 }
 0x34f   :  { %6013 = vmatmul.msk.f32.vlgmr.msrb.gmra.mxu2 %vm173_vm1, %v9101_v19  ;;  %6017 = vmatmul.msk.f32.vlgmr.msrb.gmra.mxu1 %vm173_vm1, %v7365_v49  ;;  %v7466_v49 = vpop.f32.mrf.mxu3  ;;  %v7542_v19 = vpop.permute.xlu0 %2879 }
 0x350   :  { %6024 = vmatpush.xpose.msk.msrb.mxu2 %vm173_vm1, %v7384_v29  ;;  %6028 = vmatpush.xpose.msk.msrb.mxu1 %vm173_vm1, %v7382_v39  ;;  %9102 = vst [vmem:[#allocation16_spill] sm:$0xff] %v7466_v49 }
 0x351   :  { %6033 = vmatmul.msk.f32.vlgmr.msrb.gmra.mxu3 %vm173_vm1, %v1825_v45 }
 0x353   :  { %v6308_v46 = vpop.permute.xlu2 %6307  ;;  %v7487_v1 = vpop.f32.mrf.mxu1 }
 0x354   :  { %v6310_v23 = vunpack.i.h.bf16 %v6308_v46  ;;  %v6309_v18 = vunpack.i.l.bf16 %v6308_v46  ;;  %9110 = vst [vmem:[#allocation20_spill] sm:$0xff] %v7487_v1  ;;  %v7544_v46 = vpop.permute.xlu1 %2937 }
 0x356   :  { %2309 = vmatpush.msra.mxu3 %v6309_v18 }
 0x357   :  { %6019 = vmatmul.msk.f32.vlgmr.msra.gmra.mxu2 %vm173_vm1, %v7335_v59  ;;  %6023 = vmatmul.msk.f32.vlgmr.msra.gmra.mxu1 %vm173_vm1, %v7386_v61  ;;  %v7472_v39 = vpop.f32.mrf.mxu3 }
 0x358   :  { %6030 = vmatpush.xpose.msk.msra.mxu2 %vm173_vm1, %v7353_v2  ;;  %2413 = vmatpush.msrb.mxu3 %v6310_v23  ;;  %9103 = vst [vmem:[#allocation12_spill] sm:$0xff] %v7472_v39 }
 0x35b   :  { %v7497_v3 = vpop.permute.xlu2 %6322 }
 0x35c   :  { %v7491_v17 = vpop.f32.mrf.mxu1  ;;  %v6324_v44 = vunpack.i.l.bf16 %v7497_v3 }
 0x35d   :  { %9112 = vst [vmem:[#allocation22_spill] sm:$0xff] %v7491_v17 }
 0x35f   :  { %6025 = vmatmul.msk.f32.vlgmr.msrb.gmra.mxu2 %vm173_vm1, %v7344_v6  ;;  %6029 = vmatmul.msk.f32.vlgmr.msrb.gmra.mxu1 %vm173_vm1, %v7401_v54  ;;  %v7474_v59 = vpop.f32.mrf.mxu3  ;;  %v7485_v54 = vpop.f32.mrf.mxu2 }
 0x360   :  { %9104 = vst [vmem:[#allocation15_spill] sm:$0xff] %v7474_v59 }
 0x361   :  { %9109 = vst [vmem:[#allocation18_spill] sm:$0xff] %v7485_v54 }
 0x363   :  { %v7505_v41 = vpop.permute.xlu2 %2993 }
 0x367   :  { %6031 = vmatmul.msk.f32.vlgmr.msra.gmra.mxu2 %vm173_vm1, %v7360_v50  ;;  %v7476_v29 = vpop.f32.mrf.mxu3  ;;  %v7489_v50 = vpop.f32.mrf.mxu2 }
 0x368   :  { %9105 = vst [vmem:[#allocation17_spill] sm:$0xff] %v7476_v29 }
 0x369   :  { %9111 = vst [vmem:[#allocation21_spill] sm:$0xff] %v7489_v50 }
 0x36b   :  { %v7513_v35 = vpop.permute.xlu2 %2965 }
 0x36f   :  { %v7493_v9 = vpop.f32.mrf.mxu2 }
 0x370   :  { %9113 = vst [vmem:[#allocation23_spill] sm:$0xff] %v7493_v9 }
 0x373   :  { %v7517_v0 = vpop.permute.xlu2 %3047 }
 0x377   :  { %v7499_v53 = vpop.f32.mrf.mxu2 }
 0x378   :  { %9115 = vst [vmem:[#allocation25_spill] sm:$0xff] %v7499_v53 }
 0x37b   :  { %v7526_v62 = vpop.permute.xlu2 %3019 }
 0x383   :  { %v7536_v43 = vpop.permute.xlu2 %3161 }
 0x384   :  { %v7478_v61 = vpop.f32.mrf.mxu3  ;;  %9122 = vst [vmem:[#allocation32_spill] sm:$0xff] %v7536_v43 }
 0x385   :  { %9106 = vst [vmem:[#allocation14_spill] sm:$0xff] %v7478_v61 }
 0x38c   :  { %v7480_v2 = vpop.f32.mrf.mxu3 }
 0x38d   :  { %9107 = vst [vmem:[#allocation13_spill] sm:$0xff] %v7480_v2 }
 0x394   :  { %v1513_v6 = vpop.f32.mrf.mxu3 }
 0x395   :  { %v1861_v10 = vsel %vm173_vm1, %v1513_v6, -inf }
 0x396   :  { %1862 = vmax.xlane.f32.xlu2 %v1861_v10  ;;  %v7547_v10 = vpop.permute.xlu2 %3133 }
 0x39c   :  { %v7519_v21 = vpop.f32.mrf.mxu3 }
 0x39d   :  { %v1870_v33 = vsel %vm173_vm1, %v7519_v21, -inf }
 0x3a4   :  { %v7495_v8 = vpop.f32.mrf.mxu1 }
 0x3a5   :  { %9114 = vst [vmem:[#allocation24_spill] sm:$0xff] %v7495_v8 }
 0x3b2   :  { %v7503_v13 = vpop.f32.mrf.mxu2 }
 0x3b3   :  { %9117 = vst [vmem:[#allocation27_spill] sm:$0xff] %v7503_v13 }
 0x3b4   :  { %v7501_v57 = vpop.f32.mrf.mxu1 }
 0x3b5   :  { %9116 = vst [vmem:[#allocation26_spill] sm:$0xff] %v7501_v57 }
 0x3bc   :  { %v7507_v37 = vpop.f32.mrf.mxu1 }
 0x3bf   :  { %v7530_v63 = vpop.f32.mrf.mxu3 }
 0x3c2   :  { %v7509_v27 = vpop.f32.mrf.mxu2 }
 0x3c3   :  { %9118 = vst [vmem:[#allocation28_spill] sm:$0xff] %v7509_v27 }
 0x3c4   :  { %v7511_v7 = vpop.f32.mrf.mxu1 }
 0x3c5   :  { %9119 = vst [vmem:[#allocation29_spill] sm:$0xff] %v7511_v7 }
 0x3ca   :  { %v1485_v20 = vpop.f32.mrf.mxu2 }
 0x3cb   :  { %v1858_v4 = vsel %vm173_vm1, %v1485_v20, -inf }
 0x3cc   :  { %v1625_v16 = vpop.f32.mrf.mxu1  ;;  %1859 = vmax.xlane.f32.xlu0 %v1858_v4  ;;  %v7540_v45 = vpop.f32.mrf.mxu3 }
 0x3cd   :  { %v1873_v56 = vsel %vm173_vm1, %v1625_v16, -inf  ;;  %9123 = vst [vmem:[#allocation33_spill] sm:$0xff] %v7540_v45 }
 0x3ce   :  { %1874 = vmax.xlane.f32.xlu1 %v1873_v56  ;;  %v7551_v56 = vpop.permute.xlu0 %2935 }
 0x3d2   :  { %v7521_v60 = vpop.f32.mrf.mxu2 }
 0x3d3   :  { %9120 = vst [vmem:[#allocation30_spill] sm:$0xff] %v7521_v60 }
 0x3d4   :  { %v1709_v58 = vpop.f32.mrf.mxu1  ;;  %v7549_v4 = vpop.f32.mrf.mxu3 }
 0x3d5   :  { %v1882_v12 = vsel %vm173_vm1, %v1709_v58, -inf }
 0x3d6   :  { %1871 = vmax.xlane.f32.xlu1 %v1870_v33  ;;  %1883 = vmax.xlane.f32.xlu0 %v1882_v12  ;;  %v7553_v33 = vpop.permute.xlu1 %2909  ;;  %v1897_v12 = vsel %vm173_vm1, %v7549_v4, -inf  ;;  %v7559_v49 = vpop.permute.xlu0 %2907 }
 0x3da   :  { %v7528_v55 = vpop.f32.mrf.mxu2 }
 0x3db   :  { %9121 = vst [vmem:[#allocation31_spill] sm:$0xff] %v7528_v55 }
 0x3de   :  { %v7561_v54 = vpop.permute.xlu1 %2991 }
 0x3e2   :  { %v7534_v14 = vpop.f32.mrf.mxu2 }
 0x3e3   :  { %v1885_v5 = vsel %vm173_vm1, %v7534_v14, -inf }
 0x3e4   :  { %1886 = vmax.xlane.f32.xlu0 %v1885_v5  ;;  %v7557_v5 = vpop.permute.xlu2 %3215 }
 0x3e5   :  { %9124 = vst [vmem:[#allocation34_spill] sm:$0xff] %v7557_v5 }
 0x3e6   :  { %v7567_v45 = vpop.permute.xlu1 %2963 }
 0x3ea   :  { %v1821_v23 = vpop.f32.mrf.mxu2 }
 0x3eb   :  { %v1894_v18 = vsel %vm173_vm1, %v1821_v23, -inf }
 0x3ec   :  { %1895 = vmax.xlane.f32.xlu2 %v1894_v18  ;;  %v7563_v55 = vpop.permute.xlu2 %3187  ;;  %v7565_v18 = vpop.permute.xlu0 %3049 }
 0x3ed   :  { %9125 = vst [vmem:[#allocation35_spill] sm:$0xff] %v7563_v55 }
 0x3ee   :  { %v7571_v13 = vpop.permute.xlu1 %3105 }
 0x3f4   :  { %1898 = vmax.xlane.f32.xlu2 %v1897_v12  ;;  %v7569_v61 = vpop.permute.xlu0 %3021 }
 0x3f6   :  { %v7579_v53 = vpop.permute.xlu1 %3077 }
 0x3fc   :  { %v7577_v29 = vpop.permute.xlu0 %3103 }
 0x3fd   :  { %9126 = vst [vmem:[#allocation36_spill] sm:$0xff] %v7577_v29 }
 0x3fe   :  { %v7583_v59 = vpop.permute.xlu1 %3159 }
 0x3ff   :  { %9127 = vst [vmem:[#allocation37_spill] sm:$0xff] %v7583_v59 }
 0x404   :  { %v7581_v17 = vpop.permute.xlu0 %3075 }
 0x409   :  { %v1863_v7 = vpop.xlane.xlu2 %1862 }
 0x40a   :  { %v1903_v27 = vsub.f32 %v1513_v6, %v1863_v7 }
 0x40c   :  { %v1922_v57 = vmul.f32 1.442695, %v1903_v27  ;;  %v7585_v6 = vpop.permute.xlu0 %3217 }
 0x40d   :  { %9128 = vst [vmem:[#allocation38_spill] sm:$0xff] %v7585_v6 }
 0x40e   :  { %6489 = vpow2.f32 %v1922_v57  ;;  %v7587_v57 = vpop.permute.xlu1 %3131 }
 0x414   :  { %v7573_v12 = vpop.eup %6489  ;;  %v7591_v27 = vpop.permute.xlu0 %3189 }
 0x415   :  { %v1957_v8 = vsel %vm173_vm1, %v7573_v12, 0.0 }
 0x416   :  { %1958 = vadd.xlane.f32.xlu1 %v1957_v8  ;;  %v7593_v7 = vpop.permute.xlu1 %3273 }
 0x417   :  { %9129 = vst [vmem:[#allocation39_spill] sm:$0xff] %v7593_v7  ;;  %v6315_v7 = vunpack.i.h.bf16 %v7392_v15  ;;  %v1867_v15 = vsel %vm173_vm1, %v7521_v60, -inf }
 0x42f   :  { %3245 = vrot.lane.b32.xlu1 %v6880_v52, %s6687_s10 }
 0x43f   :  { %v1860_v8 = vpop.xlane.xlu0 %1859 }
 0x440   :  { %v1902_v9 = vsub.f32 %v1485_v20, %v1860_v8 }
 0x441   :  { %v1875_v1 = vpop.xlane.xlu1 %1874 }
 0x442   :  { %v1920_v39 = vmul.f32 1.442695, %v1902_v9  ;;  %v1907_v50 = vsub.f32 %v1625_v16, %v1875_v1 }
 0x444   :  { %6491 = vpow2.f32 %v1920_v39  ;;  %v1930_v31 = vmul.f32 1.442695, %v1907_v50 }
 0x446   :  { %6493 = vpow2.f32 %v1930_v31 }
 0x449   :  { %v1884_v36 = vpop.xlane.xlu0 %1883 }
 0x44a   :  { %v7595_v48 = vpop.eup %6491  ;;  %v1910_v34 = vsub.f32 %v1709_v58, %v1884_v36 }
 0x44b   :  { %v1954_v26 = vsel %vm173_vm1, %v7595_v48, 0.0 }
 0x44c   :  { %1955 = vadd.xlane.f32.xlu2 %v1954_v26  ;;  %v1936_v2 = vmul.f32 1.442695, %v1910_v34  ;;  %v7599_v5 = vpop.eup %6493  ;;  %v1872_v34 = vpop.xlane.xlu1 %1871 }
 0x44d   :  { %v1969_v20 = vsel %vm173_vm1, %v7599_v5, 0.0  ;;  %v1906_v16 = vsub.f32 %v7519_v21, %v1872_v34 }
 0x44e   :  { %6495 = vpow2.f32 %v1936_v2 }
 0x454   :  { %1970 = vadd.xlane.f32.xlu2 %v1969_v20  ;;  %v7603_v1 = vpop.eup %6495 }
 0x455   :  { %v1978_v39 = vsel %vm173_vm1, %v7603_v1, 0.0 }
 0x456   :  { %1979 = vadd.xlane.f32.xlu0 %v1978_v39 }
 0x457   :  { %v1887_v2 = vpop.xlane.xlu0 %1886 }
 0x458   :  { %v1911_v58 = vsub.f32 %v7534_v14, %v1887_v2 }
 0x45a   :  { %v1938_v8 = vmul.f32 1.442695, %v1911_v58 }
 0x45f   :  { %v1896_v31 = vpop.xlane.xlu2 %1895 }
 0x460   :  { %v1914_v36 = vsub.f32 %v1821_v23, %v1896_v31  ;;  %v1928_v23 = vmul.f32 1.442695, %v1906_v16 }
 0x462   :  { %v1944_v50 = vmul.f32 1.442695, %v1914_v36 }
 0x464   :  { %6497 = vpow2.f32 %v1944_v50 }
 0x465   :  { %6499 = vpow2.f32 %v1928_v23 }
 0x467   :  { %v1899_v20 = vpop.xlane.xlu2 %1898 }
 0x468   :  { %v1915_v31 = vsub.f32 %v7549_v4, %v1899_v20 }
 0x46a   :  { %v7607_v9 = vpop.eup %6497  ;;  %3271 = vrot.lane.b32.xlu0 %v6870_v47, %s6688_s11  ;;  %v1946_v50 = vmul.f32 1.442695, %v1915_v31 }
 0x46b   :  { %v1990_v26 = vsel %vm173_vm1, %v7607_v9, 0.0  ;;  %v7620_v36 = vpop.eup %6499 }
 0x46c   :  { %3243 = vrot.lane.b32.xlu2 %v6880_v52, %s6688_s11  ;;  %1991 = vadd.xlane.f32.xlu1 %v1990_v26  ;;  %v1966_v16 = vsel %vm173_vm1, %v7620_v36, 0.0 }
 0x485   :  { %3299 = vrot.lane.b32.xlu1 %v6878_v51, %s6688_s11 }
 0x489   :  { %v1959_v39 = vpop.xlane.xlu1 %1958 }
 0x48a   :  { %6501 = vrcp.f32 %v1959_v39  ;;  %v2049_v34 = vand.u32 2147483648, %v1959_v39  ;;  %v2047_v23 = vand.u32 2147483647, %v1959_v39  ;;  %vm2043_vm11 = vweird.f32 %v1959_v39 }
 0x48b   :  { %6503 = vpow2.f32 %v1938_v8 }
 0x48c   :  { %6505 = vpow2.f32 %v1946_v50  ;;  %v2050_v8 = vor.u32 1.1754944e-38, %v2049_v34  ;;  %vm2048_vm13 = vcmp.eq.f32.partialorder %v2047_v23, 8.507059e+37  ;;  %v7637_v34 = vpop.f32.mrf.mxu1 }
 0x48d   :  { %9130 = vst [vmem:[#allocation40_spill] sm:$0xff] %v7637_v34 }
 0x490   :  { %v6502_v26 = vpop.eup %6501 }
 0x491   :  { %v7622_v47 = vpop.eup %6503  ;;  %v2039_v21 = vmul.f32 %v6502_v26, %v1959_v39  ;;  %vm2044_vm10 = vweird.f32 %v6502_v26  ;;  %v1855_v39 = vsel %vm173_vm1, %v7507_v37, -inf }
 0x492   :  { %v1981_v2 = vsel %vm173_vm1, %v7622_v47, 0.0  ;;  %vm2045_vm12 = vmor %vm2043_vm11, %vm2044_vm10  ;;  %v7628_v20 = vpop.eup %6505 }
 0x493   :  { %v2040_v14 = vsub.f32 1.0, %v2039_v21 }
 0x494   :  { %1982 = vadd.xlane.f32.xlu0 %v1981_v2 }
 0x495   :  { %v2041_v58 = vmul.f32 %v6502_v26, %v2040_v14  ;;  %1967 = vadd.xlane.f32.xlu2 %v1966_v16  ;;  %v1993_v14 = vsel %vm173_vm1, %v7628_v20, 0.0 }
 0x497   :  { %v2042_v4 = vadd.f32 %v6502_v26, %v2041_v58 }
 0x499   :  { %v2046_v31 = vsel %vm2045_vm12, %v6502_v26, %v2042_v4  ;;  %v1891_v26 = vsel %vm173_vm1, %v7637_v34, -inf }
 0x49a   :  { %v2051_v50 = vsel %vm2048_vm13, %v2050_v8, %v2046_v31 }
 0x49b   :  { %v2223_v21 = vmul.f32 %v7573_v12, %v2051_v50  ;;  %v1879_v12 = vsel %vm173_vm1, %v7530_v63, -inf }
 0x49c   :  { %1994 = vadd.xlane.f32.xlu0 %v1993_v14 }
 0x49d   :  { %6037 = vmatmul.msk.f32.vlgmr.msrb.gmra.mxu0 %vm173_vm1, %v2223_v21  ;;  %1856 = vmax.xlane.f32.xlu2 %v1855_v39 }
 0x49e   :  { %2543 = vmatpush.msrb.mxu0 %v6324_v44 }
 0x4a5   :  { %1892 = vmax.xlane.f32.xlu2 %v1891_v26 }
 0x4af   :  { %1880 = vmax.xlane.f32.xlu1 %v1879_v12 }
 0x4b0   :  { %3301 = vrot.lane.b32.xlu0 %v6878_v51, %s6687_s10 }
 0x4bf   :  { %v1956_v2 = vpop.xlane.xlu2 %1955 }
 0x4c0   :  { %6507 = vrcp.f32 %v1956_v2  ;;  %v2035_v4 = vand.u32 2147483648, %v1956_v2  ;;  %v2033_v31 = vand.u32 2147483647, %v1956_v2  ;;  %vm2029_vm15 = vweird.f32 %v1956_v2 }
 0x4c2   :  { %v2036_v14 = vor.u32 1.1754944e-38, %v2035_v4  ;;  %vm2034_vm3 = vcmp.eq.f32.partialorder %v2033_v31, 8.507059e+37 }
 0x4c6   :  { %v6508_v16 = vpop.eup %6507 }
 0x4c7   :  { %v2025_v58 = vmul.f32 %v6508_v16, %v1956_v2  ;;  %v1971_v23 = vpop.xlane.xlu2 %1970  ;;  %vm2030_vm14 = vweird.f32 %v6508_v16 }
 0x4c8   :  { %6509 = vrcp.f32 %v1971_v23  ;;  %vm2031_vm2 = vmor %vm2029_vm15, %vm2030_vm14  ;;  %v2105_v59 = vand.u32 2147483648, %v1971_v23  ;;  %vm2099_vm5 = vweird.f32 %v1971_v23 }
 0x4c9   :  { %v2026_v44 = vsub.f32 1.0, %v2025_v58 }
 0x4ca   :  { %v2106_v4 = vor.u32 1.1754944e-38, %v2105_v59  ;;  %v7659_v59 = vpop.permute.xlu1 %3245 }
 0x4cb   :  { %v2027_v8 = vmul.f32 %v6508_v16, %v2026_v44  ;;  %v2103_v44 = vand.u32 2147483647, %v1971_v23 }
 0x4cd   :  { %v2028_v50 = vadd.f32 %v6508_v16, %v2027_v8  ;;  %vm2104_vm7 = vcmp.eq.f32.partialorder %v2103_v44, 8.507059e+37 }
 0x4ce   :  { %v6510_v21 = vpop.eup %6509 }
 0x4cf   :  { %v2032_v39 = vsel %vm2031_vm2, %v6508_v16, %v2028_v50  ;;  %v2095_v26 = vmul.f32 %v6510_v21, %v1971_v23  ;;  %vm2100_vm4 = vweird.f32 %v6510_v21 }
 0x4d0   :  { %v2037_v12 = vsel %vm2034_vm3, %v2036_v14, %v2032_v39  ;;  %vm2101_vm6 = vmor %vm2099_vm5, %vm2100_vm4 }
 0x4d1   :  { %v2096_v51 = vsub.f32 1.0, %v2095_v26  ;;  %v2222_v42 = vmul.f32 %v7595_v48, %v2037_v12  ;;  %v6325_v48 = vunpack.i.h.bf16 %v7497_v3 }
 0x4d3   :  { %v2097_v58 = vmul.f32 %v6510_v21, %v2096_v51  ;;  %6036 = vmatmul.msk.f32.vlgmr.msra.gmra.mxu3 %vm173_vm1, %v2222_v42  ;;  %v7653_v42 = vpop.xlane.xlu0 %1979  ;;  %v7655_v51 = vpop.permute.xlu2 %3243 }
 0x4d4   :  { %2517 = vmatpush.msra.mxu3 %v6315_v7  ;;  %9131 = vst [vmem:[#allocation41_spill] sm:$0xff] %v7655_v51  ;;  %6511 = vrcp.f32 %v7653_v42  ;;  %vm2141_vm3 = vweird.f32 %v7653_v42 }
 0x4d5   :  { %v2098_v2 = vadd.f32 %v6510_v21, %v2097_v58 }
 0x4d7   :  { %v2102_v16 = vsel %vm2101_vm6, %v6510_v21, %v2098_v2 }
 0x4d8   :  { %v2107_v8 = vsel %vm2104_vm7, %v2106_v4, %v2102_v16 }
 0x4d9   :  { %v2227_v31 = vmul.f32 %v7599_v5, %v2107_v8 }
 0x4da   :  { %1868 = vmax.xlane.f32.xlu0 %v1867_v15  ;;  %v7662_v5 = vpop.eup %6511 }
 0x4db   :  { %6041 = vmatmul.msk.f32.vlgmr.msra.gmra.mxu0 %vm173_vm1, %v2227_v31  ;;  %v2137_v21 = vmul.f32 %v7662_v5, %v7653_v42  ;;  %vm2142_vm10 = vweird.f32 %v7662_v5 }
 0x4dc   :  { %2647 = vmatpush.msra.mxu0 %v6325_v48  ;;  %v7657_v7 = vpop.permute.xlu0 %3271  ;;  %vm7694_vm4 = vmor %vm2141_vm3, %vm2142_vm10 }
 0x4dd   :  { %9132 = vst [vmem:[#allocation42_spill] sm:$0xff] %v7657_v7  ;;  %v2138_v39 = vsub.f32 1.0, %v2137_v21 }
 0x4df   :  { %v7664_v50 = vpop.xlane.xlu1 %1991  ;;  %v2139_v31 = vmul.f32 %v7662_v5, %v2138_v39 }
 0x4e1   :  { %v2140_v39 = vadd.f32 %v7662_v5, %v2139_v31 }
 0x507   :  { %v1983_v3 = vpop.xlane.xlu0 %1982 }
 0x508   :  { %v1968_v23 = vpop.xlane.xlu2 %1967  ;;  %6513 = vrcp.f32 %v1983_v3  ;;  %v2159_v48 = vand.u32 2147483647, %v1983_v3  ;;  %v2161_v15 = vand.u32 2147483648, %v1983_v3  ;;  %vm2155_vm11 = vweird.f32 %v1983_v3 }
 0x509   :  { %6515 = vrcp.f32 %v1968_v23  ;;  %v2091_v21 = vand.u32 2147483648, %v1968_v23  ;;  %v2089_v55 = vand.u32 2147483647, %v1968_v23  ;;  %vm2085_vm13 = vweird.f32 %v1968_v23 }
 0x50a   :  { %6517 = vrcp.f32 %v7664_v50  ;;  %vm2160_vm14 = vcmp.eq.f32.partialorder %v2159_v48, 8.507059e+37 }
 0x50b   :  { %vm2090_vm2 = vcmp.eq.f32.partialorder %v2089_v55, 8.507059e+37  ;;  %v6320_v55 = vunpack.i.h.bf16 %v7407_v11 }
 0x50e   :  { %v6514_v14 = vpop.eup %6513 }
 0x50f   :  { %v6516_v26 = vpop.eup %6515  ;;  %v2151_v12 = vmul.f32 %v6514_v14, %v1983_v3  ;;  %v7669_v58 = vpop.xlane.xlu0 %1994  ;;  %vm2156_vm8 = vweird.f32 %v6514_v14 }
 0x510   :  { %v2081_v44 = vmul.f32 %v6516_v26, %v1968_v23  ;;  %6519 = vrcp.f32 %v7669_v58  ;;  %v1857_v2 = vpop.xlane.xlu2 %1856  ;;  %v7672_v4 = vpop.eup %6517  ;;  %vm2086_vm9 = vweird.f32 %v6516_v26  ;;  %vm2157_vm12 = vmor %vm2155_vm11, %vm2156_vm8  ;;  %v2217_v23 = vand.u32 2147483648, %v7669_v58 }
 0x511   :  { %v2152_v16 = vsub.f32 1.0, %v2151_v12  ;;  %v1901_v8 = vsub.f32 %v7507_v37, %v1857_v2  ;;  %v2193_v6 = vmul.f32 %v7672_v4, %v7664_v50  ;;  %vm2087_vm15 = vmor %vm2085_vm13, %vm2086_vm9  ;;  %vm2211_vm6 = vweird.f32 %v7669_v58 }
 0x512   :  { %v2082_v7 = vsub.f32 1.0, %v2081_v44  ;;  %v2162_v44 = vor.u32 1.1754944e-38, %v2161_v15  ;;  %vm2198_vm10 = vweird.f32 %v7672_v4  ;;  %vm2197_vm11 = vweird.f32 %v7664_v50 }
 0x513   :  { %v2153_v51 = vmul.f32 %v6514_v14, %v2152_v16  ;;  %v1918_v30 = vmul.f32 1.442695, %v1901_v8  ;;  %v2092_v8 = vor.u32 1.1754944e-38, %v2091_v21  ;;  %v2194_v34 = vsub.f32 1.0, %v2193_v6 }
 0x514   :  { %v2083_v29 = vmul.f32 %v6516_v26, %v2082_v7  ;;  %v2218_v21 = vor.u32 1.1754944e-38, %v2217_v23 }
 0x515   :  { %v2154_v12 = vadd.f32 %v6514_v14, %v2153_v51  ;;  %6521 = vpow2.f32 %v1918_v30  ;;  %v2147_v51 = vand.u32 2147483648, %v7653_v42  ;;  %v7682_v30 = vpop.permute.xlu1 %3299 }
 0x516   :  { %v6520_v37 = vpop.eup %6519  ;;  %v2084_v2 = vadd.f32 %v6516_v26, %v2083_v29  ;;  %v2145_v29 = vand.u32 2147483647, %v7653_v42 }
 0x517   :  { %v2158_v16 = vsel %vm2157_vm12, %v6514_v14, %v2154_v12  ;;  %v2207_v7 = vmul.f32 %v6520_v37, %v7669_v58  ;;  %vm2212_vm5 = vweird.f32 %v6520_v37  ;;  %v2148_v42 = vor.u32 1.1754944e-38, %v2147_v51  ;;  %vm2199_vm12 = vmor %vm2197_vm11, %vm2198_vm10  ;;  %v9145_v51 = vld [vmem:[#allocation41_spill] sm:$0xff] }
 0x518   :  { %v2163_v60 = vsel %vm2160_vm14, %v2162_v44, %v2158_v16  ;;  %v2088_v43 = vsel %vm2087_vm15, %v6516_v26, %v2084_v2  ;;  %vm2146_vm7 = vcmp.eq.f32.partialorder %v2145_v29, 8.507059e+37  ;;  %vm2213_vm8 = vmor %vm2211_vm6, %vm2212_vm5  ;;  %v9149_v29 = vld [vmem:[#allocation7_spill] sm:$0xff]  ;;  %v9151_v26 = vld [vmem:[#allocation34_spill] sm:$0xff] }
 0x519   :  { %v2208_v3 = vsub.f32 1.0, %v2207_v7  ;;  %v2231_v31 = vmul.f32 %v7622_v47, %v2163_v60  ;;  %v2093_v15 = vsel %vm2090_vm2, %v2092_v8, %v2088_v43  ;;  %v2215_v60 = vand.u32 2147483647, %v7669_v58 }
 0x51a   :  { %v2226_v14 = vmul.f32 %v7620_v36, %v2093_v15  ;;  %v2144_v43 = vsel %vm7694_vm4, %v7662_v5, %v2140_v39  ;;  %v2195_v36 = vmul.f32 %v7672_v4, %v2194_v34  ;;  %v2203_v39 = vand.u32 2147483648, %v7664_v50  ;;  %v9148_v15 = vld [vmem:[#allocation6_spill] sm:$0xff] }
 0x51b   :  { %v7689_v6 = vpop.eup %6521  ;;  %v2209_v47 = vmul.f32 %v6520_v37, %v2208_v3  ;;  %6045 = vmatmul.msk.f32.vlgmr.msrb.gmra.mxu0 %vm173_vm1, %v2231_v31  ;;  %v2149_v5 = vsel %vm2146_vm7, %v2148_v42, %v2144_v43  ;;  %vm2216_vm9 = vcmp.eq.f32.partialorder %v2215_v60, 8.507059e+37  ;;  %v2201_v58 = vand.u32 2147483647, %v7664_v50  ;;  %v9146_v3 = vld [vmem:[#allocation37_spill] sm:$0xff]  ;;  %v9147_v31 = vld [vmem:[#allocation39_spill] sm:$0xff]  ;;  %v9153_v60 = vld [vmem:[#allocation8_spill] sm:$0xff] }
 0x51c   :  { %6084 = vmatpush.xpose.msk.msrb.mxu0 %vm173_vm1, %v7553_v33  ;;  %6040 = vmatmul.msk.f32.vlgmr.msrb.gmra.mxu3 %vm173_vm1, %v2226_v14  ;;  %v1951_v11 = vsel %vm173_vm1, %v7689_v6, 0.0  ;;  %v2196_v34 = vadd.f32 %v7672_v4, %v2195_v36  ;;  %v2230_v8 = vmul.f32 %v7603_v1, %v2149_v5  ;;  %v7814_v23 = vpack.i.bf16 %v9149_v29, %v9148_v15  ;;  %v9154_v43 = vld [vmem:[#allocation10_spill] sm:$0xff]  ;;  %v9159_v5 = vld [vmem:[#allocation5_spill] sm:$0xff] }
 0x51d   :  { %v2210_v48 = vadd.f32 %v6520_v37, %v2209_v47  ;;  %2621 = vmatpush.msrb.mxu3 %v6320_v55  ;;  %1952 = vadd.xlane.f32.xlu0 %v1951_v11  ;;  %vm2202_vm13 = vcmp.eq.f32.partialorder %v2201_v58, 8.507059e+37  ;;  %v9152_v47 = vld [vmem:[#allocation42_spill] sm:$0xff]  ;;  %v6371_v36 = vpack.i.bf16 %v9154_v43, %v9153_v60  ;;  %v9155_v11 = vld [vmem:[#allocation13_spill] sm:$0xff] }
 0x51e   :  { %v1852_v42 = vsel %vm173_vm1, %v9155_v11, -inf }
 0x51f   :  { %v2214_v12 = vsel %vm2213_vm8, %v6520_v37, %v2210_v48  ;;  %v2200_v37 = vsel %vm2199_vm12, %v7672_v4, %v2196_v34  ;;  %v7853_v34 = vpop.f32.mrf.mxu0 }
 0x520   :  { %v2219_v33 = vsel %vm2216_vm9, %v2218_v21, %v2214_v12  ;;  %v9158_v21 = vld [vmem:[#allocation4_spill] sm:$0xff] }
 0x521   :  { %v2235_v2 = vmul.f32 %v7628_v20, %v2219_v33  ;;  %v2204_v20 = vor.u32 1.1754944e-38, %v2203_v39  ;;  %v7847_v12 = vpack.i.bf16 %v9159_v5, %v9158_v21  ;;  %v9162_v33 = vld [vmem:[#allocation9_spill] sm:$0xff] }
 0x522   :  { %v1881_v44 = vpop.xlane.xlu1 %1880  ;;  %v6366_v39 = vpack.i.bf16 %v6880_v52, %v9162_v33 }
 0x523   :  { %v1909_v16 = vsub.f32 %v7530_v63, %v1881_v44  ;;  %6049 = vmatmul.msk.f32.vlgmr.msra.gmra.mxu0 %vm173_vm1, %v2235_v2  ;;  %v2205_v63 = vsel %vm2202_vm13, %v2204_v20, %v2200_v37 }
 0x524   :  { %6088 = vmatpush.xpose.msk.msra.mxu0 %vm173_vm1, %v7513_v35  ;;  %6044 = vmatmul.msk.f32.vlgmr.msra.gmra.mxu3 %vm173_vm1, %v2230_v8  ;;  %v2234_v1 = vmul.f32 %v7607_v9, %v2205_v63 }
 0x525   :  { %v1934_v7 = vmul.f32 1.442695, %v1909_v16  ;;  %6082 = vmatpush.xpose.msk.msra.mxu3 %vm173_vm1, %v7532_v25  ;;  %v6326_v25 = vpack.i.bf16 %v6842_v32, %v6826_v24 }
 0x527   :  { %6523 = vpow2.f32 %v1934_v7 }
 0x52b   :  { %6085 = vmatmul.msk.f32.vlgmr.msrb.gmra.mxu0 %vm173_vm1, %v7559_v49  ;;  %v7750_v49 = vpack.i.bf16 %v6858_v40, %v6854_v38 }
 0x52c   :  { %6092 = vmatpush.xpose.msk.msrb.mxu0 %vm173_vm1, %v7569_v61  ;;  %6048 = vmatmul.msk.f32.vlgmr.msrb.gmra.mxu3 %vm173_vm1, %v2234_v1  ;;  %v3302_v61 = vpop.permute.xlu0 %3301 }
 0x52d   :  { %v7728_v50 = vpop.eup %6523  ;;  %6086 = vmatpush.xpose.msk.msrb.mxu3 %vm173_vm1, %v7544_v46  ;;  %9135 = vst [vmem:[#allocation43_spill] sm:$0xff] %v7750_v49 }
 0x52e   :  { %v1975_v35 = vsel %vm173_vm1, %v7728_v50, 0.0 }
 0x52f   :  { %1976 = vadd.xlane.f32.xlu1 %v1975_v35 }
 0x531   :  { %6327 = vrot.lane.b32.xlu0 %v6326_v25, %s6686_s30 }
 0x533   :  { %6089 = vmatmul.msk.f32.vlgmr.msra.gmra.mxu0 %vm173_vm1, %v7567_v45  ;;  %v9138_v45 = vld [vmem:[#allocation11_spill] sm:$0xff] }
 0x534   :  { %6096 = vmatpush.xpose.msk.msra.mxu0 %vm173_vm1, %v7579_v53  ;;  %6083 = vmatmul.msk.f32.vlgmr.msra.gmra.mxu3 %vm173_vm1, %v7542_v19  ;;  %v6331_v53 = vpack.i.bf16 %v6880_v52, %v6858_v40  ;;  %v9139_v19 = vld [vmem:[#allocation40_spill] sm:$0xff] }
 0x535   :  { %6090 = vmatpush.xpose.msk.msra.mxu3 %vm173_vm1, %v7505_v41  ;;  %v9137_v41 = vld [vmem:[#allocation30_spill] sm:$0xff]  ;;  %9160 = vst [vmem:[#allocation40_spill] sm:$0xff] %v7847_v12 }
 0x536   :  { %9150 = vst [vmem:[#allocation30_spill] sm:$0xff] %v7814_v23 }
 0x539   :  { %6357 = vrot.lane.b32.xlu0 %v7750_v49, %s6689_s12 }
 0x53b   :  { %6093 = vmatmul.msk.f32.vlgmr.msrb.gmra.mxu0 %vm173_vm1, %v7526_v62 }
 0x53c   :  { %6100 = vmatpush.xpose.msk.msrb.mxu0 %vm173_vm1, %v7547_v10  ;;  %6087 = vmatmul.msk.f32.vlgmr.msrb.gmra.mxu3 %vm173_vm1, %v7551_v56  ;;  %v9140_v56 = vld [vmem:[#allocation35_spill] sm:$0xff] }
 0x53d   :  { %6094 = vmatpush.xpose.msk.msrb.mxu3 %vm173_vm1, %v7565_v18  ;;  %9161 = vst [vmem:[#allocation35_spill] sm:$0xff] %v7853_v34 }
 0x541   :  { %4257 = vrot.lane.b32.xlu0 %v6822_v22, %s6690_s13 }
 0x543   :  { %6097 = vmatmul.msk.f32.vlgmr.msra.gmra.mxu0 %vm173_vm1, %v7581_v17  ;;  %v9136_v17 = vld [vmem:[#allocation32_spill] sm:$0xff] }
 0x544   :  { %6104 = vmatpush.xpose.msk.msra.mxu0 %vm173_vm1, %v7591_v27  ;;  %6091 = vmatmul.msk.f32.vlgmr.msra.gmra.mxu3 %vm173_vm1, %v7561_v54  ;;  %v1893_v54 = vpop.xlane.xlu2 %1892  ;;  %v9143_v27 = vld [vmem:[#allocation3_spill] sm:$0xff] }
 0x545   :  { %6098 = vmatpush.xpose.msk.msra.mxu3 %vm173_vm1, %v7571_v13  ;;  %v1913_v46 = vsub.f32 %v9139_v19, %v1893_v54  ;;  %v7798_v9 = vpack.i.bf16 %v6842_v32, %v9143_v27 }
 0x547   :  { %v1942_v18 = vmul.f32 1.442695, %v1913_v46  ;;  %9144 = vst [vmem:[#allocation32_spill] sm:$0xff] %v7798_v9 }
 0x548   :  { %6332 = vrot.lane.b32.xlu1 %v6331_v53, %s6686_s30 }
 0x549   :  { %4343 = vrot.lane.b32.xlu0 %v6834_v28, %s6691_s14 }
 0x54b   :  { %6101 = vmatmul.msk.f32.vlgmr.msrb.gmra.mxu0 %vm173_vm1, %v7587_v57  ;;  %v9142_v57 = vld [vmem:[#allocation38_spill] sm:$0xff] }
 0x54c   :  { %6108 = vmatpush.xpose.msk.msrb.mxu0 %vm173_vm1, %v7659_v59  ;;  %6095 = vmatmul.msk.f32.vlgmr.msrb.gmra.mxu3 %vm173_vm1, %v7517_v0  ;;  %v9141_v0 = vld [vmem:[#allocation36_spill] sm:$0xff] }
 0x54d   :  { %6102 = vmatpush.xpose.msk.msrb.mxu3 %vm173_vm1, %v9136_v17  ;;  %v1869_v13 = vpop.xlane.xlu0 %1868 }
 0x54e   :  { %v1905_v62 = vsub.f32 %v9137_v41, %v1869_v13 }
 0x550   :  { %6337 = vrot.lane.b32.xlu1 %v9138_v45, %s6689_s12  ;;  %v1926_v10 = vmul.f32 1.442695, %v1905_v62 }
 0x552   :  { %6525 = vpow2.f32 %v1926_v10 }
 0x553   :  { %6105 = vmatmul.msk.f32.vlgmr.msra.gmra.mxu0 %vm173_vm1, %v9140_v56  ;;  %6527 = vpow2.f32 %v1942_v18 }
 0x554   :  { %6112 = vmatpush.xpose.msk.msra.mxu0 %vm173_vm1, %v3302_v61  ;;  %6099 = vmatmul.msk.f32.vlgmr.msra.gmra.mxu3 %vm173_vm1, %v9141_v0 }
 0x555   :  { %6106 = vmatpush.xpose.msk.msra.mxu3 %vm173_vm1, %v9142_v57 }
 0x556   :  { %v7864_v16 = vpop.f32.mrf.mxu3 }
 0x557   :  { %9164 = vst [vmem:[#allocation38_spill] sm:$0xff] %v7864_v16 }
 0x558   :  { %6347 = vrot.lane.b32.xlu1 %v7798_v9, %s6689_s12  ;;  %v7802_v59 = vpop.eup %6525  ;;  %v7860_v44 = vpop.f32.mrf.mxu0 }
 0x559   :  { %v1963_v4 = vsel %vm173_vm1, %v7802_v59, 0.0  ;;  %v7816_v14 = vpop.eup %6527  ;;  %9163 = vst [vmem:[#allocation36_spill] sm:$0xff] %v7860_v44  ;;  %v9184_v44 = vld [vmem:[#allocation28_spill] sm:$0xff] }
 0x55a   :  { %1964 = vadd.xlane.f32.xlu2 %v1963_v4  ;;  %v1987_v55 = vsel %vm173_vm1, %v7816_v14, 0.0 }
 0x55b   :  { %6109 = vmatmul.msk.f32.vlgmr.msrb.gmra.mxu0 %vm173_vm1, %v9145_v51 }
 0x55c   :  { %6103 = vmatmul.msk.f32.vlgmr.msrb.gmra.mxu3 %vm173_vm1, %v9146_v3 }
 0x55d   :  { %6110 = vmatpush.xpose.msk.msrb.mxu3 %vm173_vm1, %v9147_v31 }
 0x560   :  { %6362 = vrot.lane.b32.xlu1 %v7814_v23, %s6689_s12  ;;  %v9180_v23 = vld [vmem:[#allocation24_spill] sm:$0xff] }
 0x562   :  { %1988 = vadd.xlane.f32.xlu2 %v1987_v55 }
 0x563   :  { %6113 = vmatmul.msk.f32.vlgmr.msra.gmra.mxu0 %vm173_vm1, %v7682_v30  ;;  %v9156_v30 = vld [vmem:[#allocation2_spill] sm:$0xff] }
 0x564   :  { %6107 = vmatmul.msk.f32.vlgmr.msra.gmra.mxu3 %vm173_vm1, %v9151_v26  ;;  %v7839_v48 = vpack.i.bf16 %v6834_v28, %v9156_v30 }
 0x566   :  { %9157 = vst [vmem:[#allocation11_spill] sm:$0xff] %v7839_v48 }
 0x568   :  { %4259 = vrot.lane.b32.xlu1 %v6822_v22, %s6691_s14 }
 0x56c   :  { %6111 = vmatmul.msk.f32.vlgmr.msrb.gmra.mxu3 %vm173_vm1, %v9152_v47 }
 0x570   :  { %6372 = vrot.lane.b32.xlu1 %v6371_v36, %s6689_s12 }
 0x573   :  { %1853 = vmax.xlane.f32.xlu0 %v1852_v42 }
 0x578   :  { %4285 = vrot.lane.b32.xlu1 %v6826_v24, %s6690_s13 }
 0x57a   :  { %6342 = vrot.lane.b32.xlu2 %v7839_v48, %s6689_s12 }
 0x580   :  { %4313 = vrot.lane.b32.xlu1 %v9156_v30, %s6690_s13 }
 0x582   :  { %6352 = vrot.lane.b32.xlu2 %v7847_v12, %s6689_s12 }
 0x588   :  { %4371 = vrot.lane.b32.xlu1 %v9143_v27, %s6691_s14 }
 0x58a   :  { %6367 = vrot.lane.b32.xlu2 %v6366_v39, %s6689_s12 }
 0x590   :  { %4399 = vrot.lane.b32.xlu1 %v6842_v32, %s6691_s14  ;;  %v1953_v2 = vpop.xlane.xlu0 %1952 }
 0x591   :  { %6529 = vrcp.f32 %v1953_v2  ;;  %v2021_v63 = vand.u32 2147483648, %v1953_v2  ;;  %v2019_v1 = vand.u32 2147483647, %v1953_v2  ;;  %vm2015_vm15 = vweird.f32 %v1953_v2 }
 0x592   :  { %4287 = vrot.lane.b32.xlu2 %v6826_v24, %s6691_s14 }
 0x593   :  { %v2022_v61 = vor.u32 1.1754944e-38, %v2021_v63  ;;  %vm2020_vm3 = vcmp.eq.f32.partialorder %v2019_v1, 8.507059e+37 }
 0x597   :  { %v6530_v58 = vpop.eup %6529 }
 0x598   :  { %4397 = vrot.lane.b32.xlu1 %v6842_v32, %s6690_s13  ;;  %v2011_v8 = vmul.f32 %v6530_v58, %v1953_v2  ;;  %v7868_v37 = vpop.f32.mrf.mxu0  ;;  %vm2016_vm14 = vweird.f32 %v6530_v58 }
 0x599   :  { %9165 = vst [vmem:[#allocation3_spill] sm:$0xff] %v7868_v37  ;;  %vm2017_vm2 = vmor %vm2015_vm15, %vm2016_vm14 }
 0x59a   :  { %v2012_v7 = vsub.f32 1.0, %v2011_v8  ;;  %4315 = vrot.lane.b32.xlu2 %v9156_v30, %s6691_s14 }
 0x59c   :  { %v2013_v20 = vmul.f32 %v6530_v58, %v2012_v7 }
 0x59e   :  { %v2014_v35 = vadd.f32 %v6530_v58, %v2013_v20 }
 0x59f   :  { %v7872_v24 = vpop.f32.mrf.mxu3 }
 0x5a0   :  { %9166 = vst [vmem:[#allocation41_spill] sm:$0xff] %v7872_v24  ;;  %v2018_v25 = vsel %vm2017_vm2, %v6530_v58, %v2014_v35  ;;  %v7874_v53 = vpop.f32.mrf.mxu0 }
 0x5a1   :  { %9167 = vst [vmem:[#allocation37_spill] sm:$0xff] %v7874_v53  ;;  %v2023_v32 = vsel %vm2020_vm3, %v2022_v61, %v2018_v25 }
 0x5a2   :  { %4341 = vrot.lane.b32.xlu2 %v6834_v28, %s6690_s13  ;;  %v2221_v41 = vmul.f32 %v7689_v6, %v2023_v32  ;;  %v7890_v28 = vpop.xlane.xlu1 %1976 }
 0x5a3   :  { %v6328_v54 = vpop.permute.xlu0 %6327  ;;  %6531 = vrcp.f32 %v7890_v28  ;;  %vm2127_vm9 = vweird.f32 %v7890_v28 }
 0x5a4   :  { %v6330_v17 = vunpack.i.h.bf16 %v6328_v54  ;;  %v6329_v13 = vunpack.i.l.bf16 %v6328_v54 }
 0x5a6   :  { %2283 = vmatpush.msrb.mxu2 %v6329_v13 }
 0x5a7   :  { %6035 = vmatmul.msk.f32.vlgmr.msrb.gmra.mxu2 %vm173_vm1, %v2221_v41  ;;  %v7880_v62 = vpop.f32.mrf.mxu3 }
 0x5a8   :  { %9168 = vst [vmem:[#allocation39_spill] sm:$0xff] %v7880_v62  ;;  %2387 = vmatpush.msra.mxu2 %v6330_v17  ;;  %v7882_v19 = vpop.f32.mrf.mxu0 }
 0x5a9   :  { %v6532_v30 = vpop.eup %6531 }
 0x5aa   :  { %4369 = vrot.lane.b32.xlu2 %v9143_v27, %s6690_s13  ;;  %v2123_v2 = vmul.f32 %v6532_v30, %v7890_v28  ;;  %vm2128_vm6 = vweird.f32 %v6532_v30 }
 0x5ab   :  { %vm2129_vm10 = vmor %vm2127_vm9, %vm2128_vm6 }
 0x5ac   :  { %v2124_v20 = vsub.f32 1.0, %v2123_v2 }
 0x5ae   :  { %v2125_v61 = vmul.f32 %v6532_v30, %v2124_v20 }
 0x5af   :  { %v7886_v46 = vpop.f32.mrf.mxu3 }
 0x5b0   :  { %9169 = vst [vmem:[#allocation6_spill] sm:$0xff] %v7886_v46  ;;  %v7888_v10 = vpop.f32.mrf.mxu0 }
 0x5b2   :  { %4427 = vrot.lane.b32.xlu2 %v9158_v21, %s6691_s14 }
 0x5b7   :  { %v7894_v6 = vpop.f32.mrf.mxu3 }
 0x5b8   :  { %v7896_v56 = vpop.f32.mrf.mxu0 }
 0x5ba   :  { %v7898_v18 = vpop.permute.xlu1 %6332  ;;  %4425 = vrot.lane.b32.xlu2 %v9158_v21, %s6690_s13 }
 0x5bb   :  { %v6334_v0 = vunpack.i.l.bf16 %v7898_v18 }
 0x5bd   :  { %2491 = vmatpush.msrb.mxu2 %v6334_v0 }
 0x5bf   :  { %v7903_v57 = vpop.f32.mrf.mxu3 }
 0x5c0   :  { %v7905_v4 = vpop.f32.mrf.mxu0  ;;  %v3333_v51 = vsel %vm173_vm1, %v7903_v57, -inf }
 0x5c1   :  { %3334 = vmax.xlane.f32.xlu0 %v3333_v51 }
 0x5c2   :  { %v6338_v3 = vpop.permute.xlu1 %6337 }
 0x5c3   :  { %v6340_v31 = vunpack.i.h.bf16 %v6338_v3  ;;  %v6339_v55 = vunpack.i.l.bf16 %v6338_v3 }
 0x5c5   :  { %3732 = vmatpush.msra.mxu3 %v6339_v55  ;;  %3758 = vmatpush.msrb.mxu0 %v6340_v31  ;;  %v2126_v31 = vadd.f32 %v6532_v30, %v2125_v61 }
 0x5c7   :  { %v7910_v26 = vpop.f32.mrf.mxu3 }
 0x5c8   :  { %v7912_v47 = vpop.f32.mrf.mxu0  ;;  %v3339_v36 = vsel %vm173_vm1, %v7910_v26, -inf }
 0x5c9   :  { %3340 = vmax.xlane.f32.xlu1 %v3339_v36  ;;  %v3354_v42 = vsel %vm173_vm1, %v7912_v47, -inf }
 0x5ca   :  { %3355 = vmax.xlane.f32.xlu0 %v3354_v42  ;;  %v7934_v55 = vpop.permute.xlu1 %6347 }
 0x5cd   :  { %v1965_v21 = vpop.xlane.xlu2 %1964 }
 0x5ce   :  { %6533 = vrcp.f32 %v1965_v21  ;;  %v2077_v32 = vand.u32 2147483648, %v1965_v21  ;;  %v2075_v13 = vand.u32 2147483647, %v1965_v21  ;;  %vm2071_vm5 = vweird.f32 %v1965_v21 }
 0x5cf   :  { %v7918_v39 = vpop.f32.mrf.mxu3 }
 0x5d0   :  { %v7921_v58 = vpop.f32.mrf.mxu0  ;;  %v2078_v3 = vor.u32 1.1754944e-38, %v2077_v32  ;;  %vm2076_vm8 = vcmp.eq.f32.partialorder %v2075_v13, 8.507059e+37  ;;  %v2130_v32 = vsel %vm2129_vm10, %v6532_v30, %v2126_v31 }
 0x5d1   :  { %v3360_v8 = vsel %vm173_vm1, %v7921_v58, -inf }
 0x5d2   :  { %3361 = vmax.xlane.f32.xlu0 %v3360_v8  ;;  %v2133_v8 = vand.u32 2147483648, %v7890_v28 }
 0x5d4   :  { %v6534_v7 = vpop.eup %6533 }
 0x5d5   :  { %v2067_v63 = vmul.f32 %v6534_v7, %v1965_v21  ;;  %v7925_v1 = vpop.xlane.xlu2 %1988  ;;  %vm2072_vm4 = vweird.f32 %v6534_v7  ;;  %v2131_v21 = vand.u32 2147483647, %v7890_v28  ;;  %v3327_v28 = vsel %vm173_vm1, %v7894_v6, -inf }
 0x5d6   :  { %6535 = vrcp.f32 %v7925_v1  ;;  %vm2073_vm7 = vmor %vm2071_vm5, %vm2072_vm4  ;;  %vm2183_vm13 = vweird.f32 %v7925_v1  ;;  %v2187_v30 = vand.u32 2147483647, %v7925_v1 }
 0x5d7   :  { %v2068_v35 = vsub.f32 1.0, %v2067_v63  ;;  %v7928_v25 = vpop.f32.mrf.mxu3  ;;  %vm2132_vm11 = vcmp.eq.f32.partialorder %v2131_v21, 8.507059e+37 }
 0x5d8   :  { %v7930_v54 = vpop.f32.mrf.mxu0  ;;  %vm2188_vm15 = vcmp.eq.f32.partialorder %v2187_v30, 8.507059e+37  ;;  %v3345_v30 = vsel %vm173_vm1, %v7918_v39, -inf }
 0x5d9   :  { %v2069_v17 = vmul.f32 %v6534_v7, %v2068_v35  ;;  %v3366_v41 = vsel %vm173_vm1, %v7930_v54, -inf }
 0x5da   :  { %3367 = vmax.xlane.f32.xlu0 %v3366_v41 }
 0x5db   :  { %v2070_v0 = vadd.f32 %v6534_v7, %v2069_v17 }
 0x5dc   :  { %v6536_v51 = vpop.eup %6535 }
 0x5dd   :  { %v2074_v36 = vsel %vm2073_vm7, %v6534_v7, %v2070_v0  ;;  %v2179_v42 = vmul.f32 %v6536_v51, %v7925_v1  ;;  %v6343_v2 = vpop.permute.xlu2 %6342  ;;  %v6335_v7 = vunpack.i.h.bf16 %v7898_v18  ;;  %v2134_v0 = vor.u32 1.1754944e-38, %v2133_v8  ;;  %v1403_v8 = vld [vmem:[%s9034_s3] sm:$0xff] }
 0x5de   :  { %v6345_v20 = vunpack.i.h.bf16 %v6343_v2  ;;  %v6344_v63 = vunpack.i.l.bf16 %v6343_v2  ;;  %v2079_v35 = vsel %vm2076_vm8, %v2078_v3, %v2074_v36  ;;  %v7948_v36 = vpop.permute.xlu0 %6357  ;;  %vm2184_vm12 = vweird.f32 %v6536_v51 }
 0x5df   :  { %v2180_v17 = vsub.f32 1.0, %v2179_v42  ;;  %v7940_v41 = vpop.f32.mrf.mxu3  ;;  %v2225_v61 = vmul.f32 %v7802_v59, %v2079_v35  ;;  %v2135_v3 = vsel %vm2132_vm11, %v2134_v0, %v2130_v32  ;;  %v2189_v18 = vand.u32 2147483648, %v7925_v1  ;;  %v7951_v42 = vpop.permute.xlu1 %6362  ;;  %vm2185_vm14 = vmor %vm2183_vm13, %vm2184_vm12 }
 0x5e0   :  { %3784 = vmatpush.msrb.mxu3 %v6344_v63  ;;  %3810 = vmatpush.msra.mxu0 %v6345_v20  ;;  %v2229_v2 = vmul.f32 %v7728_v50, %v2135_v3  ;;  %v3330_v1 = vsel %vm173_vm1, %v7882_v19, -inf  ;;  %v3336_v32 = vsel %vm173_vm1, %v7888_v10, -inf  ;;  %v3342_v3 = vsel %vm173_vm1, %v7896_v56, -inf }
 0x5e1   :  { %v2181_v13 = vmul.f32 %v6536_v51, %v2180_v17  ;;  %6039 = vmatmul.msk.f32.vlgmr.msra.gmra.mxu2 %vm173_vm1, %v2225_v61  ;;  %v2190_v35 = vor.u32 1.1754944e-38, %v2189_v18 }
 0x5e2   :  { %2595 = vmatpush.msra.mxu2 %v6335_v7 }
 0x5e3   :  { %3328 = vmax.xlane.f32.xlu2 %v3327_v28  ;;  %v2182_v59 = vadd.f32 %v6536_v51, %v2181_v13  ;;  %v7977_v13 = vpop.f32.mrf.mxu0 }
 0x5e4   :  { %v3372_v0 = vsel %vm173_vm1, %v7977_v13, -inf }
 0x5e5   :  { %v2186_v63 = vsel %vm2185_vm14, %v6536_v51, %v2182_v59  ;;  %v9171_v59 = vld [vmem:[#allocation21_spill] sm:$0xff] }
 0x5e6   :  { %v2191_v50 = vsel %vm2188_vm15, %v2190_v35, %v2186_v63  ;;  %v7966_v21 = vpop.permute.xlu0 %4257  ;;  %v9173_v35 = vld [vmem:[#allocation20_spill] sm:$0xff] }
 0x5e7   :  { %v7955_v31 = vpop.f32.mrf.mxu3  ;;  %v2233_v61 = vmul.f32 %v7816_v14, %v2191_v50  ;;  %v4260_v7 = vpop.permute.xlu1 %4259  ;;  %v9170_v14 = vld [vmem:[#allocation19_spill] sm:$0xff]  ;;  %v3351_v50 = vsel %vm173_vm1, %v7928_v25, -inf }
 0x5e8   :  { %v3363_v20 = vsel %vm173_vm1, %v7955_v31, -inf }
 0x5e9   :  { %3364 = vmax.xlane.f32.xlu1 %v3363_v20  ;;  %6043 = vmatmul.msk.f32.vlgmr.msrb.gmra.mxu2 %vm173_vm1, %v2229_v2  ;;  %v7992_v2 = vpop.permute.xlu2 %6352  ;;  %v3348_v20 = vsel %vm173_vm1, %v7905_v4, -inf }
 0x5ea   :  { %6246 = vmatpush.msrb.mxu2 %v1403_v8  ;;  %v9172_v8 = vld [vmem:[#allocation12_spill] sm:$0xff] }
 0x5eb   :  { %3331 = vmax.xlane.f32.xlu2 %v3330_v1 }
 0x5ee   :  { %v4344_v28 = vpop.permute.xlu0 %4343 }
 0x5ef   :  { %v7968_v17 = vpop.f32.mrf.mxu3  ;;  %v7988_v18 = vpop.permute.xlu1 %6372 }
 0x5f0   :  { %v3369_v51 = vsel %vm173_vm1, %v7968_v17, -inf }
 0x5f1   :  { %3370 = vmax.xlane.f32.xlu1 %v3369_v51  ;;  %6047 = vmatmul.msk.f32.vlgmr.msra.gmra.mxu2 %vm173_vm1, %v2233_v61  ;;  %v8002_v1 = vpop.permute.xlu2 %6367  ;;  %v9174_v51 = vld [vmem:[#allocation23_spill] sm:$0xff] }
 0x5f2   :  { %6146 = vmatpush.xpose.msk.msra.mxu2 %vm173_vm1, %v4260_v7  ;;  %v3357_v7 = vsel %vm173_vm1, %v7940_v41, -inf }
 0x5f3   :  { %3337 = vmax.xlane.f32.xlu2 %v3336_v32 }
 0x5f7   :  { %v7998_v63 = vpop.permute.xlu1 %4285 }
 0x5f9   :  { %3373 = vmax.xlane.f32.xlu1 %v3372_v0  ;;  %6068 = vmatmul.msk.f32.vlgmr.msrb.gmra.mxu2 %vm173_vm1, %v9170_v14  ;;  %v8012_v32 = vpop.permute.xlu2 %4287 }
 0x5fa   :  { %6152 = vmatpush.xpose.msk.msrb.mxu2 %vm173_vm1, %v4344_v28  ;;  %v9175_v28 = vld [vmem:[#allocation15_spill] sm:$0xff] }
 0x5fb   :  { %3343 = vmax.xlane.f32.xlu2 %v3342_v3  ;;  %v9176_v3 = vld [vmem:[#allocation22_spill] sm:$0xff] }
 0x5ff   :  { %v8006_v61 = vpop.permute.xlu1 %4313 }
 0x601   :  { %6069 = vmatmul.msk.f32.gmra.mxu2 %vm173_vm1, %v9171_v59  ;;  %v8018_v14 = vpop.permute.xlu2 %4315 }
 0x603   :  { %3346 = vmax.xlane.f32.xlu2 %v3345_v30  ;;  %v8024_v30 = vpop.xlane.xlu0 %1853 }
 0x607   :  { %v8014_v0 = vpop.permute.xlu1 %4371 }
 0x609   :  { %6070 = vmatmul.msk.f32.gmra.mxu2 %vm173_vm1, %v9172_v8  ;;  %v4342_v8 = vpop.permute.xlu2 %4341 }
 0x60b   :  { %3349 = vmax.xlane.f32.xlu2 %v3348_v20  ;;  %v9177_v20 = vld [vmem:[#allocation25_spill] sm:$0xff] }
 0x60f   :  { %v8022_v59 = vpop.permute.xlu1 %4399 }
 0x611   :  { %6071 = vmatmul.msk.f32.gmra.mxu2 %vm173_vm1, %v9173_v35  ;;  %v8033_v53 = vpop.permute.xlu2 %4369 }
 0x613   :  { %3352 = vmax.xlane.f32.xlu2 %v3351_v50 }
 0x617   :  { %v8028_v35 = vpop.permute.xlu1 %4397 }
 0x618   :  { %9178 = vst [vmem:[#allocation7_spill] sm:$0xff] %v8028_v35 }
 0x619   :  { %6072 = vmatmul.msk.f32.gmra.mxu2 %vm173_vm1, %v9174_v51 }
 0x61b   :  { %3358 = vmax.xlane.f32.xlu2 %v3357_v7 }
 0x621   :  { %6073 = vmatmul.msk.f32.gmra.mxu2 %vm173_vm1, %v9175_v28  ;;  %v9179_v28 = vld [vmem:[#allocation17_spill] sm:$0xff] }
 0x629   :  { %6074 = vmatmul.msk.f32.gmra.mxu2 %vm173_vm1, %v9176_v3 }
 0x631   :  { %6075 = vmatmul.msk.f32.gmra.mxu2 %vm173_vm1, %v9177_v20 }
 0x634   :  { %v3335_v50 = vpop.xlane.xlu0 %3334 }
 0x635   :  { %v3377_v51 = vsub.f32 %v7903_v57, %v3335_v50  ;;  %v4428_v57 = vpop.permute.xlu2 %4427 }
 0x637   :  { %v3395_v7 = vmul.f32 1.442695, %v3377_v51 }
 0x639   :  { %6537 = vpow2.f32 %v3395_v7  ;;  %6076 = vmatmul.msk.f32.gmra.mxu2 %vm173_vm1, %v9179_v28  ;;  %v9181_v7 = vld [vmem:[#allocation27_spill] sm:$0xff] }
 0x63c   :  { %v3341_v3 = vpop.xlane.xlu1 %3340 }
 0x63d   :  { %v3379_v46 = vsub.f32 %v7910_v26, %v3341_v3  ;;  %v4426_v26 = vpop.permute.xlu2 %4425 }
 0x63f   :  { %v8036_v37 = vpop.eup %6537  ;;  %v3399_v62 = vmul.f32 1.442695, %v3379_v46  ;;  %v9182_v46 = vld [vmem:[#allocation14_spill] sm:$0xff] }
 0x640   :  { %v3429_v20 = vsel %vm173_vm1, %v8036_v37, 0.0 }
 0x641   :  { %6539 = vpow2.f32 %v3399_v62  ;;  %3430 = vadd.xlane.f32.xlu0 %v3429_v20  ;;  %6077 = vmatmul.msk.f32.gmra.mxu2 %vm173_vm1, %v9180_v23  ;;  %v9183_v20 = vld [vmem:[#allocation26_spill] sm:$0xff] }
 0x647   :  { %v8042_v50 = vpop.eup %6539 }
 0x648   :  { %v3435_v51 = vsel %vm173_vm1, %v8042_v50, 0.0 }
 0x649   :  { %3436 = vadd.xlane.f32.xlu0 %v3435_v51  ;;  %6078 = vmatmul.msk.f32.gmra.mxu2 %vm173_vm1, %v9181_v7 }
 0x651   :  { %6079 = vmatmul.msk.f32.gmra.mxu2 %vm173_vm1, %v9182_v46 }
 0x656   :  { %v3329_v28 = vpop.xlane.xlu2 %3328 }
 0x657   :  { %v3375_v62 = vsub.f32 %v7894_v6, %v3329_v28 }
 0x659   :  { %v3391_v3 = vmul.f32 1.442695, %v3375_v62  ;;  %6080 = vmatmul.msk.f32.gmra.mxu2 %vm173_vm1, %v9183_v20 }
 0x65b   :  { %6541 = vpow2.f32 %v3391_v3 }
 0x65e   :  { %v3332_v23 = vpop.xlane.xlu2 %3331 }
 0x65f   :  { %v3376_v49 = vsub.f32 %v7882_v19, %v3332_v23 }
 0x661   :  { %v8054_v12 = vpop.eup %6541  ;;  %v3393_v51 = vmul.f32 1.442695, %v3376_v49  ;;  %6081 = vmatmul.msk.f32.gmra.mxu2 %vm173_vm1, %v9184_v44 }
 0x662   :  { %v3423_v7 = vsel %vm173_vm1, %v8054_v12, 0.0 }
 0x663   :  { %6543 = vpow2.f32 %v3393_v51  ;;  %3424 = vadd.xlane.f32.xlu2 %v3423_v7 }
 0x666   :  { %v3338_v6 = vpop.xlane.xlu2 %3337 }
 0x667   :  { %v3378_v46 = vsub.f32 %v7888_v10, %v3338_v6 }
 0x669   :  { %v8061_v28 = vpop.eup %6543  ;;  %v3397_v62 = vmul.f32 1.442695, %v3378_v46  ;;  %6147 = vmatmul.msk.f32.vlgmr.msra.gmra.mxu2 %vm173_vm1, %v7966_v21 }
 0x66a   :  { %6158 = vmatpush.xpose.msk.msra.mxu2 %vm173_vm1, %v4428_v57  ;;  %v3426_v49 = vsel %vm173_vm1, %v8061_v28, 0.0 }
 0x66b   :  { %6545 = vpow2.f32 %v3397_v62  ;;  %3427 = vadd.xlane.f32.xlu2 %v3426_v49  ;;  %v3356_v62 = vpop.xlane.xlu0 %3355 }
 0x66e   :  { %v3344_v44 = vpop.xlane.xlu2 %3343 }
 0x66f   :  { %v3380_v19 = vsub.f32 %v7896_v56, %v3344_v44 }
 0x671   :  { %v8069_v3 = vpop.eup %6545  ;;  %v3401_v20 = vmul.f32 1.442695, %v3380_v19  ;;  %6153 = vmatmul.msk.f32.vlgmr.msrb.gmra.mxu2 %vm173_vm1, %v4342_v8  ;;  %v3384_v19 = vsub.f32 %v7912_v47, %v3356_v62 }
 0x672   :  { %v3432_v10 = vsel %vm173_vm1, %v8069_v3, 0.0 }
 0x673   :  { %6547 = vpow2.f32 %v3401_v20  ;;  %3433 = vadd.xlane.f32.xlu2 %v3432_v10  ;;  %v3362_v10 = vpop.xlane.xlu0 %3361 }
 0x676   :  { %v3347_v21 = vpop.xlane.xlu2 %3346 }
 0x677   :  { %v3381_v57 = vsub.f32 %v7918_v39, %v3347_v21  ;;  %v3409_v21 = vmul.f32 1.442695, %v3384_v19 }
 0x679   :  { %v8075_v23 = vpop.eup %6547  ;;  %v3403_v51 = vmul.f32 1.442695, %v3381_v57  ;;  %6159 = vmatmul.msk.f32.vlgmr.msra.gmra.mxu2 %vm173_vm1, %v4426_v26 }
 0x67a   :  { %v3438_v56 = vsel %vm173_vm1, %v8075_v23, 0.0 }
 0x67b   :  { %6549 = vpow2.f32 %v3403_v51  ;;  %3439 = vadd.xlane.f32.xlu2 %v3438_v56  ;;  %v8091_v51 = vpop.f32.mrf.mxu2  ;;  %v3368_v62 = vpop.xlane.xlu0 %3367 }
 0x67c   :  { %9185 = vst [vmem:[#allocation34_spill] sm:$0xff] %v8091_v51 }
 0x67e   :  { %v3350_v7 = vpop.xlane.xlu2 %3349 }
 0x67f   :  { %v3382_v8 = vsub.f32 %v7905_v4, %v3350_v7 }
 0x681   :  { %v8081_v6 = vpop.eup %6549  ;;  %v3405_v46 = vmul.f32 1.442695, %v3382_v8 }
 0x682   :  { %v3441_v39 = vsel %vm173_vm1, %v8081_v6, 0.0 }
 0x683   :  { %6551 = vpow2.f32 %v3405_v46  ;;  %3442 = vadd.xlane.f32.xlu0 %v3441_v39 }
 0x686   :  { %v3353_v49 = vpop.xlane.xlu2 %3352 }
 0x687   :  { %v3383_v26 = vsub.f32 %v7928_v25, %v3353_v49  ;;  %v3386_v25 = vsub.f32 %v7921_v58, %v3362_v10  ;;  %v8103_v49 = vpop.f32.mrf.mxu2  ;;  %v3388_v58 = vsub.f32 %v7930_v54, %v3368_v62  ;;  %v3365_v54 = vpop.xlane.xlu1 %3364 }
 0x688   :  { %9186 = vst [vmem:[#allocation42_spill] sm:$0xff] %v8103_v49 }
 0x689   :  { %v8086_v44 = vpop.eup %6551  ;;  %v3407_v20 = vmul.f32 1.442695, %v3383_v26  ;;  %v3413_v46 = vmul.f32 1.442695, %v3386_v25 }
 0x68a   :  { %v3444_v4 = vsel %vm173_vm1, %v8086_v44, 0.0 }
 0x68b   :  { %6553 = vpow2.f32 %v3407_v20  ;;  %3445 = vadd.xlane.f32.xlu0 %v3444_v4  ;;  %v3417_v20 = vmul.f32 1.442695, %v3388_v58 }
 0x68c   :  { %6555 = vpow2.f32 %v3409_v21 }
 0x68e   :  { %v3359_v57 = vpop.xlane.xlu2 %3358 }
 0x68f   :  { %v3385_v56 = vsub.f32 %v7940_v41, %v3359_v57  ;;  %v8114_v10 = vpop.f32.mrf.mxu2 }
 0x690   :  { %9187 = vst [vmem:[#allocation8_spill] sm:$0xff] %v8114_v10 }
 0x691   :  { %v8094_v7 = vpop.eup %6553  ;;  %v3411_v8 = vmul.f32 1.442695, %v3385_v56  ;;  %v3387_v56 = vsub.f32 %v7955_v31, %v3365_v54 }
 0x692   :  { %v3447_v47 = vsel %vm173_vm1, %v8094_v7, 0.0  ;;  %v8101_v39 = vpop.eup %6555 }
 0x693   :  { %6557 = vpow2.f32 %v3411_v8  ;;  %4453 = vrot.lane.b32.xlu2 %v9159_v5, %s6690_s13  ;;  %3448 = vadd.xlane.f32.xlu0 %v3447_v47  ;;  %v3450_v26 = vsel %vm173_vm1, %v8101_v39, 0.0  ;;  %v3415_v47 = vmul.f32 1.442695, %v3387_v56 }
 0x694   :  { %6559 = vpow2.f32 %v3413_v46 }
 0x695   :  { %6561 = vpow2.f32 %v3417_v20 }
 0x696   :  { %6563 = vpow2.f32 %v3415_v47 }
 0x697   :  { %v8123_v8 = vpop.f32.mrf.mxu2 }
 0x698   :  { %9188 = vst [vmem:[#allocation10_spill] sm:$0xff] %v8123_v8 }
 0x699   :  { %v8105_v41 = vpop.eup %6557 }
 0x69a   :  { %v3453_v19 = vsel %vm173_vm1, %v8105_v41, 0.0  ;;  %v8112_v4 = vpop.eup %6559 }
 0x69b   :  { %3451 = vadd.xlane.f32.xlu0 %v3450_v26  ;;  %3454 = vadd.xlane.f32.xlu1 %v3453_v19  ;;  %v3456_v21 = vsel %vm173_vm1, %v8112_v4, 0.0  ;;  %v8118_v57 = vpop.eup %6561  ;;  %v3371_v26 = vpop.xlane.xlu1 %3370 }
 0x69c   :  { %v3462_v25 = vsel %vm173_vm1, %v8118_v57, 0.0  ;;  %v8129_v62 = vpop.eup %6563  ;;  %v3389_v20 = vsub.f32 %v7968_v17, %v3371_v26 }
 0x69d   :  { %v3459_v58 = vsel %vm173_vm1, %v8129_v62, 0.0 }
 0x69f   :  { %v8127_v46 = vpop.f32.mrf.mxu2 }
 0x6a0   :  { %9189 = vst [vmem:[#allocation13_spill] sm:$0xff] %v8127_v46 }
 0x6a3   :  { %3457 = vadd.xlane.f32.xlu0 %v3456_v21 }
 0x6a7   :  { %v8133_v31 = vpop.f32.mrf.mxu2 }
 0x6a8   :  { %9190 = vst [vmem:[#allocation2_spill] sm:$0xff] %v8133_v31 }
 0x6ab   :  { %3463 = vadd.xlane.f32.xlu0 %v3462_v25  ;;  %v1900_v25 = vsub.f32 %v9155_v11, %v8024_v30 }
 0x6af   :  { %v8137_v19 = vpop.f32.mrf.mxu2 }
 0x6b0   :  { %9191 = vst [vmem:[#allocation4_spill] sm:$0xff] %v8137_v19 }
 0x6b4   :  { %4455 = vrot.lane.b32.xlu1 %v9159_v5, %s6691_s14  ;;  %v8140_v21 = vpop.xlane.xlu0 %3430  ;;  %v3419_v5 = vmul.f32 1.442695, %v3389_v20  ;;  %v1916_v20 = vmul.f32 1.442695, %v1900_v25 }
 0x6b5   :  { %6565 = vrcp.f32 %v8140_v21  ;;  %vm3504_vm7 = vweird.f32 %v8140_v21 }
 0x6b6   :  { %6567 = vpow2.f32 %v3419_v5 }
 0x6b7   :  { %v8143_v54 = vpop.f32.mrf.mxu2 }
 0x6b8   :  { %9192 = vst [vmem:[#allocation5_spill] sm:$0xff] %v8143_v54 }
 0x6bb   :  { %v8147_v56 = vpop.eup %6565 }
 0x6bc   :  { %3460 = vadd.xlane.f32.xlu2 %v3459_v58  ;;  %v8151_v47 = vpop.xlane.xlu0 %3436  ;;  %v3500_v17 = vmul.f32 %v8147_v56, %v8140_v21  ;;  %v8156_v26 = vpop.eup %6567  ;;  %vm3505_vm4 = vweird.f32 %v8147_v56 }
 0x6bd   :  { %v3465_v11 = vsel %vm173_vm1, %v8156_v26, 0.0  ;;  %vm8186_vm8 = vmor %vm3504_vm7, %vm3505_vm4  ;;  %vm3532_vm15 = vweird.f32 %v8151_v47 }
 0x6be   :  { %v3501_v19 = vsub.f32 1.0, %v3500_v17 }
 0x6bf   :  { %4511 = vrot.lane.b32.xlu0 %v6858_v40, %s6691_s14  ;;  %v8160_v54 = vpop.f32.mrf.mxu2 }
 0x6c0   :  { %9193 = vst [vmem:[#allocation9_spill] sm:$0xff] %v8160_v54  ;;  %v3502_v25 = vmul.f32 %v8147_v56, %v3501_v19 }
 0x6d4   :  { %4483 = vrot.lane.b32.xlu2 %v6854_v38, %s6691_s14 }
 0x6d6   :  { %v3425_v58 = vpop.xlane.xlu2 %3424 }
 0x6d7   :  { %6569 = vrcp.f32 %v3425_v58  ;;  %v3482_v10 = vand.u32 2147483648, %v3425_v58  ;;  %v3480_v17 = vand.u32 2147483647, %v3425_v58  ;;  %vm3476_vm3 = vweird.f32 %v3425_v58 }
 0x6d8   :  { %6571 = vrcp.f32 %v8151_v47 }
 0x6d9   :  { %6573 = vpow2.f32 %v1916_v20  ;;  %v3483_v19 = vor.u32 1.1754944e-38, %v3482_v10  ;;  %vm3481_vm6 = vcmp.eq.f32.partialorder %v3480_v17, 8.507059e+37  ;;  %v6349_v17 = vunpack.i.l.bf16 %v7934_v55 }
 0x6dc   :  { %4481 = vrot.lane.b32.xlu2 %v6854_v38, %s6690_s13 }
 0x6dd   :  { %v6570_v5 = vpop.eup %6569 }
 0x6de   :  { %v3472_v30 = vmul.f32 %v6570_v5, %v3425_v58  ;;  %3466 = vadd.xlane.f32.xlu1 %v3465_v11  ;;  %v3428_v31 = vpop.xlane.xlu2 %3427  ;;  %v8164_v46 = vpop.eup %6571  ;;  %vm3477_vm2 = vweird.f32 %v6570_v5  ;;  %v3503_v11 = vadd.f32 %v8147_v56, %v3502_v25 }
 0x6df   :  { %6575 = vrcp.f32 %v3428_v31  ;;  %v3528_v24 = vmul.f32 %v8164_v46, %v8151_v47  ;;  %v8169_v54 = vpop.eup %6573  ;;  %vm3478_vm5 = vmor %vm3476_vm3, %vm3477_vm2  ;;  %v8179_v58 = vpop.f32.mrf.mxu2  ;;  %v3494_v35 = vand.u32 2147483647, %v3428_v31  ;;  %vm3490_vm11 = vweird.f32 %v3428_v31 }
 0x6e0   :  { %v3473_v8 = vsub.f32 1.0, %v3472_v30  ;;  %v9194_v30 = vld [vmem:[#allocation29_spill] sm:$0xff]  ;;  %9195 = vst [vmem:[#allocation19_spill] sm:$0xff] %v8179_v58  ;;  %vm3533_vm12 = vweird.f32 %v8164_v46 }
 0x6e1   :  { %v1864_v16 = vsel %vm173_vm1, %v9194_v30, -inf  ;;  %vm3495_vm14 = vcmp.eq.f32.partialorder %v3494_v35, 8.507059e+37  ;;  %v6354_v35 = vunpack.i.l.bf16 %v7992_v2  ;;  %vm8216_vm2 = vmor %vm3532_vm15, %vm3533_vm12 }
 0x6e2   :  { %v3474_v49 = vmul.f32 %v6570_v5, %v3473_v8  ;;  %v3529_v8 = vsub.f32 1.0, %v3528_v24 }
 0x6e4   :  { %v3475_v34 = vadd.f32 %v6570_v5, %v3474_v49  ;;  %4509 = vrot.lane.b32.xlu2 %v6858_v40, %s6690_s13  ;;  %v3510_v40 = vand.u32 2147483648, %v8140_v21  ;;  %v3530_v58 = vmul.f32 %v8164_v46, %v3529_v8 }
 0x6e5   :  { %v6576_v20 = vpop.eup %6575 }
 0x6e6   :  { %v3479_v9 = vsel %vm3478_vm5, %v6570_v5, %v3475_v34  ;;  %v3486_v51 = vmul.f32 %v6576_v20, %v3428_v31  ;;  %1865 = vmax.xlane.f32.xlu1 %v1864_v16  ;;  %v8177_v49 = vpop.xlane.xlu2 %3433  ;;  %v3508_v34 = vand.u32 2147483647, %v8140_v21  ;;  %v1948_v5 = vsel %vm173_vm1, %v8169_v54, 0.0 }
 0x6e7   :  { %v3484_v25 = vsel %vm3481_vm6, %v3483_v19, %v3479_v9  ;;  %6577 = vrcp.f32 %v8177_v49  ;;  %v3507_v9 = vsel %vm8186_vm8, %v8147_v56, %v3503_v11  ;;  %v3496_v19 = vand.u32 2147483648, %v3428_v31 }
 0x6e8   :  { %v3695_v16 = vmul.f32 %v8054_v12, %v3484_v25  ;;  %v3487_v24 = vsub.f32 1.0, %v3486_v51  ;;  %vm3491_vm9 = vweird.f32 %v6576_v20  ;;  %v3511_v12 = vor.u32 1.1754944e-38, %v3510_v40 }
 0x6e9   :  { %1949 = vadd.xlane.f32.xlu0 %v1948_v5  ;;  %vm3509_vm10 = vcmp.eq.f32.partialorder %v3508_v34, 8.507059e+37  ;;  %vm3492_vm13 = vmor %vm3490_vm11, %vm3491_vm9  ;;  %v3497_v56 = vor.u32 1.1754944e-38, %v3496_v19  ;;  %v3531_v11 = vadd.f32 %v8164_v46, %v3530_v58  ;;  %v6350_v58 = vunpack.i.h.bf16 %v7934_v55 }
 0x6ea   :  { %v3488_v48 = vmul.f32 %v6576_v20, %v3487_v24  ;;  %6114 = vmatmul.msk.f32.vlgmr.msra.gmra.mxu3 %vm173_vm1, %v3695_v16  ;;  %v3512_v25 = vsel %vm3509_vm10, %v3511_v12, %v3507_v9  ;;  %v3536_v16 = vand.u32 2147483647, %v8151_v47  ;;  %v3524_v9 = vand.u32 2147483648, %v8177_v49 }
 0x6eb   :  { %3836 = vmatpush.msra.mxu3 %v6349_v17  ;;  %v3697_v34 = vmul.f32 %v8036_v37, %v3512_v25  ;;  %v3535_v37 = vsel %vm8216_vm2, %v8164_v46, %v3531_v11  ;;  %v3522_v55 = vand.u32 2147483647, %v8177_v49  ;;  %vm3518_vm5 = vweird.f32 %v8177_v49 }
 0x6ec   :  { %v3489_v51 = vadd.f32 %v6576_v20, %v3488_v48  ;;  %4539 = vrot.lane.b32.xlu2 %v9148_v15, %s6691_s14  ;;  %v3538_v48 = vand.u32 2147483648, %v8151_v47  ;;  %vm3537_vm4 = vcmp.eq.f32.partialorder %v3536_v16, 8.507059e+37 }
 0x6ed   :  { %v6578_v21 = vpop.eup %6577  ;;  %vm3523_vm7 = vcmp.eq.f32.partialorder %v3522_v55, 8.507059e+37 }
 0x6ee   :  { %v3493_v8 = vsel %vm3492_vm13, %v6576_v20, %v3489_v51  ;;  %v3514_v10 = vmul.f32 %v6578_v21, %v8177_v49  ;;  %v3440_v40 = vpop.xlane.xlu2 %3439  ;;  %v8212_v20 = vpop.f32.mrf.mxu2  ;;  %vm3519_vm3 = vweird.f32 %v6578_v21  ;;  %v3539_v47 = vor.u32 1.1754944e-38, %v3538_v48 }
 0x6ef   :  { %v3498_v31 = vsel %vm3495_vm14, %v3497_v56, %v3493_v8  ;;  %6579 = vrcp.f32 %v3440_v40  ;;  %vm3520_vm6 = vmor %vm3518_vm5, %vm3519_vm3  ;;  %v3525_v51 = vor.u32 1.1754944e-38, %v3524_v9  ;;  %v6359_v49 = vunpack.i.l.bf16 %v7948_v36 }
 0x6f0   :  { %v3696_v24 = vmul.f32 %v8061_v28, %v3498_v31  ;;  %v3515_v5 = vsub.f32 1.0, %v3514_v10  ;;  %v3540_v46 = vsel %vm3537_vm4, %v3539_v47, %v3535_v37  ;;  %vm3546_vm9 = vweird.f32 %v3440_v40 }
 0x6f1   :  { %v3699_v10 = vmul.f32 %v8042_v50, %v3540_v46  ;;  %v6376_v50 = vpack.i.bf16 %v9143_v27, %v6822_v22 }
 0x6f2   :  { %v3516_v28 = vmul.f32 %v6578_v21, %v3515_v5  ;;  %6115 = vmatmul.msk.f32.vlgmr.msrb.gmra.mxu0 %vm173_vm1, %v3696_v24  ;;  %6116 = vmatmul.msk.f32.vlgmr.msrb.gmra.mxu3 %vm173_vm1, %v3697_v34  ;;  %v6355_v34 = vunpack.i.h.bf16 %v7992_v2  ;;  %v3550_v24 = vand.u32 2147483647, %v3440_v40 }
 0x6f3   :  { %3862 = vmatpush.msrb.mxu0 %v6350_v58  ;;  %3888 = vmatpush.msrb.mxu3 %v6354_v35 }
 0x6f4   :  { %v3517_v19 = vadd.f32 %v6578_v21, %v3516_v28  ;;  %4537 = vrot.lane.b32.xlu2 %v9148_v15, %s6690_s13  ;;  %v3552_v15 = vand.u32 2147483648, %v3440_v40  ;;  %vm3551_vm11 = vcmp.eq.f32.partialorder %v3550_v24, 8.507059e+37 }
 0x6f5   :  { %v6580_v12 = vpop.eup %6579 }
 0x6f6   :  { %v3521_v25 = vsel %vm3520_vm6, %v6578_v21, %v3517_v19  ;;  %v3542_v56 = vmul.f32 %v6580_v12, %v3440_v40  ;;  %v3443_v11 = vpop.xlane.xlu0 %3442  ;;  %vm3547_vm8 = vweird.f32 %v6580_v12  ;;  %v8236_v21 = vpop.f32.mrf.mxu2  ;;  %v3553_v5 = vor.u32 1.1754944e-38, %v3552_v15 }
 0x6f7   :  { %v3526_v8 = vsel %vm3523_vm7, %v3525_v51, %v3521_v25  ;;  %6581 = vrcp.f32 %v3443_v11  ;;  %vm3548_vm10 = vmor %vm3546_vm9, %vm3547_vm8  ;;  %v6360_v40 = vunpack.i.h.bf16 %v7948_v36  ;;  %v3566_v37 = vand.u32 2147483648, %v3443_v11 }
 0x6f8   :  { %v3698_v48 = vmul.f32 %v8069_v3, %v3526_v8  ;;  %v3543_v31 = vsub.f32 1.0, %v3542_v56  ;;  %v3564_v55 = vand.u32 2147483647, %v3443_v11  ;;  %vm3560_vm13 = vweird.f32 %v3443_v11 }
 0x6f9   :  { %v3567_v46 = vor.u32 1.1754944e-38, %v3566_v37 }
 0x6fa   :  { %v3544_v16 = vmul.f32 %v6580_v12, %v3543_v31  ;;  %6117 = vmatmul.msk.f32.vlgmr.msra.gmra.mxu0 %vm173_vm1, %v3698_v48  ;;  %6118 = vmatmul.msk.f32.vlgmr.msra.gmra.mxu3 %vm173_vm1, %v3699_v10  ;;  %vm3565_vm15 = vcmp.eq.f32.partialorder %v3564_v55, 8.507059e+37  ;;  %v6364_v10 = vunpack.i.l.bf16 %v7951_v42 }
 0x6fb   :  { %3914 = vmatpush.msra.mxu0 %v6355_v34  ;;  %3940 = vmatpush.msra.mxu3 %v6359_v49 }
 0x6fc   :  { %v3545_v3 = vadd.f32 %v6580_v12, %v3544_v16  ;;  %4567 = vrot.lane.b32.xlu2 %v9149_v29, %s6691_s14 }
 0x6fd   :  { %v6582_v2 = vpop.eup %6581  ;;  %6377 = vrot.lane.b32.xlu0 %v6376_v50, %s6686_s30 }
 0x6fe   :  { %v3549_v58 = vsel %vm3548_vm10, %v6580_v12, %v3545_v3  ;;  %v3556_v35 = vmul.f32 %v6582_v2, %v3443_v11  ;;  %v3446_v17 = vpop.xlane.xlu0 %3445  ;;  %vm3561_vm12 = vweird.f32 %v6582_v2  ;;  %v8248_v12 = vpop.f32.mrf.mxu2 }
 0x6ff   :  { %v3554_v9 = vsel %vm3551_vm11, %v3553_v5, %v3549_v58  ;;  %6583 = vrcp.f32 %v3446_v17  ;;  %4595 = vrot.lane.b32.xlu1 %v9162_v33, %s6691_s14  ;;  %vm3562_vm14 = vmor %vm3560_vm13, %vm3561_vm12  ;;  %v3580_v48 = vand.u32 2147483648, %v3446_v17  ;;  %v3578_v49 = vand.u32 2147483647, %v3446_v17 }
 0x700   :  { %v3700_v22 = vmul.f32 %v8075_v23, %v3554_v9  ;;  %v3557_v27 = vsub.f32 1.0, %v3556_v35  ;;  %v3374_v23 = vpop.xlane.xlu1 %3373  ;;  %vm3574_vm3 = vweird.f32 %v3446_v17 }
 0x701   :  { %v3581_v16 = vor.u32 1.1754944e-38, %v3580_v48  ;;  %vm3579_vm5 = vcmp.eq.f32.partialorder %v3578_v49, 8.507059e+37 }
 0x702   :  { %v3558_v28 = vmul.f32 %v6582_v2, %v3557_v27  ;;  %6119 = vmatmul.msk.f32.vlgmr.msrb.gmra.mxu0 %vm173_vm1, %v3700_v22 }
 0x703   :  { %3966 = vmatpush.msrb.mxu0 %v6360_v40  ;;  %v3390_v40 = vsub.f32 %v7977_v13, %v3374_v23 }
 0x704   :  { %v3559_v47 = vadd.f32 %v6582_v2, %v3558_v28 }
 0x705   :  { %v6584_v19 = vpop.eup %6583  ;;  %4651 = vrot.lane.b32.xlu0 %v9153_v60, %s6691_s14 }
 0x706   :  { %v3563_v51 = vsel %vm3562_vm14, %v6582_v2, %v3559_v47  ;;  %v3570_v36 = vmul.f32 %v6584_v19, %v3446_v17  ;;  %v3449_v25 = vpop.xlane.xlu0 %3448  ;;  %vm3575_vm2 = vweird.f32 %v6584_v19  ;;  %v8261_v2 = vpop.f32.mrf.mxu2  ;;  %v6365_v17 = vunpack.i.h.bf16 %v7951_v42 }
 0x707   :  { %v3568_v56 = vsel %vm3565_vm15, %v3567_v46, %v3563_v51  ;;  %6585 = vrcp.f32 %v3449_v25  ;;  %4593 = vrot.lane.b32.xlu1 %v9162_v33, %s6690_s13  ;;  %vm3576_vm4 = vmor %vm3574_vm3, %vm3575_vm2  ;;  %v3594_v9 = vand.u32 2147483648, %v3449_v25  ;;  %v3592_v27 = vand.u32 2147483647, %v3449_v25 }
 0x708   :  { %v3701_v11 = vmul.f32 %v8081_v6, %v3568_v56  ;;  %v3571_v8 = vsub.f32 1.0, %v3570_v36  ;;  %vm3588_vm7 = vweird.f32 %v3449_v25  ;;  %v3421_v46 = vmul.f32 1.442695, %v3390_v40 }
 0x709   :  { %v3595_v55 = vor.u32 1.1754944e-38, %v3594_v9  ;;  %vm3593_vm9 = vcmp.eq.f32.partialorder %v3592_v27, 8.507059e+37 }
 0x70a   :  { %v3572_v31 = vmul.f32 %v6584_v19, %v3571_v8  ;;  %6120 = vmatmul.msk.f32.vlgmr.msrb.gmra.mxu3 %vm173_vm1, %v3701_v11 }
 0x70b   :  { %3992 = vmatpush.msrb.mxu3 %v6364_v10 }
 0x70c   :  { %v3573_v34 = vadd.f32 %v6584_v19, %v3572_v31 }
 0x70d   :  { %v6586_v15 = vpop.eup %6585  ;;  %4679 = vrot.lane.b32.xlu0 %v9154_v43, %s6691_s14 }
 0x70e   :  { %v3577_v24 = vsel %vm3576_vm4, %v6584_v19, %v3573_v34  ;;  %v3584_v6 = vmul.f32 %v6586_v15, %v3449_v25  ;;  %v3452_v50 = vpop.xlane.xlu0 %3451  ;;  %v8259_v3 = vpop.xlane.xlu1 %3454  ;;  %vm3589_vm6 = vweird.f32 %v6586_v15  ;;  %v6369_v25 = vunpack.i.l.bf16 %v8002_v1 }
 0x70f   :  { %v3582_v5 = vsel %vm3579_vm5, %v3581_v16, %v3577_v24  ;;  %6587 = vrcp.f32 %v3452_v50  ;;  %4623 = vrot.lane.b32.xlu1 %v6880_v52, %s6691_s14  ;;  %vm3590_vm8 = vmor %vm3588_vm7, %vm3589_vm6  ;;  %v8280_v56 = vpop.f32.mrf.mxu2  ;;  %v3608_v11 = vand.u32 2147483648, %v3452_v50  ;;  %v3606_v48 = vand.u32 2147483647, %v3452_v50 }
 0x710   :  { %v3702_v58 = vmul.f32 %v8086_v44, %v3582_v5  ;;  %v3585_v35 = vsub.f32 1.0, %v3584_v6  ;;  %6589 = vrcp.f32 %v8259_v3  ;;  %v3622_v31 = vand.u32 2147483648, %v8259_v3 }
 0x711   :  { %v3620_v34 = vand.u32 2147483647, %v8259_v3  ;;  %vm3602_vm12 = vweird.f32 %v3452_v50  ;;  %v3609_v16 = vor.u32 1.1754944e-38, %v3608_v11  ;;  %vm3616_vm14 = vweird.f32 %v8259_v3 }
 0x712   :  { %v3586_v22 = vmul.f32 %v6586_v15, %v3585_v35  ;;  %6121 = vmatmul.msk.f32.vlgmr.msra.gmra.mxu0 %vm173_vm1, %v3702_v58  ;;  %vm3607_vm15 = vcmp.eq.f32.partialorder %v3606_v48, 8.507059e+37  ;;  %v3623_v5 = vor.u32 1.1754944e-38, %v3622_v31 }
 0x713   :  { %4018 = vmatpush.msra.mxu0 %v6365_v17  ;;  %vm3621_vm3 = vcmp.eq.f32.partialorder %v3620_v34, 8.507059e+37 }
 0x714   :  { %v3587_v37 = vadd.f32 %v6586_v15, %v3586_v22 }
 0x715   :  { %v6588_v28 = vpop.eup %6587  ;;  %4677 = vrot.lane.b32.xlu0 %v9154_v43, %s6690_s13 }
 0x716   :  { %v6590_v44 = vpop.eup %6589  ;;  %v3591_v47 = vsel %vm3590_vm8, %v6586_v15, %v3587_v37  ;;  %v3598_v42 = vmul.f32 %v6588_v28, %v3452_v50  ;;  %v8272_v19 = vpop.xlane.xlu0 %3457  ;;  %vm3603_vm10 = vweird.f32 %v6588_v28  ;;  %v6370_v37 = vunpack.i.h.bf16 %v8002_v1 }
 0x717   :  { %v3596_v51 = vsel %vm3593_vm9, %v3595_v55, %v3591_v47  ;;  %v3612_v36 = vmul.f32 %v6590_v44, %v8259_v3  ;;  %6591 = vrcp.f32 %v8272_v19  ;;  %4621 = vrot.lane.b32.xlu1 %v6880_v52, %s6690_s13  ;;  %vm3617_vm11 = vweird.f32 %v6590_v44  ;;  %vm3604_vm13 = vmor %vm3602_vm12, %vm3603_vm10 }
 0x718   :  { %v3703_v13 = vmul.f32 %v8094_v7, %v3596_v51  ;;  %v3599_v23 = vsub.f32 1.0, %v3598_v42  ;;  %6593 = vpow2.f32 %v3421_v46  ;;  %vm3618_vm2 = vmor %vm3616_vm14, %vm3617_vm11  ;;  %v6374_v55 = vunpack.i.l.bf16 %v7988_v18  ;;  %v8296_v42 = vpop.f32.mrf.mxu2 }
 0x719   :  { %v3613_v8 = vsub.f32 1.0, %v3612_v36  ;;  %vm3630_vm5 = vweird.f32 %v8272_v19 }
 0x71a   :  { %v3600_v10 = vmul.f32 %v6588_v28, %v3599_v23  ;;  %6122 = vmatmul.msk.f32.vlgmr.msra.gmra.mxu3 %vm173_vm1, %v3703_v13  ;;  %v8302_v13 = vpop.permute.xlu2 %4453 }
 0x71b   :  { %v3614_v49 = vmul.f32 %v6590_v44, %v3613_v8  ;;  %4044 = vmatpush.msra.mxu3 %v6369_v25  ;;  %v6375_v8 = vunpack.i.h.bf16 %v7988_v18 }
 0x71c   :  { %v3601_v7 = vadd.f32 %v6588_v28, %v3600_v10 }
 0x71d   :  { %v6592_v15 = vpop.eup %6591  ;;  %v3615_v24 = vadd.f32 %v6590_v44, %v3614_v49 }
 0x71e   :  { %v3605_v6 = vsel %vm3604_vm13, %v6588_v28, %v3601_v7  ;;  %v3626_v58 = vmul.f32 %v6592_v15, %v8272_v19  ;;  %v3464_v35 = vpop.xlane.xlu0 %3463  ;;  %v8288_v40 = vpop.eup %6593  ;;  %v3636_v28 = vand.u32 2147483648, %v8272_v19  ;;  %vm3631_vm4 = vweird.f32 %v6592_v15 }
 0x71f   :  { %v3610_v17 = vsel %vm3607_vm15, %v3609_v16, %v3605_v6  ;;  %v3619_v9 = vsel %vm3618_vm2, %v6590_v44, %v3615_v24  ;;  %6595 = vrcp.f32 %v3464_v35  ;;  %v3634_v44 = vand.u32 2147483647, %v8272_v19  ;;  %vm3632_vm6 = vmor %vm3630_vm5, %vm3631_vm4 }
 0x720   :  { %v3704_v22 = vmul.f32 %v8101_v39, %v3610_v17  ;;  %v3624_v50 = vsel %vm3621_vm3, %v3623_v5, %v3619_v9  ;;  %v3627_v27 = vsub.f32 1.0, %v3626_v58  ;;  %v3468_v1 = vsel %vm173_vm1, %v8288_v40, 0.0  ;;  %v8307_v49 = vpop.f32.mrf.mxu2 }
 0x721   :  { %v3705_v3 = vmul.f32 %v8105_v41, %v3624_v50  ;;  %v3637_v46 = vor.u32 1.1754944e-38, %v3636_v28  ;;  %vm3635_vm7 = vcmp.eq.f32.partialorder %v3634_v44, 8.507059e+37  ;;  %v3664_v19 = vand.u32 2147483648, %v3464_v35 }
 0x722   :  { %v3628_v47 = vmul.f32 %v6592_v15, %v3627_v27  ;;  %6123 = vmatmul.msk.f32.vlgmr.msrb.gmra.mxu0 %vm173_vm1, %v3704_v22  ;;  %v3662_v48 = vand.u32 2147483647, %v3464_v35  ;;  %vm3658_vm9 = vweird.f32 %v3464_v35  ;;  %v9201_v27 = vld [vmem:[#allocation33_spill] sm:$0xff] }
 0x723   :  { %6124 = vmatmul.msk.f32.vlgmr.msrb.gmra.mxu3 %vm173_vm1, %v3705_v3  ;;  %4070 = vmatpush.msrb.mxu0 %v6370_v37  ;;  %v3665_v34 = vor.u32 1.1754944e-38, %v3664_v19 }
 0x724   :  { %v3629_v39 = vadd.f32 %v6592_v15, %v3628_v47  ;;  %4096 = vmatpush.msrb.mxu3 %v6374_v55  ;;  %vm3663_vm11 = vcmp.eq.f32.partialorder %v3662_v48, 8.507059e+37 }
 0x725   :  { %v6596_v41 = vpop.eup %6595  ;;  %3469 = vadd.xlane.f32.xlu2 %v3468_v1 }
 0x726   :  { %v3633_v51 = vsel %vm3632_vm6, %v6592_v15, %v3629_v39  ;;  %v3654_v36 = vmul.f32 %v6596_v41, %v3464_v35  ;;  %vm3659_vm8 = vweird.f32 %v6596_v41  ;;  %v4456_v39 = vpop.permute.xlu1 %4455 }
 0x727   :  { %v3638_v23 = vsel %vm3635_vm7, %v3637_v46, %v3633_v51  ;;  %vm3660_vm10 = vmor %vm3658_vm9, %vm3659_vm8 }
 0x728   :  { %v3706_v25 = vmul.f32 %v8112_v4, %v3638_v23  ;;  %v3655_v11 = vsub.f32 1.0, %v3654_v36  ;;  %v8314_v6 = vpop.f32.mrf.mxu2 }
 0x729   :  { %9200 = vst [vmem:[#allocation21_spill] sm:$0xff] %v8314_v6 }
 0x72a   :  { %v3656_v10 = vmul.f32 %v6596_v41, %v3655_v11  ;;  %6125 = vmatmul.msk.f32.vlgmr.msra.gmra.mxu0 %vm173_vm1, %v3706_v25 }
 0x72b   :  { %4122 = vmatpush.msra.mxu0 %v6375_v8 }
 0x72c   :  { %v3657_v31 = vadd.f32 %v6596_v41, %v3656_v10 }
 0x72e   :  { %v3661_v7 = vsel %vm3660_vm10, %v6596_v41, %v3657_v31 }
 0x72f   :  { %v3666_v15 = vsel %vm3663_vm11, %v3665_v34, %v3661_v7  ;;  %v3461_v4 = vpop.xlane.xlu2 %3460 }
 0x730   :  { %v3708_v16 = vmul.f32 %v8118_v57, %v3666_v15  ;;  %6597 = vrcp.f32 %v3461_v4  ;;  %v3650_v17 = vand.u32 2147483648, %v3461_v4  ;;  %v3648_v57 = vand.u32 2147483647, %v3461_v4  ;;  %v8324_v55 = vpop.f32.mrf.mxu2 }
 0x731   :  { %v4512_v18 = vpop.permute.xlu0 %4511  ;;  %vm3644_vm13 = vweird.f32 %v3461_v4 }
 0x732   :  { %6127 = vmatmul.msk.f32.vlgmr.msrb.gmra.mxu0 %vm173_vm1, %v3708_v16  ;;  %6164 = vmatpush.xpose.msk.msrb.mxu2 %vm173_vm1, %v4512_v18  ;;  %v3651_v50 = vor.u32 1.1754944e-38, %v3650_v17  ;;  %vm3649_vm15 = vcmp.eq.f32.partialorder %v3648_v57, 8.507059e+37  ;;  %v9202_v18 = vld [vmem:[#allocation31_spill] sm:$0xff] }
 0x733   :  { %6150 = vmatpush.xpose.msk.msrb.mxu0 %vm173_vm1, %v8018_v14  ;;  %v1888_v14 = vsel %vm173_vm1, %v9201_v27, -inf }
 0x736   :  { %v6598_v24 = vpop.eup %6597 }
 0x737   :  { %v3640_v5 = vmul.f32 %v6598_v24, %v3461_v4  ;;  %v8316_v58 = vpop.permute.xlu2 %4483  ;;  %vm3645_vm12 = vweird.f32 %v6598_v24 }
 0x738   :  { %vm3646_vm14 = vmor %vm3644_vm13, %vm3645_vm12  ;;  %v8333_v1 = vpop.f32.mrf.mxu2 }
 0x739   :  { %v3641_v35 = vsub.f32 1.0, %v3640_v5  ;;  %v4714_v41 = vsel %vm173_vm1, %v8333_v1, -inf }
 0x73b   :  { %v3642_v9 = vmul.f32 %v6598_v24, %v3641_v35 }
 0x73d   :  { %v3643_v22 = vadd.f32 %v6598_v24, %v3642_v9  ;;  %4565 = vrot.lane.b32.xlu2 %v9149_v29, %s6690_s13  ;;  %v4705_v29 = vsel %vm173_vm1, %v8324_v55, -inf }
 0x73f   :  { %v3647_v37 = vsel %vm3646_vm14, %v6598_v24, %v3643_v22  ;;  %1889 = vmax.xlane.f32.xlu0 %v1888_v14  ;;  %v8322_v3 = vpop.permute.xlu2 %4481  ;;  %v1876_v24 = vsel %vm173_vm1, %v9202_v18, -inf }
 0x740   :  { %v3652_v28 = vsel %vm3649_vm15, %v3651_v50, %v3647_v37 }
 0x741   :  { %v3707_v47 = vmul.f32 %v8129_v62, %v3652_v28 }
 0x743   :  { %6126 = vmatmul.msk.f32.vlgmr.msra.gmra.mxu3 %vm173_vm1, %v3707_v47 }
 0x744   :  { %6148 = vmatpush.xpose.msk.msra.mxu3 %vm173_vm1, %v8012_v32 }
 0x747   :  { %4706 = vmax.xlane.f32.xlu0 %v4705_v29  ;;  %v4510_v44 = vpop.permute.xlu2 %4509 }
 0x748   :  { %6165 = vmatmul.msk.f32.vlgmr.msrb.gmra.mxu2 %vm173_vm1, %v4510_v44 }
 0x74f   :  { %4715 = vmax.xlane.f32.xlu0 %v4714_v41  ;;  %v4540_v29 = vpop.permute.xlu2 %4539 }
 0x751   :  { %v3467_v62 = vpop.xlane.xlu1 %3466 }
 0x752   :  { %6599 = vrcp.f32 %v3467_v62  ;;  %v3678_v25 = vand.u32 2147483648, %v3467_v62  ;;  %v3676_v10 = vand.u32 2147483647, %v3467_v62  ;;  %vm3672_vm3 = vweird.f32 %v3467_v62 }
 0x754   :  { %v3679_v31 = vor.u32 1.1754944e-38, %v3678_v25  ;;  %vm3677_vm5 = vcmp.eq.f32.partialorder %v3676_v10, 8.507059e+37 }
 0x757   :  { %v4538_v41 = vpop.permute.xlu2 %4537 }
 0x758   :  { %v6600_v46 = vpop.eup %6599 }
 0x759   :  { %v3668_v51 = vmul.f32 %v6600_v46, %v3467_v62  ;;  %v1866_v36 = vpop.xlane.xlu1 %1865  ;;  %vm3673_vm2 = vweird.f32 %v6600_v46 }
 0x75a   :  { %v1904_v32 = vsub.f32 %v9194_v30, %v1866_v36  ;;  %vm3674_vm4 = vmor %vm3672_vm3, %vm3673_vm2 }
 0x75b   :  { %v3669_v23 = vsub.f32 1.0, %v3668_v51 }
 0x75c   :  { %v1924_v11 = vmul.f32 1.442695, %v1904_v32  ;;  %v1950_v8 = vpop.xlane.xlu0 %1949 }
 0x75d   :  { %v3670_v19 = vmul.f32 %v6600_v46, %v3669_v23  ;;  %6601 = vrcp.f32 %v1950_v8  ;;  %v2005_v17 = vand.u32 2147483647, %v1950_v8  ;;  %vm2001_vm7 = vweird.f32 %v1950_v8 }
 0x75e   :  { %6603 = vpow2.f32 %v1924_v11 }
 0x75f   :  { %v3671_v48 = vadd.f32 %v6600_v46, %v3670_v19  ;;  %vm2006_vm9 = vcmp.eq.f32.partialorder %v2005_v17, 8.507059e+37 }
 0x761   :  { %v3675_v34 = vsel %vm3674_vm4, %v6600_v46, %v3671_v48  ;;  %v4568_v46 = vpop.permute.xlu2 %4567 }
 0x762   :  { %v3680_v7 = vsel %vm3677_vm5, %v3679_v31, %v3675_v34 }
 0x763   :  { %v6602_v15 = vpop.eup %6601  ;;  %v3709_v4 = vmul.f32 %v8156_v26, %v3680_v7  ;;  %6387 = vrot.lane.b32.xlu0 %v9138_v45, %s6692_s17  ;;  %v2007_v45 = vand.u32 2147483648, %v1950_v8 }
 0x764   :  { %v8341_v30 = vpop.eup %6603  ;;  %v1997_v16 = vmul.f32 %v6602_v15, %v1950_v8  ;;  %vm2002_vm6 = vweird.f32 %v6602_v15 }
 0x765   :  { %6128 = vmatmul.msk.f32.vlgmr.msrb.gmra.mxu3 %vm173_vm1, %v3709_v4  ;;  %v1960_v5 = vsel %vm173_vm1, %v8341_v30, 0.0  ;;  %vm2003_vm8 = vmor %vm2001_vm7, %vm2002_vm6  ;;  %v2008_v22 = vor.u32 1.1754944e-38, %v2007_v45 }
 0x766   :  { %v1998_v35 = vsub.f32 1.0, %v1997_v16  ;;  %6154 = vmatpush.xpose.msk.msrb.mxu3 %vm173_vm1, %v8014_v0  ;;  %1877 = vmax.xlane.f32.xlu2 %v1876_v24 }
 0x767   :  { %1961 = vadd.xlane.f32.xlu1 %v1960_v5  ;;  %v9203_v5 = vld [vmem:[#allocation7_spill] sm:$0xff] }
 0x768   :  { %v1999_v26 = vmul.f32 %v6602_v15, %v1998_v35 }
 0x76a   :  { %v2000_v9 = vadd.f32 %v6602_v15, %v1999_v26 }
 0x76c   :  { %v2004_v57 = vsel %vm2003_vm8, %v6602_v15, %v2000_v9 }
 0x76d   :  { %6149 = vmatmul.msk.f32.vlgmr.msra.gmra.mxu3 %vm173_vm1, %v7998_v63  ;;  %v2009_v50 = vsel %vm2006_vm9, %v2008_v22, %v2004_v57  ;;  %v8372_v31 = vpop.f32.mrf.mxu3 }
 0x76e   :  { %6160 = vmatpush.xpose.msk.msra.mxu3 %vm173_vm1, %v4456_v39  ;;  %v2220_v47 = vmul.f32 %v8169_v54, %v2009_v50  ;;  %v6381_v54 = vpack.i.bf16 %v9162_v33, %v6854_v38 }
 0x76f   :  { %v6378_v14 = vpop.permute.xlu0 %6377 }
 0x770   :  { %v6380_v0 = vunpack.i.h.bf16 %v6378_v14  ;;  %v6379_v37 = vunpack.i.l.bf16 %v6378_v14  ;;  %v9204_v14 = vld [vmem:[#allocation11_spill] sm:$0xff] }
 0x771   :  { %v4596_v28 = vpop.permute.xlu1 %4595 }
 0x772   :  { %2257 = vmatpush.msra.mxu1 %v6379_v37  ;;  %6170 = vmatpush.xpose.msk.msra.mxu2 %vm173_vm1, %v4596_v28 }
 0x773   :  { %6034 = vmatmul.msk.f32.vlgmr.msra.gmra.mxu1 %vm173_vm1, %v2220_v47 }
 0x774   :  { %2361 = vmatpush.msrb.mxu1 %v6380_v0 }
 0x775   :  { %6155 = vmatmul.msk.f32.vlgmr.msrb.gmra.mxu3 %vm173_vm1, %v8033_v53  ;;  %v8379_v4 = vpop.f32.mrf.mxu3 }
 0x776   :  { %6166 = vmatpush.xpose.msk.msrb.mxu3 %vm173_vm1, %v4540_v29 }
 0x777   :  { %v4652_v63 = vpop.permute.xlu0 %4651 }
 0x779   :  { %v4594_v44 = vpop.permute.xlu1 %4593 }
 0x77a   :  { %6171 = vmatmul.msk.f32.vlgmr.msra.gmra.mxu2 %vm173_vm1, %v4594_v44 }
 0x77d   :  { %6161 = vmatmul.msk.f32.vlgmr.msra.gmra.mxu3 %vm173_vm1, %v8302_v13 }
 0x77e   :  { %4649 = vrot.lane.b32.xlu2 %v9153_v60, %s6690_s13 }
 0x77f   :  { %v4680_v39 = vpop.permute.xlu0 %4679 }
 0x780   :  { %6382 = vrot.lane.b32.xlu1 %v6381_v54, %s6686_s30  ;;  %6176 = vmatpush.xpose.msk.msrb.mxu2 %vm173_vm1, %v4680_v39 }
 0x781   :  { %v4624_v53 = vpop.permute.xlu1 %4623 }
 0x782   :  { %6172 = vmatpush.xpose.msk.msra.mxu3 %vm173_vm1, %v4624_v53 }
 0x785   :  { %6167 = vmatmul.msk.f32.vlgmr.msrb.gmra.mxu3 %vm173_vm1, %v4538_v41 }
 0x787   :  { %v4678_v62 = vpop.permute.xlu0 %4677 }
 0x788   :  { %6177 = vmatmul.msk.f32.vlgmr.msrb.gmra.mxu2 %vm173_vm1, %v4678_v62 }
 0x789   :  { %v4622_v13 = vpop.permute.xlu1 %4621 }
 0x78d   :  { %6173 = vmatmul.msk.f32.vlgmr.msra.gmra.mxu3 %vm173_vm1, %v4622_v13 }
 0x798   :  { %v3470_v51 = vpop.xlane.xlu2 %3469 }
 0x799   :  { %6605 = vrcp.f32 %v3470_v51  ;;  %v3692_v23 = vand.u32 2147483648, %v3470_v51  ;;  %v3690_v11 = vand.u32 2147483647, %v3470_v51  ;;  %vm3686_vm11 = vweird.f32 %v3470_v51 }
 0x79b   :  { %v3693_v19 = vor.u32 1.1754944e-38, %v3692_v23  ;;  %vm3691_vm13 = vcmp.eq.f32.partialorder %v3690_v11, 8.507059e+37 }
 0x79f   :  { %v6606_v38 = vpop.eup %6605 }
 0x7a0   :  { %v3682_v36 = vmul.f32 %v6606_v38, %v3470_v51  ;;  %vm3687_vm10 = vweird.f32 %v6606_v38  ;;  %v4566_v45 = vpop.permute.xlu2 %4565 }
 0x7a1   :  { %vm3688_vm12 = vmor %vm3686_vm11, %vm3687_vm10 }
 0x7a2   :  { %v3683_v32 = vsub.f32 1.0, %v3682_v36 }
 0x7a4   :  { %v3684_v25 = vmul.f32 %v6606_v38, %v3683_v32  ;;  %v8423_v32 = vpop.f32.mrf.mxu2 }
 0x7a6   :  { %v3685_v8 = vadd.f32 %v6606_v38, %v3684_v25 }
 0x7a8   :  { %v3689_v10 = vsel %vm3688_vm12, %v6606_v38, %v3685_v8  ;;  %v8421_v38 = vpop.f32.mrf.mxu0  ;;  %v4723_v8 = vsel %vm173_vm1, %v8423_v32, -inf }
 0x7a9   :  { %v3694_v48 = vsel %vm3691_vm13, %v3693_v19, %v3689_v10 }
 0x7aa   :  { %v3710_v34 = vmul.f32 %v8288_v40, %v3694_v48 }
 0x7ac   :  { %6129 = vmatmul.msk.f32.vlgmr.msra.gmra.mxu0 %vm173_vm1, %v3710_v34 }
 0x7ad   :  { %6156 = vmatpush.xpose.msk.msra.mxu0 %vm173_vm1, %v8022_v59 }
 0x7b2   :  { %v1890_v7 = vpop.xlane.xlu0 %1889 }
 0x7b3   :  { %v1912_v15 = vsub.f32 %v9201_v27, %v1890_v7  ;;  %v8391_v27 = vpop.f32.mrf.mxu3 }
 0x7b4   :  { %6151 = vmatmul.msk.f32.vlgmr.msrb.gmra.mxu0 %vm173_vm1, %v8006_v61 }
 0x7b5   :  { %v1940_v16 = vmul.f32 1.442695, %v1912_v15  ;;  %6162 = vmatpush.xpose.msk.msrb.mxu0 %vm173_vm1, %v8316_v58  ;;  %v8436_v15 = vpop.f32.mrf.mxu0 }
 0x7b7   :  { %6607 = vpow2.f32 %v1940_v16 }
 0x7ba   :  { %v4707_v24 = vpop.xlane.xlu0 %4706 }
 0x7bb   :  { %v4753_v40 = vsub.f32 %v8324_v55, %v4707_v24  ;;  %v8400_v55 = vpop.f32.mrf.mxu3 }
 0x7bc   :  { %6157 = vmatmul.msk.f32.vlgmr.msra.gmra.mxu0 %vm173_vm1, %v9203_v5 }
 0x7bd   :  { %v8388_v59 = vpop.eup %6607  ;;  %v4769_v35 = vmul.f32 1.442695, %v4753_v40  ;;  %6168 = vmatpush.xpose.msk.msra.mxu0 %vm173_vm1, %v4568_v46 }
 0x7be   :  { %v1984_v61 = vsel %vm173_vm1, %v8388_v59, 0.0 }
 0x7bf   :  { %6609 = vpow2.f32 %v4769_v35  ;;  %1985 = vadd.xlane.f32.xlu1 %v1984_v61 }
 0x7c2   :  { %v4716_v17 = vpop.xlane.xlu0 %4715 }
 0x7c3   :  { %v8405_v9 = vpop.f32.mrf.mxu3  ;;  %v4756_v19 = vsub.f32 %v8333_v1, %v4716_v17  ;;  %v8440_v1 = vpop.f32.mrf.mxu0 }
 0x7c4   :  { %6163 = vmatmul.msk.f32.vlgmr.msrb.gmra.mxu0 %vm173_vm1, %v8322_v3 }
 0x7c5   :  { %v8397_v58 = vpop.eup %6609  ;;  %6174 = vmatpush.xpose.msk.msrb.mxu0 %vm173_vm1, %v4652_v63  ;;  %v4775_v24 = vmul.f32 1.442695, %v4756_v19 }
 0x7c6   :  { %v4801_v26 = vsel %vm173_vm1, %v8397_v58, 0.0 }
 0x7c7   :  { %4802 = vadd.xlane.f32.xlu0 %v4801_v26 }
 0x7cb   :  { %v8407_v3 = vpop.f32.mrf.mxu3  ;;  %v8434_v34 = vpop.f32.mrf.mxu2 }
 0x7cc   :  { %6169 = vmatmul.msk.f32.vlgmr.msra.gmra.mxu0 %vm173_vm1, %v4566_v45  ;;  %v4732_v40 = vsel %vm173_vm1, %v8434_v34, -inf  ;;  %v8450_v45 = vpop.f32.mrf.mxu0 }
 0x7d3   :  { %v8412_v29 = vpop.f32.mrf.mxu3 }
 0x7d4   :  { %v8452_v17 = vpop.f32.mrf.mxu0 }
 0x7d5   :  { %v6388_v57 = vpop.permute.xlu0 %6387 }
 0x7d6   :  { %v6390_v22 = vunpack.i.h.bf16 %v6388_v57  ;;  %v6389_v50 = vunpack.i.l.bf16 %v6388_v57 }
 0x7d8   :  { %6392 = vrot.lane.b32.xlu1 %v9204_v14, %s6692_s17  ;;  %5110 = vmatpush.msrb.mxu3 %v6389_v50 }
 0x7d9   :  { %5136 = vmatpush.msra.mxu0 %v6390_v22  ;;  %v1878_v0 = vpop.xlane.xlu2 %1877 }
 0x7da   :  { %v1962_v37 = vpop.xlane.xlu1 %1961  ;;  %v1908_v28 = vsub.f32 %v9202_v18, %v1878_v0 }
 0x7db   :  { %6611 = vrcp.f32 %v1962_v37  ;;  %v2063_v41 = vand.u32 2147483648, %v1962_v37  ;;  %v2061_v18 = vand.u32 2147483647, %v1962_v37  ;;  %vm2057_vm15 = vweird.f32 %v1962_v37 }
 0x7dc   :  { %v1932_v47 = vmul.f32 1.442695, %v1908_v28  ;;  %v8454_v57 = vpop.f32.mrf.mxu0 }
 0x7dd   :  { %v2064_v36 = vor.u32 1.1754944e-38, %v2063_v41  ;;  %vm2062_vm3 = vcmp.eq.f32.partialorder %v2061_v18, 8.507059e+37 }
 0x7de   :  { %6613 = vpow2.f32 %v1932_v47 }
 0x7df   :  { %6615 = vpow2.f32 %v4775_v24 }
 0x7e1   :  { %v6612_v63 = vpop.eup %6611  ;;  %v4650_v44 = vpop.permute.xlu2 %4649 }
 0x7e2   :  { %v2053_v54 = vmul.f32 %v6612_v63, %v1962_v37  ;;  %6175 = vmatmul.msk.f32.vlgmr.msrb.gmra.mxu0 %vm173_vm1, %v4650_v44  ;;  %vm2058_vm14 = vweird.f32 %v6612_v63 }
 0x7e3   :  { %vm2059_vm2 = vmor %vm2057_vm15, %vm2058_vm14 }
 0x7e4   :  { %v8415_v39 = vpop.eup %6613  ;;  %v2054_v53 = vsub.f32 1.0, %v2053_v54  ;;  %v8456_v22 = vpop.f32.mrf.mxu0 }
 0x7e5   :  { %v1972_v62 = vsel %vm173_vm1, %v8415_v39, 0.0  ;;  %v8444_v35 = vpop.eup %6615 }
 0x7e6   :  { %v2055_v13 = vmul.f32 %v6612_v63, %v2054_v53  ;;  %1973 = vadd.xlane.f32.xlu2 %v1972_v62  ;;  %v4810_v26 = vsel %vm173_vm1, %v8444_v35, 0.0 }
 0x7e8   :  { %v2056_v46 = vadd.f32 %v6612_v63, %v2055_v13  ;;  %v8419_v51 = vpop.f32.mrf.mxu3 }
 0x7ea   :  { %v2060_v23 = vsel %vm2059_vm2, %v6612_v63, %v2056_v46 }
 0x7eb   :  { %v2065_v25 = vsel %vm2062_vm3, %v2064_v36, %v2060_v23 }
 0x7ec   :  { %v2224_v11 = vmul.f32 %v8341_v30, %v2065_v25 }
 0x7ee   :  { %6038 = vmatmul.msk.f32.vlgmr.msrb.gmra.mxu1 %vm173_vm1, %v2224_v11  ;;  %4724 = vmax.xlane.f32.xlu2 %v4723_v8 }
 0x7f0   :  { %v8430_v10 = vpop.f32.mrf.mxu3 }
 0x7f1   :  { %v4708_v48 = vsel %vm173_vm1, %v8430_v10, -inf }
 0x7f2   :  { %v6383_v7 = vpop.permute.xlu1 %6382  ;;  %4709 = vmax.xlane.f32.xlu0 %v4708_v48 }
 0x7f3   :  { %v6385_v30 = vunpack.i.h.bf16 %v6383_v7  ;;  %v6384_v16 = vunpack.i.l.bf16 %v6383_v7 }
 0x7f5   :  { %2465 = vmatpush.msra.mxu1 %v6384_v16 }
 0x7f6   :  { %4733 = vmax.xlane.f32.xlu2 %v4732_v40 }
 0x7f7   :  { %2569 = vmatpush.msrb.mxu1 %v6385_v30 }
 0x7f8   :  { %v8458_v50 = vpop.f32.mrf.mxu3 }
 0x7f9   :  { %v4717_v54 = vsel %vm173_vm1, %v8458_v50, -inf }
 0x7fd   :  { %v8442_v5 = vpop.f32.mrf.mxu2 }
 0x7fe   :  { %v4741_v61 = vsel %vm173_vm1, %v8442_v5, -inf }
 0x7ff   :  { %4742 = vmax.xlane.f32.xlu2 %v4741_v61 }
 0x800   :  { %v8466_v28 = vpop.f32.mrf.mxu3 }
 0x801   :  { %v4726_v36 = vsel %vm173_vm1, %v8466_v28, -inf }
 0x802   :  { %4811 = vadd.xlane.f32.xlu1 %v4810_v26 }
 0x808   :  { %v8474_v53 = vpop.f32.mrf.mxu3 }
 0x810   :  { %v8484_v19 = vpop.f32.mrf.mxu3 }
 0x811   :  { %v4744_v61 = vsel %vm173_vm1, %v8484_v19, -inf }
 0x829   :  { %v8460_v14 = vpop.f32.mrf.mxu0 }
 0x831   :  { %v8462_v0 = vpop.f32.mrf.mxu0 }
 0x832   :  { %v4711_v37 = vsel %vm173_vm1, %v8462_v0, -inf  ;;  %v8478_v13 = vpop.xlane.xlu1 %1985 }
 0x833   :  { %4712 = vmax.xlane.f32.xlu2 %v4711_v37  ;;  %vm2169_vm13 = vweird.f32 %v8478_v13 }
 0x839   :  { %v8468_v47 = vpop.f32.mrf.mxu0 }
 0x83a   :  { %v4803_v63 = vpop.xlane.xlu0 %4802  ;;  %v4720_v44 = vsel %vm173_vm1, %v8468_v47, -inf }
 0x83b   :  { %6617 = vrcp.f32 %v4803_v63  ;;  %4721 = vmax.xlane.f32.xlu0 %v4720_v44  ;;  %4718 = vmax.xlane.f32.xlu2 %v4717_v54  ;;  %v4860_v25 = vand.u32 2147483648, %v4803_v63  ;;  %v4858_v8 = vand.u32 2147483647, %v4803_v63  ;;  %vm4854_vm5 = vweird.f32 %v4803_v63  ;;  %v8494_v54 = vpop.f32.mrf.mxu2 }
 0x83c   :  { %6619 = vrcp.f32 %v8478_v13 }
 0x83d   :  { %v4861_v7 = vor.u32 1.1754944e-38, %v4860_v25  ;;  %vm4859_vm7 = vcmp.eq.f32.partialorder %v4858_v8, 8.507059e+37 }
 0x841   :  { %v6618_v41 = vpop.eup %6617  ;;  %v8476_v62 = vpop.f32.mrf.mxu0 }
 0x842   :  { %v4850_v18 = vmul.f32 %v6618_v41, %v4803_v63  ;;  %v4729_v46 = vsel %vm173_vm1, %v8476_v62, -inf  ;;  %vm4855_vm4 = vweird.f32 %v6618_v41 }
 0x843   :  { %4730 = vmax.xlane.f32.xlu0 %v4729_v46  ;;  %4727 = vmax.xlane.f32.xlu2 %v4726_v36  ;;  %vm4856_vm6 = vmor %vm4854_vm5, %vm4855_vm4  ;;  %v6620_v36 = vpop.eup %6619 }
 0x844   :  { %v4851_v23 = vsub.f32 1.0, %v4850_v18  ;;  %v4750_v18 = vsel %vm173_vm1, %v8494_v54, -inf  ;;  %vm2170_vm11 = vweird.f32 %v6620_v36 }
 0x845   :  { %vm2171_vm14 = vmor %vm2169_vm13, %vm2170_vm11 }
 0x846   :  { %v4852_v11 = vmul.f32 %v6618_v41, %v4851_v23 }
 0x848   :  { %v4853_v48 = vadd.f32 %v6618_v41, %v4852_v11 }
 0x849   :  { %v8486_v30 = vpop.f32.mrf.mxu0 }
 0x84a   :  { %v4857_v16 = vsel %vm4856_vm6, %v6618_v41, %v4853_v48  ;;  %v6393_v24 = vpop.permute.xlu1 %6392  ;;  %v4738_v40 = vsel %vm173_vm1, %v8486_v30, -inf  ;;  %v4735_v41 = vsel %vm173_vm1, %v8474_v53, -inf }
 0x84b   :  { %v4862_v26 = vsel %vm4859_vm7, %v4861_v7, %v4857_v16  ;;  %v6395_v37 = vunpack.i.h.bf16 %v6393_v24  ;;  %v6394_v44 = vunpack.i.l.bf16 %v6393_v24  ;;  %4739 = vmax.xlane.f32.xlu2 %v4738_v40  ;;  %4745 = vmax.xlane.f32.xlu0 %v4744_v61 }
 0x84c   :  { %v5073_v63 = vmul.f32 %v8397_v58, %v4862_v26  ;;  %v2165_v58 = vmul.f32 %v6620_v36, %v8478_v13 }
 0x84d   :  { %5162 = vmatpush.msra.mxu2 %v6394_v44  ;;  %5188 = vmatpush.msra.mxu3 %v6395_v37 }
 0x84e   :  { %6178 = vmatmul.msk.f32.vlgmr.msrb.gmra.mxu3 %vm173_vm1, %v5073_v63  ;;  %v2166_v25 = vsub.f32 1.0, %v2165_v58 }
 0x850   :  { %v2167_v40 = vmul.f32 %v6620_v36, %v2166_v25 }
 0x852   :  { %v2168_v58 = vadd.f32 %v6620_v36, %v2167_v40 }
 0x853   :  { %4736 = vmax.xlane.f32.xlu2 %v4735_v41  ;;  %4751 = vmax.xlane.f32.xlu0 %v4750_v18 }
 0x859   :  { %v1974_v46 = vpop.xlane.xlu2 %1973 }
 0x85a   :  { %6621 = vrcp.f32 %v1974_v46  ;;  %v2119_v16 = vand.u32 2147483648, %v1974_v46  ;;  %v2117_v26 = vand.u32 2147483647, %v1974_v46  ;;  %vm2113_vm9 = vweird.f32 %v1974_v46 }
 0x85c   :  { %v2120_v41 = vor.u32 1.1754944e-38, %v2119_v16  ;;  %vm2118_vm12 = vcmp.eq.f32.partialorder %v2117_v26, 8.507059e+37  ;;  %v2172_v16 = vsel %vm2171_vm14, %v6620_v36, %v2168_v58 }
 0x860   :  { %v6622_v23 = vpop.eup %6621 }
 0x861   :  { %v2109_v11 = vmul.f32 %v6622_v23, %v1974_v46  ;;  %v4725_v8 = vpop.xlane.xlu2 %4724  ;;  %vm2114_vm8 = vweird.f32 %v6622_v23 }
 0x862   :  { %v4759_v48 = vsub.f32 %v8423_v32, %v4725_v8  ;;  %vm2115_vm10 = vmor %vm2113_vm9, %vm2114_vm8 }
 0x863   :  { %v2110_v7 = vsub.f32 1.0, %v2109_v11  ;;  %v2175_v11 = vand.u32 2147483648, %v8478_v13 }
 0x864   :  { %v4781_v24 = vmul.f32 1.442695, %v4759_v48  ;;  %v2652_v48 = vld [vmem:[%s9034_s3 + $0x8] sm:$0xff] }
 0x865   :  { %v2111_v61 = vmul.f32 %v6622_v23, %v2110_v7  ;;  %v4710_v37 = vpop.xlane.xlu0 %4709 }
 0x866   :  { %6623 = vpow2.f32 %v4781_v24  ;;  %v4754_v44 = vsub.f32 %v8430_v10, %v4710_v37  ;;  %v2173_v10 = vand.u32 2147483647, %v8478_v13  ;;  %v6681_v37 = vld [vmem:[%s9034_s3] sm:$0xff] }
 0x867   :  { %v2112_v63 = vadd.f32 %v6622_v23, %v2111_v61 }
 0x868   :  { %v4771_v18 = vmul.f32 1.442695, %v4754_v44  ;;  %vm2174_vm15 = vcmp.eq.f32.partialorder %v2173_v10, 8.507059e+37  ;;  %v9205_v10 = vld [vmem:[#allocation34_spill] sm:$0xff] }
 0x869   :  { %v2116_v6 = vsel %vm2115_vm10, %v6622_v23, %v2112_v63  ;;  %v4734_v32 = vpop.xlane.xlu2 %4733  ;;  %v2259_v63 = vpop.f32.mrf.mxu1 }
 0x86a   :  { %v2121_v25 = vsel %vm2118_vm12, %v2120_v41, %v2116_v6  ;;  %6625 = vpow2.f32 %v4771_v18  ;;  %v4762_v8 = vsub.f32 %v8434_v34, %v4734_v32  ;;  %v2176_v34 = vor.u32 1.1754944e-38, %v2175_v11 }
 0x86b   :  { %v2228_v46 = vmul.f32 %v8415_v39, %v2121_v25 }
 0x86c   :  { %v8512_v7 = vpop.eup %6623  ;;  %v4787_v23 = vmul.f32 1.442695, %v4762_v8  ;;  %v2177_v13 = vsel %vm2174_vm15, %v2176_v34, %v2172_v16  ;;  %v9207_v16 = vld [vmem:[#allocation38_spill] sm:$0xff] }
 0x86d   :  { %6042 = vmatmul.msk.f32.vlgmr.msra.gmra.mxu1 %vm173_vm1, %v2228_v46  ;;  %v4819_v6 = vsel %vm173_vm1, %v8512_v7, 0.0  ;;  %v2232_v40 = vmul.f32 %v8388_v59, %v2177_v13 }
 0x86e   :  { %6627 = vpow2.f32 %v4787_v23  ;;  %4820 = vadd.xlane.f32.xlu1 %v4819_v6  ;;  %2716 = vmatpush.msra.mxu1 %v2652_v48  ;;  %v9206_v23 = vld [vmem:[#allocation32_spill] sm:$0xff]  ;;  %v9208_v6 = vld [vmem:[#allocation35_spill] sm:$0xff] }
 0x870   :  { %v8517_v39 = vpop.eup %6625 }
 0x871   :  { %v4804_v24 = vsel %vm173_vm1, %v8517_v39, 0.0  ;;  %v2363_v34 = vpop.f32.mrf.mxu1 }
 0x872   :  { %4805 = vadd.xlane.f32.xlu2 %v4804_v24  ;;  %v4743_v13 = vpop.xlane.xlu2 %4742  ;;  %v9209_v24 = vld [vmem:[#allocation42_spill] sm:$0xff] }
 0x874   :  { %v8522_v36 = vpop.eup %6627 }
 0x875   :  { %v4812_v61 = vpop.xlane.xlu1 %4811  ;;  %6046 = vmatmul.msk.f32.vlgmr.msrb.gmra.mxu1 %vm173_vm1, %v2232_v40  ;;  %v4828_v26 = vsel %vm173_vm1, %v8522_v36, 0.0 }
 0x876   :  { %6629 = vrcp.f32 %v4812_v61  ;;  %4829 = vadd.xlane.f32.xlu0 %v4828_v26  ;;  %2829 = vmatpush.msrb.mxu1 %v6681_v37  ;;  %v4902_v18 = vand.u32 2147483648, %v4812_v61  ;;  %v4900_v32 = vand.u32 2147483647, %v4812_v61  ;;  %vm4896_vm3 = vweird.f32 %v4812_v61  ;;  %v9210_v26 = vld [vmem:[#allocation41_spill] sm:$0xff] }
 0x878   :  { %v4903_v25 = vor.u32 1.1754944e-38, %v4902_v18  ;;  %vm4901_vm5 = vcmp.eq.f32.partialorder %v4900_v32, 8.507059e+37 }
 0x87c   :  { %v6630_v44 = vpop.eup %6629 }
 0x87d   :  { %v4892_v41 = vmul.f32 %v6630_v44, %v4812_v61  ;;  %6050 = vmatmul.msk.f32.vlgmr.msra.gmra.mxu1 %vm173_vm1, %v2259_v63  ;;  %vm4897_vm2 = vweird.f32 %v6630_v44  ;;  %v8547_v63 = vpop.f32.mrf.mxu0 }
 0x87e   :  { %vm4898_vm4 = vmor %vm4896_vm3, %vm4897_vm2 }
 0x87f   :  { %v4893_v59 = vsub.f32 1.0, %v4892_v41 }
 0x881   :  { %v4894_v58 = vmul.f32 %v6630_v44, %v4893_v59 }
 0x883   :  { %v4895_v11 = vadd.f32 %v6630_v44, %v4894_v58  ;;  %v4765_v58 = vsub.f32 %v8442_v5, %v4743_v13 }
 0x885   :  { %v4899_v8 = vsel %vm4898_vm4, %v6630_v44, %v4895_v11  ;;  %6051 = vmatmul.msk.f32.gmra.mxu1 %vm173_vm1, %v9205_v10 }
 0x886   :  { %v4904_v46 = vsel %vm4901_vm5, %v4903_v25, %v4899_v8  ;;  %v4747_v25 = vsel %vm173_vm1, %v8547_v63, -inf  ;;  %v4793_v8 = vmul.f32 1.442695, %v4765_v58 }
 0x887   :  { %v5076_v48 = vmul.f32 %v8444_v35, %v4904_v46 }
 0x889   :  { %6181 = vmatmul.msk.f32.vlgmr.msra.gmra.mxu3 %vm173_vm1, %v5076_v48 }
 0x88a   :  { %6397 = vrot.lane.b32.xlu2 %v9206_v23, %s6692_s17 }
 0x88d   :  { %6052 = vmatmul.msk.f32.gmra.mxu1 %vm173_vm1, %v9207_v16 }
 0x895   :  { %6053 = vmatmul.msk.f32.gmra.mxu1 %vm173_vm1, %v9208_v6 }
 0x89d   :  { %6054 = vmatmul.msk.f32.gmra.mxu1 %vm173_vm1, %v2363_v34 }
 0x8a5   :  { %6055 = vmatmul.msk.f32.gmra.mxu1 %vm173_vm1, %v9209_v24 }
 0x8a6   :  { %v4713_v40 = vpop.xlane.xlu2 %4712 }
 0x8a7   :  { %v4755_v35 = vsub.f32 %v8462_v0, %v4713_v40 }
 0x8a9   :  { %v4773_v61 = vmul.f32 1.442695, %v4755_v35 }
 0x8ab   :  { %6631 = vpow2.f32 %v4773_v61 }
 0x8ad   :  { %6056 = vmatmul.msk.f32.gmra.mxu1 %vm173_vm1, %v9210_v26 }
 0x8ae   :  { %v4722_v37 = vpop.xlane.xlu0 %4721  ;;  %v4719_v44 = vpop.xlane.xlu2 %4718 }
 0x8af   :  { %v4758_v41 = vsub.f32 %v8468_v47, %v4722_v37  ;;  %v4757_v59 = vsub.f32 %v8458_v50, %v4719_v44  ;;  %v9211_v47 = vld [vmem:[#allocation36_spill] sm:$0xff] }
 0x8b1   :  { %v8551_v18 = vpop.eup %6631  ;;  %v4779_v32 = vmul.f32 1.442695, %v4758_v41  ;;  %v4777_v11 = vmul.f32 1.442695, %v4757_v59  ;;  %v9212_v59 = vld [vmem:[#allocation40_spill] sm:$0xff] }
 0x8b2   :  { %v4807_v0 = vsel %vm173_vm1, %v8551_v18, 0.0 }
 0x8b3   :  { %6633 = vpow2.f32 %v4779_v32  ;;  %4808 = vadd.xlane.f32.xlu1 %v4807_v0  ;;  %4748 = vmax.xlane.f32.xlu2 %v4747_v25  ;;  %v9213_v32 = vld [vmem:[#allocation43_spill] sm:$0xff] }
 0x8b4   :  { %6635 = vpow2.f32 %v4777_v11  ;;  %v9214_v11 = vld [vmem:[#allocation30_spill] sm:$0xff] }
 0x8b5   :  { %6057 = vmatmul.msk.f32.gmra.mxu1 %vm173_vm1, %v9211_v47  ;;  %6637 = vpow2.f32 %v4793_v8 }
 0x8b6   :  { %v4731_v50 = vpop.xlane.xlu0 %4730  ;;  %v4728_v10 = vpop.xlane.xlu2 %4727 }
 0x8b7   :  { %v4761_v5 = vsub.f32 %v8476_v62, %v4731_v50  ;;  %v4760_v16 = vsub.f32 %v8466_v28, %v4728_v10 }
 0x8b9   :  { %v8561_v46 = vpop.eup %6633  ;;  %v4785_v48 = vmul.f32 1.442695, %v4761_v5  ;;  %v4783_v13 = vmul.f32 1.442695, %v4760_v16 }
 0x8ba   :  { %v8563_v23 = vpop.eup %6635  ;;  %v4816_v6 = vsel %vm173_vm1, %v8561_v46, 0.0 }
 0x8bb   :  { %6639 = vpow2.f32 %v4785_v48  ;;  %4817 = vadd.xlane.f32.xlu2 %v4816_v6  ;;  %v4813_v34 = vsel %vm173_vm1, %v8563_v23, 0.0  ;;  %v8570_v62 = vpop.eup %6637 }
 0x8bc   :  { %4814 = vadd.xlane.f32.xlu0 %v4813_v34  ;;  %6641 = vpow2.f32 %v4783_v13  ;;  %v4837_v28 = vsel %vm173_vm1, %v8570_v62, 0.0 }
 0x8be   :  { %v4740_v24 = vpop.xlane.xlu2 %4739  ;;  %v4746_v50 = vpop.xlane.xlu0 %4745 }
 0x8bf   :  { %v4764_v40 = vsub.f32 %v8486_v30, %v4740_v24 }
 0x8c1   :  { %v8573_v35 = vpop.eup %6639  ;;  %v4791_v61 = vmul.f32 1.442695, %v4764_v40 }
 0x8c2   :  { %v4825_v26 = vsel %vm173_vm1, %v8573_v35, 0.0  ;;  %v8579_v37 = vpop.eup %6641 }
 0x8c3   :  { %6643 = vpow2.f32 %v4791_v61  ;;  %4838 = vadd.xlane.f32.xlu2 %v4837_v28  ;;  %v4822_v41 = vsel %vm173_vm1, %v8579_v37, 0.0  ;;  %v9215_v28 = vld [vmem:[#allocation8_spill] sm:$0xff] }
 0x8c4   :  { %4826 = vadd.xlane.f32.xlu0 %v4825_v26 }
 0x8c6   :  { %v4737_v58 = vpop.xlane.xlu2 %4736 }
 0x8c7   :  { %v4763_v0 = vsub.f32 %v8474_v53, %v4737_v58 }
 0x8c9   :  { %v8581_v44 = vpop.eup %6643  ;;  %v4789_v8 = vmul.f32 1.442695, %v4763_v0  ;;  %v9216_v0 = vld [vmem:[#allocation39_spill] sm:$0xff] }
 0x8ca   :  { %v4834_v30 = vsel %vm173_vm1, %v8581_v44, 0.0 }
 0x8cb   :  { %4835 = vadd.xlane.f32.xlu2 %v4834_v30  ;;  %v4752_v30 = vpop.xlane.xlu0 %4751 }
 0x8cc   :  { %4823 = vadd.xlane.f32.xlu0 %v4822_v41  ;;  %6402 = vrot.lane.b32.xlu1 %v9212_v59, %s6692_s17 }
 0x8e0   :  { %6407 = vrot.lane.b32.xlu0 %v9213_v32, %s6692_s17 }
 0x8e3   :  { %6412 = vrot.lane.b32.xlu2 %v9214_v11, %s6692_s17  ;;  %v4768_v11 = vsub.f32 %v8494_v54, %v4752_v30 }
 0x8e5   :  { %v4806_v25 = vpop.xlane.xlu2 %4805 }
 0x8e6   :  { %6645 = vrcp.f32 %v4806_v25  ;;  %v4874_v13 = vand.u32 2147483648, %v4806_v25  ;;  %v4872_v53 = vand.u32 2147483647, %v4806_v25  ;;  %vm4868_vm7 = vweird.f32 %v4806_v25 }
 0x8e7   :  { %6647 = vpow2.f32 %v4789_v8  ;;  %v4766_v8 = vsub.f32 %v8484_v19, %v4746_v50  ;;  %v9218_v50 = vld [vmem:[#allocation10_spill] sm:$0xff] }
 0x8e8   :  { %v4875_v26 = vor.u32 1.1754944e-38, %v4874_v13  ;;  %vm4873_vm9 = vcmp.eq.f32.partialorder %v4872_v53, 8.507059e+37  ;;  %v6416_v13 = vpack.i.bf16 %v9153_v60, %v6880_v52 }
 0x8ea   :  { %v2467_v47 = vpop.f32.mrf.mxu1 }
 0x8eb   :  { %6058 = vmatmul.msk.f32.gmra.mxu1 %vm173_vm1, %v2467_v47  ;;  %v9217_v47 = vld [vmem:[#allocation3_spill] sm:$0xff] }
 0x8ec   :  { %v6646_v10 = vpop.eup %6645 }
 0x8ed   :  { %v4864_v5 = vmul.f32 %v6646_v10, %v4806_v25  ;;  %v6398_v48 = vpop.permute.xlu2 %6397  ;;  %vm4869_vm6 = vweird.f32 %v6646_v10  ;;  %v8595_v40 = vpop.eup %6647  ;;  %v4799_v25 = vmul.f32 1.442695, %v4768_v11 }
 0x8ee   :  { %v6400_v16 = vunpack.i.h.bf16 %v6398_v48  ;;  %v6399_v6 = vunpack.i.l.bf16 %v6398_v48  ;;  %vm4870_vm8 = vmor %vm4868_vm7, %vm4869_vm6  ;;  %v4831_v59 = vsel %vm173_vm1, %v8595_v40, 0.0 }
 0x8ef   :  { %v4865_v34 = vsub.f32 1.0, %v4864_v5  ;;  %6649 = vpow2.f32 %v4799_v25 }
 0x8f0   :  { %5214 = vmatpush.msrb.mxu0 %v6399_v6  ;;  %5240 = vmatpush.msrb.mxu2 %v6400_v16  ;;  %v9219_v16 = vld [vmem:[#allocation6_spill] sm:$0xff]  ;;  %v8626_v6 = vpop.xlane.xlu1 %4820 }
 0x8f1   :  { %v4866_v24 = vmul.f32 %v6646_v10, %v4865_v34  ;;  %v4127_v34 = vld [vmem:[%s9034_s3 + $0x10] sm:$0xff]  ;;  %vm4938_vm14 = vweird.f32 %v8626_v6 }
 0x8f2   :  { %v2571_v54 = vpop.f32.mrf.mxu1  ;;  %4191 = vmatpush.msra.mxu1 %v4127_v34 }
 0x8f3   :  { %v4867_v61 = vadd.f32 %v6646_v10, %v4866_v24  ;;  %6059 = vmatmul.msk.f32.gmra.mxu1 %vm173_vm1, %v9215_v28 }
 0x8f5   :  { %v4871_v41 = vsel %vm4870_vm8, %v6646_v10, %v4867_v61  ;;  %v4795_v10 = vmul.f32 1.442695, %v4766_v8  ;;  %v8609_v5 = vpop.eup %6649  ;;  %v8639_v61 = vpop.xlane.xlu0 %4829 }
 0x8f6   :  { %v4876_v58 = vsel %vm4873_vm9, %v4875_v26, %v4871_v41  ;;  %4832 = vadd.xlane.f32.xlu1 %v4831_v59  ;;  %v9221_v41 = vld [vmem:[#allocation18_spill] sm:$0xff] }
 0x8f7   :  { %v5074_v32 = vmul.f32 %v8517_v39, %v4876_v58  ;;  %6651 = vpow2.f32 %v4795_v10  ;;  %v4846_v39 = vsel %vm173_vm1, %v8609_v5, 0.0  ;;  %v9222_v10 = vld [vmem:[#allocation16_spill] sm:$0xff] }
 0x8f8   :  { %6653 = vrcp.f32 %v8626_v6 }
 0x8f9   :  { %6179 = vmatmul.msk.f32.vlgmr.msra.gmra.mxu0 %vm173_vm1, %v5074_v32 }
 0x8fb   :  { %6060 = vmatmul.msk.f32.gmra.mxu1 %vm173_vm1, %v9216_v0 }
 0x8fd   :  { %v8614_v48 = vpop.eup %6651 }
 0x8fe   :  { %v4840_v19 = vsel %vm173_vm1, %v8614_v48, 0.0  ;;  %v8636_v24 = vpop.eup %6653 }
 0x8ff   :  { %v4934_v28 = vmul.f32 %v8636_v24, %v8626_v6  ;;  %vm4939_vm11 = vweird.f32 %v8636_v24 }
 0x900   :  { %vm8659_vm2 = vmor %vm4938_vm14, %vm4939_vm11  ;;  %vm4980_vm14 = vweird.f32 %v8639_v61 }
 0x901   :  { %v4935_v59 = vsub.f32 1.0, %v4934_v28 }
 0x903   :  { %6061 = vmatmul.msk.f32.gmra.mxu1 %vm173_vm1, %v9217_v47  ;;  %v4936_v11 = vmul.f32 %v8636_v24, %v4935_v59 }
 0x90a   :  { %4847 = vadd.xlane.f32.xlu0 %v4846_v39 }
 0x90b   :  { %6062 = vmatmul.msk.f32.gmra.mxu1 %vm173_vm1, %v2571_v54  ;;  %v4937_v54 = vadd.f32 %v8636_v24, %v4936_v11 }
 0x90d   :  { %v4941_v59 = vsel %vm8659_vm2, %v8636_v24, %v4937_v54 }
 0x90f   :  { %5401 = vrot.lane.b32.xlu1 %v9162_v33, %s6692_s17  ;;  %v9220_v33 = vld [vmem:[#allocation37_spill] sm:$0xff] }
 0x912   :  { %4841 = vadd.xlane.f32.xlu0 %v4840_v19 }
 0x913   :  { %6063 = vmatmul.msk.f32.gmra.mxu1 %vm173_vm1, %v9218_v50 }
 0x917   :  { %5479 = vrot.lane.b32.xlu1 %v9154_v43, %s6692_s17 }
 0x91b   :  { %6064 = vmatmul.msk.f32.gmra.mxu1 %vm173_vm1, %v9219_v16 }
 0x923   :  { %6065 = vmatmul.msk.f32.gmra.mxu1 %vm173_vm1, %v9220_v33 }
 0x926   :  { %6417 = vrot.lane.b32.xlu0 %v6416_v13, %s6692_s17  ;;  %v4809_v43 = vpop.xlane.xlu1 %4808  ;;  %v4749_v53 = vpop.xlane.xlu2 %4748 }
 0x927   :  { %6655 = vrcp.f32 %v4809_v43  ;;  %v4767_v26 = vsub.f32 %v8547_v63, %v4749_v53  ;;  %v4888_v25 = vand.u32 2147483648, %v4809_v43  ;;  %v4886_v63 = vand.u32 2147483647, %v4809_v43 }
 0x928   :  { %vm4882_vm12 = vweird.f32 %v4809_v43 }
 0x929   :  { %v4797_v30 = vmul.f32 1.442695, %v4767_v26  ;;  %v4889_v16 = vor.u32 1.1754944e-38, %v4888_v25  ;;  %vm4887_vm15 = vcmp.eq.f32.partialorder %v4886_v63, 8.507059e+37  ;;  %v4944_v26 = vand.u32 2147483648, %v8626_v6 }
 0x92b   :  { %6066 = vmatmul.msk.f32.vlgmr.msrb.gmra.mxu1 %vm173_vm1, %v9221_v41  ;;  %6657 = vpow2.f32 %v4797_v30 }
 0x92d   :  { %v6656_v52 = vpop.eup %6655 }
 0x92e   :  { %v4878_v60 = vmul.f32 %v6656_v52, %v4809_v43  ;;  %v4818_v58 = vpop.xlane.xlu2 %4817  ;;  %vm4883_vm10 = vweird.f32 %v6656_v52 }
 0x92f   :  { %6659 = vrcp.f32 %v4818_v58  ;;  %v4815_v32 = vpop.xlane.xlu0 %4814  ;;  %vm4884_vm13 = vmor %vm4882_vm12, %vm4883_vm10  ;;  %v4928_v25 = vand.u32 2147483647, %v4818_v58  ;;  %vm4924_vm6 = vweird.f32 %v4818_v58 }
 0x930   :  { %v4879_v0 = vsub.f32 1.0, %v4878_v60  ;;  %6661 = vrcp.f32 %v4815_v32  ;;  %vm4910_vm8 = vweird.f32 %v4815_v32 }
 0x931   :  { %v8647_v8 = vpop.eup %6657  ;;  %6663 = vrcp.f32 %v8639_v61  ;;  %vm4929_vm9 = vcmp.eq.f32.partialorder %v4928_v25, 8.507059e+37 }
 0x932   :  { %v4880_v47 = vmul.f32 %v6656_v52, %v4879_v0  ;;  %v4843_v39 = vsel %vm173_vm1, %v8647_v8, 0.0 }
 0x933   :  { %6067 = vmatmul.msk.f32.gmra.mxu1 %vm173_vm1, %v9222_v10  ;;  %4844 = vadd.xlane.f32.xlu2 %v4843_v39  ;;  %v4914_v39 = vand.u32 2147483647, %v4815_v32 }
 0x934   :  { %v4881_v19 = vadd.f32 %v6656_v52, %v4880_v47  ;;  %v4930_v47 = vand.u32 2147483648, %v4818_v58 }
 0x935   :  { %v6660_v50 = vpop.eup %6659  ;;  %vm4915_vm11 = vcmp.eq.f32.partialorder %v4914_v39, 8.507059e+37 }
 0x936   :  { %v6662_v34 = vpop.eup %6661  ;;  %v4885_v33 = vsel %vm4884_vm13, %v6656_v52, %v4881_v19  ;;  %v4920_v13 = vmul.f32 %v6660_v50, %v4818_v58  ;;  %v8657_v53 = vpop.xlane.xlu2 %4838  ;;  %v4942_v52 = vand.u32 2147483647, %v8626_v6  ;;  %vm4925_vm3 = vweird.f32 %v6660_v50 }
 0x937   :  { %v4890_v30 = vsel %vm4887_vm15, %v4889_v16, %v4885_v33  ;;  %v4906_v43 = vmul.f32 %v6662_v34, %v4815_v32  ;;  %v8664_v41 = vpop.xlane.xlu0 %4826  ;;  %v8671_v0 = vpop.eup %6663  ;;  %v4916_v19 = vand.u32 2147483648, %v4815_v32  ;;  %v4945_v16 = vor.u32 1.1754944e-38, %v4944_v26  ;;  %vm4926_vm7 = vmor %vm4924_vm6, %vm4925_vm3 }
 0x938   :  { %v5075_v60 = vmul.f32 %v8551_v18, %v4890_v30  ;;  %v4921_v11 = vsub.f32 1.0, %v4920_v13  ;;  %6665 = vrcp.f32 %v8664_v41  ;;  %vm4911_vm4 = vweird.f32 %v6662_v34 }
 0x939   :  { %v4907_v63 = vsub.f32 1.0, %v4906_v43  ;;  %vm4943_vm5 = vcmp.eq.f32.partialorder %v4942_v52, 8.507059e+37  ;;  %v4976_v18 = vmul.f32 %v8671_v0, %v8639_v61  ;;  %v4931_v33 = vor.u32 1.1754944e-38, %v4930_v47  ;;  %vm4912_vm10 = vmor %vm4910_vm8, %vm4911_vm4 }
 0x93a   :  { %v4922_v10 = vmul.f32 %v6660_v50, %v4921_v11  ;;  %6180 = vmatmul.msk.f32.vlgmr.msra.gmra.mxu2 %vm173_vm1, %v5075_v60  ;;  %v4946_v54 = vsel %vm4943_vm5, %v4945_v16, %v4941_v59  ;;  %v4917_v26 = vor.u32 1.1754944e-38, %v4916_v19  ;;  %vm4981_vm12 = vweird.f32 %v8671_v0 }
 0x93b   :  { %v4908_v24 = vmul.f32 %v6662_v34, %v4907_v63  ;;  %6130 = vmatmul.msk.f32.vlgmr.msra.gmra.mxu1 %vm173_vm1, %v8372_v31  ;;  %v5079_v58 = vmul.f32 %v8512_v7, %v4946_v54  ;;  %v4977_v25 = vsub.f32 1.0, %v4976_v18  ;;  %vm8706_vm15 = vmor %vm4980_vm14, %vm4981_vm12  ;;  %vm4966_vm2 = vweird.f32 %v8664_v41 }
 0x93c   :  { %v4923_v6 = vadd.f32 %v6660_v50, %v4922_v10 }
 0x93d   :  { %v4909_v13 = vadd.f32 %v6662_v34, %v4908_v24  ;;  %v4978_v7 = vmul.f32 %v8671_v0, %v4977_v25 }
 0x93e   :  { %v4927_v28 = vsel %vm4926_vm7, %v6660_v50, %v4923_v6  ;;  %v6403_v30 = vpop.permute.xlu1 %6402  ;;  %v8679_v43 = vpop.xlane.xlu2 %4835 }
 0x93f   :  { %v6666_v31 = vpop.eup %6665  ;;  %v4932_v52 = vsel %vm4929_vm9, %v4931_v33, %v4927_v28  ;;  %v4913_v60 = vsel %vm4912_vm10, %v6662_v34, %v4909_v13  ;;  %v6405_v11 = vunpack.i.h.bf16 %v6403_v30  ;;  %v6404_v63 = vunpack.i.l.bf16 %v6403_v30  ;;  %v4824_v50 = vpop.xlane.xlu0 %4823 }
 0x940   :  { %v5078_v59 = vmul.f32 %v8561_v46, %v4932_v52  ;;  %v4918_v47 = vsel %vm4915_vm11, %v4917_v26, %v4913_v60  ;;  %v4962_v32 = vmul.f32 %v6666_v31, %v8664_v41  ;;  %6667 = vrcp.f32 %v8679_v43 }
 0x941   :  { %v5077_v10 = vmul.f32 %v8563_v23, %v4918_v47  ;;  %5266 = vmatpush.msrb.mxu3 %v6404_v63  ;;  %5292 = vmatpush.msra.mxu0 %v6405_v11  ;;  %6669 = vrcp.f32 %v4824_v50  ;;  %v4979_v18 = vadd.f32 %v8671_v0, %v4978_v7  ;;  %vm4967_vm13 = vweird.f32 %v6666_v31 }
 0x942   :  { %v4963_v39 = vsub.f32 1.0, %v4962_v32  ;;  %6183 = vmatmul.msk.f32.vlgmr.msrb.gmra.mxu2 %vm173_vm1, %v5078_v59  ;;  %6184 = vmatmul.msk.f32.vlgmr.msrb.gmra.mxu3 %vm173_vm1, %v5079_v58  ;;  %v4986_v33 = vand.u32 2147483648, %v8639_v61  ;;  %v4972_v13 = vand.u32 2147483648, %v8664_v41  ;;  %v4984_v26 = vand.u32 2147483647, %v8639_v61  ;;  %vm4968_vm3 = vmor %vm4966_vm2, %vm4967_vm13 }
 0x943   :  { %6182 = vmatmul.msk.f32.vlgmr.msrb.gmra.mxu0 %vm173_vm1, %v5077_v10  ;;  %6131 = vmatmul.msk.f32.gmra.mxu1 %vm173_vm1, %v8421_v38  ;;  %v4970_v30 = vand.u32 2147483647, %v8664_v41  ;;  %v4983_v60 = vsel %vm8706_vm15, %v8671_v0, %v4979_v18  ;;  %v4956_v11 = vand.u32 2147483647, %v4824_v50  ;;  %v4958_v63 = vand.u32 2147483648, %v4824_v50 }
 0x944   :  { %v4964_v46 = vmul.f32 %v6666_v31, %v4963_v39  ;;  %v4987_v47 = vor.u32 1.1754944e-38, %v4986_v33  ;;  %v4973_v32 = vor.u32 1.1754944e-38, %v4972_v13  ;;  %vm4985_vm5 = vcmp.eq.f32.partialorder %v4984_v26, 8.507059e+37 }
 0x945   :  { %vm4971_vm6 = vcmp.eq.f32.partialorder %v4970_v30, 8.507059e+37  ;;  %vm4952_vm7 = vweird.f32 %v4824_v50  ;;  %v4959_v10 = vor.u32 1.1754944e-38, %v4958_v63  ;;  %vm4957_vm10 = vcmp.eq.f32.partialorder %v4956_v11, 8.507059e+37 }
 0x946   :  { %v8692_v34 = vpop.permute.xlu2 %6412  ;;  %v8694_v23 = vpop.eup %6667  ;;  %v4965_v6 = vadd.f32 %v6666_v31, %v4964_v46  ;;  %v4988_v41 = vsel %vm4985_vm5, %v4987_v47, %v4983_v60  ;;  %v5014_v7 = vand.u32 2147483648, %v8679_v43  ;;  %vm5008_vm11 = vweird.f32 %v8679_v43 }
 0x947   :  { %v6414_v19 = vunpack.i.l.bf16 %v8692_v34  ;;  %v5004_v16 = vmul.f32 %v8694_v23, %v8679_v43  ;;  %v6670_v24 = vpop.eup %6669  ;;  %vm5009_vm9 = vweird.f32 %v8694_v23  ;;  %v5012_v18 = vand.u32 2147483647, %v8679_v43 }
 0x948   :  { %v4948_v54 = vmul.f32 %v6670_v24, %v4824_v50  ;;  %v4969_v58 = vsel %vm4968_vm3, %v6666_v31, %v4965_v6  ;;  %vm4953_vm4 = vweird.f32 %v6670_v24  ;;  %vm5010_vm12 = vmor %vm5008_vm11, %vm5009_vm9  ;;  %6671 = vrcp.f32 %v8657_v53 }
 0x949   :  { %5370 = vmatpush.msrb.mxu0 %v6414_v19  ;;  %v5005_v38 = vsub.f32 1.0, %v5004_v16  ;;  %v4974_v25 = vsel %vm4971_vm6, %v4973_v32, %v4969_v58  ;;  %vm4954_vm8 = vmor %vm4952_vm7, %vm4953_vm4  ;;  %vm5013_vm13 = vcmp.eq.f32.partialorder %v5012_v18, 8.507059e+37  ;;  %vm5022_vm4 = vweird.f32 %v8657_v53 }
 0x94a   :  { %v4949_v52 = vsub.f32 1.0, %v4948_v54  ;;  %v5081_v50 = vmul.f32 %v8573_v35, %v4974_v25 }
 0x94b   :  { %6132 = vmatmul.msk.f32.gmra.mxu1 %vm173_vm1, %v8379_v4  ;;  %v5006_v4 = vmul.f32 %v8694_v23, %v5005_v38  ;;  %v6415_v38 = vunpack.i.h.bf16 %v8692_v34 }
 0x94c   :  { %v4950_v59 = vmul.f32 %v6670_v24, %v4949_v52 }
 0x94d   :  { %v5007_v0 = vadd.f32 %v8694_v23, %v5006_v4  ;;  %v5026_v4 = vand.u32 2147483647, %v8657_v53 }
 0x94e   :  { %v4951_v61 = vadd.f32 %v6670_v24, %v4950_v59  ;;  %v6672_v34 = vpop.eup %6671 }
 0x94f   :  { %v5011_v54 = vsel %vm5010_vm12, %v8694_v23, %v5007_v0  ;;  %v5018_v33 = vmul.f32 %v6672_v34, %v8657_v53  ;;  %vm5023_vm15 = vweird.f32 %v6672_v34  ;;  %vm5027_vm7 = vcmp.eq.f32.partialorder %v5026_v4, 8.507059e+37 }
 0x950   :  { %v4955_v39 = vsel %vm4954_vm8, %v6670_v24, %v4951_v61  ;;  %v5082_v24 = vmul.f32 %v8522_v36, %v4988_v41  ;;  %v8734_v36 = vpop.f32.mrf.mxu1  ;;  %vm5024_vm6 = vmor %vm5022_vm4, %vm5023_vm15 }
 0x951   :  { %v4960_v46 = vsel %vm4957_vm10, %v4959_v10, %v4955_v39 }
 0x952   :  { %v6408_v31 = vpop.permute.xlu0 %6407  ;;  %v5080_v6 = vmul.f32 %v8579_v37, %v4960_v46 }
 0x953   :  { %v6410_v19 = vunpack.i.h.bf16 %v6408_v31  ;;  %v6409_v16 = vunpack.i.l.bf16 %v6408_v31  ;;  %6133 = vmatmul.msk.f32.gmra.mxu1 %vm173_vm1, %v8436_v15  ;;  %v5015_v15 = vor.u32 1.1754944e-38, %v5014_v7 }
 0x954   :  { %6185 = vmatmul.msk.f32.vlgmr.msra.gmra.mxu0 %vm173_vm1, %v5080_v6 }
 0x955   :  { %5318 = vmatpush.msra.mxu2 %v6409_v16  ;;  %5344 = vmatpush.msra.mxu3 %v6410_v19  ;;  %v5016_v35 = vsel %vm5013_vm13, %v5015_v15, %v5011_v54 }
 0x956   :  { %6186 = vmatmul.msk.f32.vlgmr.msra.gmra.mxu2 %vm173_vm1, %v5081_v50  ;;  %6187 = vmatmul.msk.f32.vlgmr.msra.gmra.mxu3 %vm173_vm1, %v5082_v24  ;;  %v5084_v37 = vmul.f32 %v8581_v44, %v5016_v35 }
 0x957   :  { %5396 = vmatpush.msrb.mxu2 %v6415_v38 }
 0x958   :  { %v8741_v43 = vpop.f32.mrf.mxu1 }
 0x95b   :  { %6134 = vmatmul.msk.f32.gmra.mxu1 %vm173_vm1, %v8391_v27  ;;  %v5019_v27 = vsub.f32 1.0, %v5018_v33 }
 0x95d   :  { %v5020_v26 = vmul.f32 %v6672_v34, %v5019_v27 }
 0x95e   :  { %6189 = vmatmul.msk.f32.vlgmr.msrb.gmra.mxu2 %vm173_vm1, %v5084_v37 }
 0x95f   :  { %v5021_v11 = vadd.f32 %v6672_v34, %v5020_v26 }
 0x960   :  { %v8746_v44 = vpop.f32.mrf.mxu1 }
 0x961   :  { %v5025_v32 = vsel %vm5024_vm6, %v6672_v34, %v5021_v11 }
 0x963   :  { %6135 = vmatmul.msk.f32.gmra.mxu1 %vm173_vm1, %v8440_v1 }
 0x968   :  { %v8753_v47 = vpop.f32.mrf.mxu1 }
 0x969   :  { %v4833_v23 = vpop.xlane.xlu1 %4832 }
 0x96a   :  { %6673 = vrcp.f32 %v4833_v23  ;;  %v5000_v1 = vand.u32 2147483648, %v4833_v23  ;;  %v4998_v60 = vand.u32 2147483647, %v4833_v23  ;;  %vm4994_vm2 = vweird.f32 %v4833_v23 }
 0x96b   :  { %6136 = vmatmul.msk.f32.gmra.mxu1 %vm173_vm1, %v8400_v55  ;;  %v5028_v55 = vand.u32 2147483648, %v8657_v53 }
 0x96c   :  { %v5001_v58 = vor.u32 1.1754944e-38, %v5000_v1  ;;  %vm4999_vm5 = vcmp.eq.f32.partialorder %v4998_v60, 8.507059e+37  ;;  %v5112_v60 = vpop.f32.mrf.mxu3 }
 0x96d   :  { %v5029_v41 = vor.u32 1.1754944e-38, %v5028_v55 }
 0x96f   :  { %v5030_v10 = vsel %vm5027_vm7, %v5029_v41, %v5025_v32 }
 0x970   :  { %v6674_v13 = vpop.eup %6673  ;;  %v5085_v53 = vmul.f32 %v8570_v62, %v5030_v10  ;;  %v8763_v39 = vpop.f32.mrf.mxu1 }
 0x971   :  { %v4990_v28 = vmul.f32 %v6674_v13, %v4833_v23  ;;  %vm4995_vm14 = vweird.f32 %v6674_v13 }
 0x972   :  { %vm4996_vm3 = vmor %vm4994_vm2, %vm4995_vm14 }
 0x973   :  { %v4991_v30 = vsub.f32 1.0, %v4990_v28  ;;  %6137 = vmatmul.msk.f32.gmra.mxu1 %vm173_vm1, %v8450_v45 }
 0x975   :  { %v4992_v52 = vmul.f32 %v6674_v13, %v4991_v30 }
 0x977   :  { %v4993_v63 = vadd.f32 %v6674_v13, %v4992_v52  ;;  %v5505_v52 = vld [vmem:[%s9034_s3 + $0x18] sm:$0xff] }
 0x978   :  { %v8767_v38 = vpop.f32.mrf.mxu1 }
 0x979   :  { %v4997_v59 = vsel %vm4996_vm3, %v6674_v13, %v4993_v63  ;;  %v5138_v63 = vpop.f32.mrf.mxu0 }
 0x97a   :  { %v5002_v45 = vsel %vm4999_vm5, %v5001_v58, %v4997_v59 }
 0x97b   :  { %v5083_v61 = vmul.f32 %v8595_v40, %v5002_v45  ;;  %6138 = vmatmul.msk.f32.gmra.mxu1 %vm173_vm1, %v8405_v9 }
 0x97d   :  { %v4848_v25 = vpop.xlane.xlu0 %4847  ;;  %6188 = vmatmul.msk.f32.vlgmr.msrb.gmra.mxu0 %vm173_vm1, %v5083_v61 }
 0x97e   :  { %6675 = vrcp.f32 %v4848_v25  ;;  %v5070_v46 = vand.u32 2147483648, %v4848_v25  ;;  %v5068_v16 = vand.u32 2147483647, %v4848_v25  ;;  %vm5064_vm9 = vweird.f32 %v4848_v25 }
 0x980   :  { %v5071_v18 = vor.u32 1.1754944e-38, %v5070_v46  ;;  %vm5069_vm11 = vcmp.eq.f32.partialorder %v5068_v16, 8.507059e+37  ;;  %v8773_v28 = vpop.f32.mrf.mxu1 }
 0x981   :  { %v5402_v0 = vpop.permute.xlu1 %5401 }
 0x982   :  { %5422 = vmatpush.msrb.mxu3 %v5402_v0  ;;  %v5190_v0 = vpop.f32.mrf.mxu3 }
 0x983   :  { %6139 = vmatmul.msk.f32.gmra.mxu1 %vm173_vm1, %v8452_v17  ;;  %6190 = vmatmul.msk.f32.vlgmr.msrb.gmra.mxu3 %vm173_vm1, %v5085_v53 }
 0x984   :  { %v6676_v40 = vpop.eup %6675 }
 0x985   :  { %v5060_v9 = vmul.f32 %v6676_v40, %v4848_v25  ;;  %v4842_v31 = vpop.xlane.xlu0 %4841  ;;  %vm5065_vm8 = vweird.f32 %v6676_v40 }
 0x986   :  { %6677 = vrcp.f32 %v4842_v31  ;;  %vm5066_vm10 = vmor %vm5064_vm9, %vm5065_vm8  ;;  %v5042_v34 = vand.u32 2147483648, %v4842_v31  ;;  %v5040_v23 = vand.u32 2147483647, %v4842_v31  ;;  %vm5036_vm13 = vweird.f32 %v4842_v31 }
 0x987   :  { %v5061_v7 = vsub.f32 1.0, %v5060_v9 }
 0x988   :  { %v5043_v27 = vor.u32 1.1754944e-38, %v5042_v34  ;;  %vm5041_vm15 = vcmp.eq.f32.partialorder %v5040_v23, 8.507059e+37 }
 0x989   :  { %v5062_v19 = vmul.f32 %v6676_v40, %v5061_v7  ;;  %v5480_v50 = vpop.permute.xlu1 %5479 }
 0x98a   :  { %5500 = vmatpush.msra.mxu3 %v5480_v50 }
 0x98b   :  { %v5063_v62 = vadd.f32 %v6676_v40, %v5062_v19  ;;  %6140 = vmatmul.msk.f32.gmra.mxu1 %vm173_vm1, %v8407_v3 }
 0x98c   :  { %v6678_v17 = vpop.eup %6677 }
 0x98d   :  { %v5067_v6 = vsel %vm5066_vm10, %v6676_v40, %v5063_v62  ;;  %v5032_v24 = vmul.f32 %v6678_v17, %v4842_v31  ;;  %vm5037_vm12 = vweird.f32 %v6678_v17 }
 0x98e   :  { %v5072_v54 = vsel %vm5069_vm11, %v5071_v18, %v5067_v6  ;;  %vm5038_vm14 = vmor %vm5036_vm13, %vm5037_vm12 }
 0x98f   :  { %v5088_v15 = vmul.f32 %v8609_v5, %v5072_v54  ;;  %v5033_v35 = vsub.f32 1.0, %v5032_v24  ;;  %v5657_v24 = vld [vmem:[%s9036_s5 + $0x10] sm:$0xff]  ;;  %v5656_v54 = vld [vmem:[%s9036_s5 + $0x8] sm:$0xff] }
 0x991   :  { %v5034_v37 = vmul.f32 %v6678_v17, %v5033_v35  ;;  %6193 = vmatmul.msk.f32.vlgmr.msra.gmra.mxu3 %vm173_vm1, %v5088_v15 }
 0x993   :  { %v5035_v33 = vadd.f32 %v6678_v17, %v5034_v37  ;;  %6141 = vmatmul.msk.f32.gmra.mxu1 %vm173_vm1, %v8454_v57  ;;  %v8782_v57 = vpop.f32.mrf.mxu1  ;;  %v5655_v37 = vld [vmem:[%s9036_s5] sm:$0xff] }
 0x995   :  { %v5039_v3 = vsel %vm5038_vm14, %v6678_v17, %v5035_v33  ;;  %v5658_v17 = vld [vmem:[%s9036_s5 + $0x18] sm:$0xff] }
 0x996   :  { %v5044_v13 = vsel %vm5041_vm15, %v5043_v27, %v5039_v3 }
 0x997   :  { %v5086_v1 = vmul.f32 %v8614_v48, %v5044_v13 }
 0x998   :  { %v6418_v5 = vpop.permute.xlu0 %6417 }
 0x999   :  { %v6420_v26 = vunpack.i.h.bf16 %v6418_v5  ;;  %v6419_v30 = vunpack.i.l.bf16 %v6418_v5  ;;  %v8838_v5 = vld [vmem:[%s9035_s4] ss:$0 sm:$0xff] }
 0x99b   :  { %5448 = vmatpush.msra.mxu0 %v6419_v30  ;;  %5474 = vmatpush.msra.mxu2 %v6420_v26  ;;  %v8787_v11 = vpop.f32.mrf.mxu1 }
 0x99c   :  { %6142 = vmatmul.msk.f32.gmra.mxu1 %vm173_vm1, %v8412_v29  ;;  %6191 = vmatmul.msk.f32.vlgmr.msra.gmra.mxu0 %vm173_vm1, %v5086_v1 }
 0x99d   :  { %5569 = vmatpush.msrb.mxu0 %v5505_v52  ;;  %5723 = vmatpush.msrb.mxu2 %v5658_v17 }
 0x99f   :  { %5724 = vmatpush.msrb.mxu2 %v5657_v24  ;;  %v9230_v24 = vld [vmem:[#allocation5_spill] sm:$0xff] }
 0x9a1   :  { %5725 = vmatpush.msrb.mxu2 %v5656_v54  ;;  %v2847_v54 = vadd.f32 %v9230_v24, %v8767_v38  ;;  %v9232_v38 = vld [vmem:[#allocation19_spill] sm:$0xff] }
 0x9a3   :  { %5726 = vmatpush.msrb.mxu2 %v5655_v37 }
 0x9a4   :  { %6143 = vmatmul.msk.f32.gmra.mxu1 %vm173_vm1, %v8456_v22  ;;  %6194 = vmatmul.msk.f32.vlgmr.msrb.gmra.mxu0 %vm173_vm1, %v5112_v60  ;;  %v8792_v22 = vpop.f32.mrf.mxu1 }
 0x9a6   :  { %v4845_v48 = vpop.xlane.xlu2 %4844 }
 0x9a7   :  { %6679 = vrcp.f32 %v4845_v48  ;;  %v5056_v4 = vand.u32 2147483648, %v4845_v48  ;;  %v5054_v45 = vand.u32 2147483647, %v4845_v48  ;;  %vm5050_vm3 = vweird.f32 %v4845_v48 }
 0x9a9   :  { %v5057_v61 = vor.u32 1.1754944e-38, %v5056_v4  ;;  %vm5055_vm5 = vcmp.eq.f32.partialorder %v5054_v45, 8.507059e+37  ;;  %v9227_v4 = vld [vmem:[#allocation13_spill] sm:$0xff] }
 0x9ac   :  { %6144 = vmatmul.msk.f32.gmra.mxu1 %vm173_vm1, %v8419_v51  ;;  %6195 = vmatmul.msk.f32.gmra.mxu0 %vm173_vm1, %v5138_v63  ;;  %v8799_v53 = vpop.f32.mrf.mxu1 }
 0x9ad   :  { %v6680_v29 = vpop.eup %6679 }
 0x9ae   :  { %v5046_v55 = vmul.f32 %v6680_v29, %v4845_v48  ;;  %vm5051_vm2 = vweird.f32 %v6680_v29 }
 0x9af   :  { %vm5052_vm4 = vmor %vm5050_vm3, %vm5051_vm2 }
 0x9b0   :  { %v5047_v58 = vsub.f32 1.0, %v5046_v55 }
 0x9b2   :  { %v5048_v59 = vmul.f32 %v6680_v29, %v5047_v58 }
 0x9b4   :  { %6145 = vmatmul.msk.f32.gmra.mxu1 %vm173_vm1, %v8460_v14  ;;  %v5049_v32 = vadd.f32 %v6680_v29, %v5048_v59  ;;  %v8802_v14 = vpop.f32.mrf.mxu1  ;;  %v2838_v59 = vadd.f32 %v9227_v4, %v8746_v44 }
 0x9b6   :  { %v5053_v41 = vsel %vm5052_vm4, %v6680_v29, %v5049_v32 }
 0x9b7   :  { %v5058_v51 = vsel %vm5055_vm5, %v5057_v61, %v5053_v41 }
 0x9b8   :  { %v5087_v25 = vmul.f32 %v8647_v8, %v5058_v51  ;;  %v9228_v51 = vld [vmem:[#allocation2_spill] sm:$0xff] }
 0x9ba   :  { %6192 = vmatmul.msk.f32.vlgmr.msra.gmra.mxu2 %vm173_vm1, %v5087_v25  ;;  %v2841_v25 = vadd.f32 %v9228_v51, %v8753_v47 }
 0x9bc   :  { %v8805_v9 = vpop.f32.mrf.mxu1 }
 0x9bd   :  { %v5164_v10 = vpop.f32.mrf.mxu2 }
 0x9be   :  { %6196 = vmatmul.msk.f32.gmra.mxu0 %vm173_vm1, %v5164_v10 }
 0x9c0   :  { %v5216_v40 = vpop.f32.mrf.mxu0 }
 0x9c4   :  { %v8808_v8 = vpop.f32.mrf.mxu1 }
 0x9c5   :  { %v5242_v31 = vpop.f32.mrf.mxu2  ;;  %v5268_v7 = vpop.f32.mrf.mxu3  ;;  %v2871_v24 = vadd.f32 %v8296_v42, %v8808_v8 }
 0x9c6   :  { %6197 = vmatmul.msk.f32.gmra.mxu0 %vm173_vm1, %v5190_v0 }
 0x9cc   :  { %v8812_v19 = vpop.f32.mrf.mxu1 }
 0x9ce   :  { %6198 = vmatmul.msk.f32.gmra.mxu0 %vm173_vm1, %v5216_v40 }
 0x9d1   :  { %v5294_v46 = vpop.f32.mrf.mxu0 }
 0x9d4   :  { %v8815_v50 = vpop.f32.mrf.mxu1 }
 0x9d6   :  { %6199 = vmatmul.msk.f32.gmra.mxu0 %vm173_vm1, %v5242_v31 }
 0x9d9   :  { %v5320_v16 = vpop.f32.mrf.mxu2  ;;  %v5346_v62 = vpop.f32.mrf.mxu3 }
 0x9dc   :  { %v2831_v18 = vpop.f32.mrf.mxu1 }
 0x9dd   :  { %v2832_v27 = vadd.f32 %v2831_v18, %v8734_v36 }
 0x9de   :  { %6200 = vmatmul.msk.f32.gmra.mxu0 %vm173_vm1, %v5268_v7 }
 0x9e1   :  { %v5398_v35 = vpop.f32.mrf.mxu2 }
 0x9e4   :  { %v2834_v15 = vpop.f32.mrf.mxu1 }
 0x9e5   :  { %v2835_v60 = vadd.f32 %v2834_v15, %v8741_v43 }
 0x9e6   :  { %6201 = vmatmul.msk.f32.gmra.mxu0 %vm173_vm1, %v5294_v46  ;;  %v9229_v46 = vld [vmem:[#allocation4_spill] sm:$0xff] }
 0x9ec   :  { %v4193_v23 = vpop.f32.mrf.mxu1 }
 0x9ed   :  { %v4241_v13 = vadd.f32 %v4193_v23, %v2832_v27 }
 0x9ee   :  { %6202 = vmatmul.msk.f32.gmra.mxu0 %vm173_vm1, %v5320_v16  ;;  %v2844_v16 = vadd.f32 %v9229_v46, %v8763_v39  ;;  %v9231_v39 = vld [vmem:[#allocation9_spill] sm:$0xff]  ;;  %v2868_v46 = vadd.f32 %v8280_v56, %v8805_v9 }
 0x9f4   :  { %v4196_v33 = vpop.f32.mrf.mxu1 }
 0x9f5   :  { %v4242_v48 = vadd.f32 %v4196_v33, %v2835_v60  ;;  %v2850_v33 = vadd.f32 %v9231_v39, %v8773_v28  ;;  %v2856_v28 = vadd.f32 %v8212_v20, %v8787_v11  ;;  %v2862_v20 = vadd.f32 %v8248_v12, %v8799_v53  ;;  %v5797_v12 = vld [vmem:[%s9038_s7 + $0x28] sm:$0xff] }
 0x9f6   :  { %6203 = vmatmul.msk.f32.gmra.mxu0 %vm173_vm1, %v5346_v62  ;;  %v2865_v53 = vadd.f32 %v8261_v2, %v8802_v14 }
 0x9fa   :  { %v5372_v6 = vpop.f32.mrf.mxu0 }
 0x9fc   :  { %v4199_v1 = vpop.f32.mrf.mxu1 }
 0x9fd   :  { %v4243_v45 = vadd.f32 %v4199_v1, %v2838_v59  ;;  %v2853_v1 = vadd.f32 %v9232_v38, %v8782_v57  ;;  %v2859_v57 = vadd.f32 %v8236_v21, %v8792_v22  ;;  %v5799_v21 = vld [vmem:[%s9038_s7 + $0x38] sm:$0xff]  ;;  %v5798_v22 = vld [vmem:[%s9038_s7 + $0x30] sm:$0xff] }
 0x9fe   :  { %6204 = vmatmul.msk.f32.gmra.mxu0 %vm173_vm1, %v5372_v6  ;;  %5861 = vmatpush.msrb.mxu1 %v5799_v21 }
 0x9ff   :  { %6247 = vmatpush.msrb.mxu3 %v5799_v21 }
 0xa00   :  { %5862 = vmatpush.msrb.mxu1 %v5798_v22 }
 0xa01   :  { %6248 = vmatpush.msrb.mxu3 %v5798_v22 }
 0xa02   :  { %5863 = vmatpush.msrb.mxu1 %v5797_v12 }
 0xa03   :  { %6249 = vmatpush.msrb.mxu3 %v5797_v12 }
 0xa04   :  { %v4202_v55 = vpop.f32.mrf.mxu1 }
 0xa05   :  { %v4244_v0 = vadd.f32 %v4202_v55, %v2841_v25 }
 0xa06   :  { %6205 = vmatmul.msk.f32.gmra.mxu0 %vm173_vm1, %v5398_v35  ;;  %v5424_v34 = vpop.f32.mrf.mxu3 }
 0xa0c   :  { %v4205_v58 = vpop.f32.mrf.mxu1 }
 0xa0d   :  { %v4245_v62 = vadd.f32 %v4205_v58, %v2844_v16 }
 0xa0e   :  { %6206 = vmatmul.msk.f32.gmra.mxu0 %vm173_vm1, %v5424_v34 }
 0xa14   :  { %v4208_v10 = vpop.f32.mrf.mxu1  ;;  %v5502_v7 = vpop.f32.mrf.mxu3 }
 0xa15   :  { %v4246_v15 = vadd.f32 %v4208_v10, %v2847_v54 }
 0xa19   :  { %v5450_v3 = vpop.f32.mrf.mxu0 }
 0xa1a   :  { %6207 = vmatmul.msk.f32.gmra.mxu0 %vm173_vm1, %v5450_v3 }
 0xa1c   :  { %v4211_v17 = vpop.f32.mrf.mxu1 }
 0xa1d   :  { %v4247_v3 = vadd.f32 %v4211_v17, %v2850_v33  ;;  %v5794_v17 = vld [vmem:[%s9038_s7 + $0x10] sm:$0xff] }
 0xa21   :  { %v5571_v26 = vpop.f32.mrf.mxu0 }
 0xa22   :  { %v5619_v30 = vadd.f32 %v5571_v26, %v4241_v13 }
 0xa24   :  { %v5639_v52 = vadd.f32 %v8838_v5, %v5619_v30  ;;  %v4214_v34 = vpop.f32.mrf.mxu1 }
 0xa26   :  { %6210 = vmatmul.msk.f32.vlgmr.msrb.gmra.mxu2 %vm56_vm0, %v5639_v52  ;;  %v4248_v52 = vadd.f32 %v4214_v34, %v2853_v1  ;;  %v8922_v34 = vld [vmem:[%s9037_s6] ss:$0 sm:$0xff] }
 0xa29   :  { %v5574_v63 = vpop.f32.mrf.mxu0 }
 0xa2a   :  { %v5620_v29 = vadd.f32 %v5574_v63, %v4242_v48 }
 0xa2c   :  { %v5640_v36 = vadd.f32 %v8838_v5, %v5620_v29  ;;  %v4217_v30 = vpop.f32.mrf.mxu1 }
 0xa2e   :  { %6211 = vmatmul.msk.f32.gmra.mxu2 %vm56_vm0, %v5640_v36  ;;  %v4249_v36 = vadd.f32 %v4217_v30, %v2856_v28 }
 0xa34   :  { %v4220_v29 = vpop.f32.mrf.mxu1 }
 0xa35   :  { %v4250_v59 = vadd.f32 %v4220_v29, %v2859_v57 }
 0xa3b   :  { %v5577_v32 = vpop.f32.mrf.mxu0 }
 0xa3c   :  { %v5621_v61 = vadd.f32 %v5577_v32, %v4243_v45  ;;  %v4223_v45 = vpop.f32.mrf.mxu1 }
 0xa3d   :  { %v5476_v43 = vpop.f32.mrf.mxu2  ;;  %v4251_v11 = vadd.f32 %v4223_v45, %v2862_v20 }
 0xa3e   :  { %v5641_v41 = vadd.f32 %v8838_v5, %v5621_v61  ;;  %6208 = vmatmul.msk.f32.gmra.mxu0 %vm173_vm1, %v5476_v43 }
 0xa40   :  { %6212 = vmatmul.msk.f32.gmra.mxu2 %vm56_vm0, %v5641_v41 }
 0xa43   :  { %v5580_v40 = vpop.f32.mrf.mxu0 }
 0xa44   :  { %v5622_v31 = vadd.f32 %v5580_v40, %v4244_v0  ;;  %v4226_v25 = vpop.f32.mrf.mxu1  ;;  %v5796_v0 = vld [vmem:[%s9038_s7 + $0x20] sm:$0xff] }
 0xa45   :  { %v4252_v40 = vadd.f32 %v4226_v25, %v2865_v53  ;;  %5864 = vmatpush.msrb.mxu1 %v5796_v0  ;;  %6250 = vmatpush.msrb.mxu3 %v5796_v0 }
 0xa46   :  { %v5642_v44 = vadd.f32 %v8838_v5, %v5622_v31  ;;  %6209 = vmatmul.msk.f32.gmra.mxu0 %vm173_vm1, %v5502_v7  ;;  %v5795_v31 = vld [vmem:[%s9038_s7 + $0x18] sm:$0xff]  ;;  %vm5804_vm1 = vcmask 523264  }
 0xa47   :  { %5865 = vmatpush.msrb.mxu1 %v5795_v31  ;;  %6251 = vmatpush.msrb.mxu3 %v5795_v31 }
 0xa48   :  { %6213 = vmatmul.msk.f32.gmra.mxu2 %vm56_vm0, %v5642_v44 }
 0xa49   :  { %5866 = vmatpush.msrb.mxu1 %v5794_v17  ;;  %6252 = vmatpush.msrb.mxu3 %v5794_v17 }
 0xa4b   :  { %v5583_v18 = vpop.f32.mrf.mxu0 }
 0xa4c   :  { %v5623_v47 = vadd.f32 %v5583_v18, %v4245_v62  ;;  %v4229_v14 = vpop.f32.mrf.mxu1 }
 0xa4d   :  { %v4253_v16 = vadd.f32 %v4229_v14, %v2868_v46 }
 0xa4e   :  { %v5643_v6 = vadd.f32 %v8838_v5, %v5623_v47  ;;  %v5793_v47 = vld [vmem:[%s9038_s7 + $0x8] sm:$0xff] }
 0xa4f   :  { %5867 = vmatpush.msrb.mxu1 %v5793_v47  ;;  %6253 = vmatpush.msrb.mxu3 %v5793_v47 }
 0xa50   :  { %6214 = vmatmul.msk.f32.gmra.mxu2 %vm56_vm0, %v5643_v6  ;;  %v5792_v6 = vld [vmem:[%s9038_s7] sm:$0xff] }
 0xa51   :  { %5868 = vmatpush.msrb.mxu1 %v5792_v6  ;;  %6254 = vmatpush.msrb.mxu3 %v5792_v6  ;;  %v6424_v6 = vld [vmem:[%s9039_s8] ss:$0 sm:$0xff] }
 0xa53   :  { %v5586_v35 = vpop.f32.mrf.mxu0 }
 0xa54   :  { %v5624_v37 = vadd.f32 %v5586_v35, %v4246_v15  ;;  %v4232_v9 = vpop.f32.mrf.mxu1 }
 0xa55   :  { %v4254_v54 = vadd.f32 %v4232_v9, %v2871_v24 }
 0xa56   :  { %v5644_v23 = vadd.f32 %v8838_v5, %v5624_v37 }
 0xa58   :  { %6215 = vmatmul.msk.f32.gmra.mxu2 %vm56_vm0, %v5644_v23 }
 0xa5b   :  { %v5589_v27 = vpop.f32.mrf.mxu0 }
 0xa5c   :  { %v5625_v13 = vadd.f32 %v5589_v27, %v4247_v3  ;;  %v4235_v27 = vpop.f32.mrf.mxu1 }
 0xa5e   :  { %v5645_v26 = vadd.f32 %v8838_v5, %v5625_v13  ;;  %v2874_v13 = vadd.f32 %v8307_v49, %v8812_v19 }
 0xa60   :  { %6216 = vmatmul.msk.f32.gmra.mxu2 %vm56_vm0, %v5645_v26  ;;  %v4255_v26 = vadd.f32 %v4235_v27, %v2874_v13 }
 0xa63   :  { %v5592_v60 = vpop.f32.mrf.mxu0 }
 0xa64   :  { %v5626_v48 = vadd.f32 %v5592_v60, %v4248_v52  ;;  %v4238_v52 = vpop.f32.mrf.mxu1  ;;  %v9233_v60 = vld [vmem:[#allocation21_spill] sm:$0xff] }
 0xa66   :  { %v5646_v63 = vadd.f32 %v8838_v5, %v5626_v48  ;;  %v2877_v48 = vadd.f32 %v9233_v60, %v8815_v50 }
 0xa68   :  { %6217 = vmatmul.msk.f32.gmra.mxu2 %vm56_vm0, %v5646_v63  ;;  %v4256_v63 = vadd.f32 %v4238_v52, %v2877_v48 }
 0xa6b   :  { %v5595_v55 = vpop.f32.mrf.mxu0 }
 0xa6c   :  { %v5627_v58 = vadd.f32 %v5595_v55, %v4249_v36 }
 0xa6e   :  { %v5647_v4 = vadd.f32 %v8838_v5, %v5627_v58 }
 0xa70   :  { %6218 = vmatmul.msk.f32.gmra.mxu2 %vm56_vm0, %v5647_v4 }
 0xa73   :  { %v5598_v32 = vpop.f32.mrf.mxu0 }
 0xa74   :  { %v5628_v61 = vadd.f32 %v5598_v32, %v4250_v59 }
 0xa76   :  { %v5648_v41 = vadd.f32 %v8838_v5, %v5628_v61 }
 0xa78   :  { %6219 = vmatmul.msk.f32.gmra.mxu2 %vm56_vm0, %v5648_v41 }
 0xa7b   :  { %v5601_v43 = vpop.f32.mrf.mxu0 }
 0xa7c   :  { %v5629_v51 = vadd.f32 %v5601_v43, %v4251_v11 }
 0xa7e   :  { %v5649_v10 = vadd.f32 %v8838_v5, %v5629_v51 }
 0xa80   :  { %6220 = vmatmul.msk.f32.gmra.mxu2 %vm56_vm0, %v5649_v10 }
 0xa83   :  { %v5604_v7 = vpop.f32.mrf.mxu0 }
 0xa84   :  { %v5630_v44 = vadd.f32 %v5604_v7, %v4252_v40 }
 0xa86   :  { %v5650_v2 = vadd.f32 %v8838_v5, %v5630_v44 }
 0xa88   :  { %6221 = vmatmul.msk.f32.gmra.mxu2 %vm56_vm0, %v5650_v2 }
 0xa8b   :  { %v5607_v62 = vpop.f32.mrf.mxu0 }
 0xa8c   :  { %v5631_v18 = vadd.f32 %v5607_v62, %v4253_v16 }
 0xa8e   :  { %v5651_v56 = vadd.f32 %v8838_v5, %v5631_v18 }
 0xa90   :  { %6222 = vmatmul.msk.f32.gmra.mxu2 %vm56_vm0, %v5651_v56 }
 0xa97   :  { %v5610_v15 = vpop.f32.mrf.mxu0 }
 0xa98   :  { %v5632_v35 = vadd.f32 %v5610_v15, %v4254_v54 }
 0xa9a   :  { %v5652_v37 = vadd.f32 %v8838_v5, %v5632_v35 }
 0xa9c   :  { %6223 = vmatmul.msk.f32.gmra.mxu2 %vm56_vm0, %v5652_v37 }
 0xaa9   :  { %v5728_v23 = vpop.f32.mrf.mxu2 }
 0xaaa   :  { %v5729_v39 = vadd.f32 %v8922_v34, %v5728_v23 }
 0xaac   :  { %v5776_v33 = vmax.f32 %v5729_v39, 0.0 }
 0xaae   :  { %6226 = vmatmul.msk.f32.vlgmr.msrb.gmra.mxu1 %vm5804_vm1, %v5776_v33 }
 0xab1   :  { %v5731_v42 = vpop.f32.mrf.mxu2 }
 0xab2   :  { %v5732_v8 = vadd.f32 %v8922_v34, %v5731_v42 }
 0xab4   :  { %v5777_v3 = vmax.f32 %v5732_v8, 0.0 }
 0xab6   :  { %6227 = vmatmul.msk.f32.gmra.mxu1 %vm5804_vm1, %v5777_v3 }
 0xabb   :  { %v5613_v30 = vpop.f32.mrf.mxu0 }
 0xabc   :  { %v5633_v38 = vadd.f32 %v5613_v30, %v4255_v26 }
 0xabe   :  { %v5653_v1 = vadd.f32 %v8838_v5, %v5633_v38 }
 0xac0   :  { %6224 = vmatmul.msk.f32.gmra.mxu2 %vm56_vm0, %v5653_v1 }
 0xac3   :  { %v5734_v28 = vpop.f32.mrf.mxu2  ;;  %v5616_v29 = vpop.f32.mrf.mxu0 }
 0xac4   :  { %v5735_v36 = vadd.f32 %v8922_v34, %v5734_v28  ;;  %v5634_v55 = vadd.f32 %v5616_v29, %v4256_v63 }
 0xac6   :  { %v5778_v58 = vmax.f32 %v5735_v36, 0.0  ;;  %v5654_v49 = vadd.f32 %v8838_v5, %v5634_v55 }
 0xac8   :  { %6228 = vmatmul.msk.f32.gmra.mxu1 %vm5804_vm1, %v5778_v58  ;;  %6225 = vmatmul.msk.f32.gmra.mxu2 %vm56_vm0, %v5654_v49 }
 0xacb   :  { %v5737_v19 = vpop.f32.mrf.mxu2 }
 0xacc   :  { %v5738_v4 = vadd.f32 %v8922_v34, %v5737_v19 }
 0xace   :  { %v5779_v57 = vmax.f32 %v5738_v4, 0.0 }
 0xad0   :  { %6229 = vmatmul.msk.f32.vlgmr.msrb.gmra.mxu3 %vm5804_vm1, %v5779_v57 }
 0xad3   :  { %v5740_v50 = vpop.f32.mrf.mxu2 }
 0xad4   :  { %v5741_v59 = vadd.f32 %v8922_v34, %v5740_v50 }
 0xad6   :  { %v5780_v45 = vmax.f32 %v5741_v59, 0.0 }
 0xad8   :  { %6230 = vmatmul.msk.f32.gmra.mxu3 %vm5804_vm1, %v5780_v45 }
 0xadb   :  { %v5743_v32 = vpop.f32.mrf.mxu2 }
 0xadc   :  { %v5744_v61 = vadd.f32 %v8922_v34, %v5743_v32 }
 0xade   :  { %v5781_v5 = vmax.f32 %v5744_v61, 0.0 }
 0xae0   :  { %6231 = vmatmul.msk.f32.gmra.mxu3 %vm5804_vm1, %v5781_v5 }
 0xae3   :  { %v5746_v41 = vpop.f32.mrf.mxu2 }
 0xae4   :  { %v5747_v20 = vadd.f32 %v8922_v34, %v5746_v41 }
 0xae6   :  { %v5782_v11 = vmax.f32 %v5747_v20, 0.0 }
 0xae8   :  { %6232 = vmatmul.msk.f32.gmra.mxu3 %vm5804_vm1, %v5782_v11 }
 0xaeb   :  { %v5749_v43 = vpop.f32.mrf.mxu2 }
 0xaec   :  { %v5750_v51 = vadd.f32 %v8922_v34, %v5749_v43 }
 0xaee   :  { %v5783_v21 = vmax.f32 %v5750_v51, 0.0 }
 0xaf0   :  { %6233 = vmatmul.msk.f32.gmra.mxu3 %vm5804_vm1, %v5783_v21 }
 0xaf3   :  { %v5752_v22 = vpop.f32.mrf.mxu2 }
 0xaf4   :  { %v5753_v25 = vadd.f32 %v8922_v34, %v5752_v22 }
 0xaf6   :  { %v5784_v10 = vmax.f32 %v5753_v25, 0.0 }
 0xaf8   :  { %6234 = vmatmul.msk.f32.gmra.mxu3 %vm5804_vm1, %v5784_v10 }
 0xafb   :  { %v5755_v12 = vpop.f32.mrf.mxu2 }
 0xafc   :  { %v5756_v53 = vadd.f32 %v8922_v34, %v5755_v12 }
 0xafe   :  { %v5785_v0 = vmax.f32 %v5756_v53, 0.0 }
 0xb00   :  { %6235 = vmatmul.msk.f32.gmra.mxu3 %vm5804_vm1, %v5785_v0 }
 0xb03   :  { %v5758_v40 = vpop.f32.mrf.mxu2 }
 0xb04   :  { %v5759_v31 = vadd.f32 %v8922_v34, %v5758_v40 }
 0xb06   :  { %v5786_v7 = vmax.f32 %v5759_v31, 0.0 }
 0xb08   :  { %6236 = vmatmul.msk.f32.gmra.mxu3 %vm5804_vm1, %v5786_v7 }
 0xb0b   :  { %v5761_v44 = vpop.f32.mrf.mxu2 }
 0xb0c   :  { %v5762_v2 = vadd.f32 %v8922_v34, %v5761_v44 }
 0xb0e   :  { %v5787_v14 = vmax.f32 %v5762_v2, 0.0 }
 0xb10   :  { %6237 = vmatmul.msk.f32.gmra.mxu3 %vm5804_vm1, %v5787_v14 }
 0xb13   :  { %v5764_v46 = vpop.f32.mrf.mxu2 }
 0xb14   :  { %v5765_v16 = vadd.f32 %v8922_v34, %v5764_v46 }
 0xb16   :  { %v5788_v62 = vmax.f32 %v5765_v16, 0.0 }
 0xb18   :  { %6238 = vmatmul.msk.f32.gmra.mxu3 %vm5804_vm1, %v5788_v62 }
 0xb1f   :  { %v5767_v17 = vpop.f32.mrf.mxu2 }
 0xb20   :  { %v5768_v18 = vadd.f32 %v8922_v34, %v5767_v17 }
 0xb22   :  { %v5789_v47 = vmax.f32 %v5768_v18, 0.0 }
 0xb24   :  { %6239 = vmatmul.msk.f32.gmra.mxu3 %vm5804_vm1, %v5789_v47 }
 0xb2b   :  { %v5870_v56 = vpop.f32.mrf.mxu1 }
 0xb2c   :  { %v5871_v9 = vadd.f32 %v6424_v6, %v5870_v56 }
 0xb2e   :  { %5918 = vst.msk [vmem:[%s9040_s9] sm:$0xff] %vm56_vm0, %v5871_v9 }
 0xb33   :  { %v5873_v24 = vpop.f32.mrf.mxu1 }
 0xb34   :  { %v5874_v54 = vadd.f32 %v6424_v6, %v5873_v24 }
 0xb36   :  { %5919 = vst.msk [vmem:[%s9040_s9 + $0x8] sm:$0xff] %vm56_vm0, %v5874_v54 }
 0xb43   :  { %v5770_v15 = vpop.f32.mrf.mxu2 }
 0xb44   :  { %v5771_v35 = vadd.f32 %v8922_v34, %v5770_v15 }
 0xb45   :  { %v5876_v37 = vpop.f32.mrf.mxu1 }
 0xb46   :  { %v5877_v23 = vadd.f32 %v6424_v6, %v5876_v37  ;;  %v5790_v39 = vmax.f32 %v5771_v35, 0.0 }
 0xb48   :  { %5920 = vst.msk [vmem:[%s9040_s9 + $0x10] sm:$0xff] %vm56_vm0, %v5877_v23  ;;  %6240 = vmatmul.msk.f32.gmra.mxu3 %vm5804_vm1, %v5790_v39 }
 0xb4b   :  { %v5773_v33 = vpop.f32.mrf.mxu2 }
 0xb4c   :  { %v5774_v42 = vadd.f32 %v8922_v34, %v5773_v33 }
 0xb4e   :  { %v5791_v8 = vmax.f32 %v5774_v42, 0.0 }
 0xb50   :  { %6241 = vmatmul.msk.f32.gmra.mxu3 %vm5804_vm1, %v5791_v8 }
 0xb53   :  { %v5879_v3 = vpop.f32.mrf.mxu3 }
 0xb54   :  { %v5880_v27 = vadd.f32 %v6424_v6, %v5879_v3 }
 0xb56   :  { %5921 = vst.msk [vmem:[%s9040_s9 + $0x18] sm:$0xff] %vm56_vm0, %v5880_v27 }
 0xb5b   :  { %v5882_v13 = vpop.f32.mrf.mxu3 }
 0xb5c   :  { %v5883_v26 = vadd.f32 %v6424_v6, %v5882_v13 }
 0xb5e   :  { %5922 = vst.msk [vmem:[%s9040_s9 + $0x20] sm:$0xff] %vm56_vm0, %v5883_v26 }
 0xb63   :  { %v5885_v30 = vpop.f32.mrf.mxu3 }
 0xb64   :  { %v5886_v38 = vadd.f32 %v6424_v6, %v5885_v30 }
 0xb66   :  { %5923 = vst.msk [vmem:[%s9040_s9 + $0x28] sm:$0xff] %vm56_vm0, %v5886_v38 }
 0xb6b   :  { %v5888_v34 = vpop.f32.mrf.mxu3 }
 0xb6c   :  { %v5889_v1 = vadd.f32 %v6424_v6, %v5888_v34 }
 0xb6e   :  { %5924 = vst.msk [vmem:[%s9040_s9 + $0x30] sm:$0xff] %vm56_vm0, %v5889_v1 }
 0xb73   :  { %v5891_v52 = vpop.f32.mrf.mxu3 }
 0xb74   :  { %v5892_v60 = vadd.f32 %v6424_v6, %v5891_v52 }
 0xb76   :  { %5925 = vst.msk [vmem:[%s9040_s9 + $0x38] sm:$0xff] %vm56_vm0, %v5892_v60 }
 0xb7b   :  { %v5894_v48 = vpop.f32.mrf.mxu3 }
 0xb7c   :  { %v5895_v63 = vadd.f32 %v6424_v6, %v5894_v48 }
 0xb7e   :  { %5926 = vst.msk [vmem:[%s9040_s9 + $0x40] sm:$0xff] %vm56_vm0, %v5895_v63 }
 0xb83   :  { %v5897_v28 = vpop.f32.mrf.mxu3 }
 0xb84   :  { %v5898_v29 = vadd.f32 %v6424_v6, %v5897_v28 }
 0xb86   :  { %5927 = vst.msk [vmem:[%s9040_s9 + $0x48] sm:$0xff] %vm56_vm0, %v5898_v29 }
 0xb8b   :  { %v5900_v36 = vpop.f32.mrf.mxu3 }
 0xb8c   :  { %v5901_v55 = vadd.f32 %v6424_v6, %v5900_v36 }
 0xb8e   :  { %5928 = vst.msk [vmem:[%s9040_s9 + $0x50] sm:$0xff] %vm56_vm0, %v5901_v55 }
 0xb93   :  { %v5903_v58 = vpop.f32.mrf.mxu3 }
 0xb94   :  { %v5904_v49 = vadd.f32 %v6424_v6, %v5903_v58 }
 0xb96   :  { %5929 = vst.msk [vmem:[%s9040_s9 + $0x58] sm:$0xff] %vm56_vm0, %v5904_v49 }
 0xb9b   :  { %v5906_v19 = vpop.f32.mrf.mxu3 }
 0xb9c   :  { %v5907_v4 = vadd.f32 %v6424_v6, %v5906_v19 }
 0xb9e   :  { %5930 = vst.msk [vmem:[%s9040_s9 + $0x60] sm:$0xff] %vm56_vm0, %v5907_v4 }
 0xba7   :  { %v5909_v57 = vpop.f32.mrf.mxu3 }
 0xba8   :  { %v5910_v50 = vadd.f32 %v6424_v6, %v5909_v57 }
 0xbaa   :  { %5931 = vst.msk [vmem:[%s9040_s9 + $0x68] sm:$0xff] %vm56_vm0, %v5910_v50 }
 0xbcb   :  { %v5912_v59 = vpop.f32.mrf.mxu3 }
 0xbcc   :  { %v5913_v45 = vadd.f32 %v6424_v6, %v5912_v59 }
 0xbce   :  { %5932 = vst.msk [vmem:[%s9040_s9 + $0x70] sm:$0xff] %vm56_vm0, %v5913_v45 }
 0xbd3   :  { %v5915_v32 = vpop.f32.mrf.mxu3 }
 0xbd4   :  { %v5916_v61 = vadd.f32 %v6424_v6, %v5915_v32 }
 0xbd6   :  { %5933 = vst.msk [vmem:[%s9040_s9 + $0x78] sm:$0xff] %vm56_vm0, %v5916_v61 }

</bundles_post_ra>
